<compile_context>
chip_gen: v5e
topology: v5e:2x2
jax: 0.10.0
libtpu: 0.0.40
codegen_flags: <defaults>
</compile_context>

<pallas_src>
import functools

import jax
import jax.numpy as jnp
from jax.experimental import pallas as pl
from jax.experimental.pallas import tpu as pltpu


def attention_kernel(x_ref, wqkv_ref, wproj_ref, bproj_ref, bias_ref,
                     out_ref, attn_ref, qkv_ref, ctx_ref,
                     *, num_heads, head_dim, block_b, seq):
    """One grid step == one block of `block_b` batch elements (all in VMEM)."""
    C = num_heads * head_dim
    T = block_b * seq

    # ---- qkv projection: one wide MXU matmul over all block_b*seq tokens ----
    # bf16 operands (scale pre-folded into the q columns of W_qkv), f32 acc.
    # Result is rounded to bf16 and parked in VMEM scratch so the big (T, 3C)
    # tensor is never live in vregs across the head loop.
    x2 = x_ref[...].reshape(T, C)                                   # (T, C) bf16
    qkv = jnp.dot(x2, wqkv_ref[...],
                  preferred_element_type=jnp.float32)               # (T, 3C) f32
    qkv_ref[...] = qkv.astype(jnp.bfloat16)

    # Group heads so each ctx write spans a full 128-lane slab.
    hpg = max(1, min(num_heads, 128 // head_dim))
    while num_heads % hpg:
        hpg -= 1

    # ---- per-head attention, batched over the batch-block axis ----
    for g in range(num_heads // hpg):
        group_out = []
        for hh in range(hpg):
            h = g * hpg + hh
            lo = h * head_dim
            # bf16 q/k/v slices straight from the scratch (MXU-native dtype).
            q = qkv_ref[:, lo:lo + head_dim].reshape(block_b, seq, head_dim)
            k = qkv_ref[:, C + lo:C + lo + head_dim].reshape(
                block_b, seq, head_dim)
            v = qkv_ref[:, 2 * C + lo:2 * C + lo + head_dim].reshape(
                block_b, seq, head_dim)

            # scaled scores (scale already in q) + relative position bias
            s = jnp.einsum("bqd,bkd->bqk", q, k,
                           preferred_element_type=jnp.float32)      # (bb, N, N)
            s = s + bias_ref[h][None]

            # numerically stable softmax in f32; divide -> EUP reciprocal
            s = s - jnp.max(s, axis=-1, keepdims=True)
            e = jnp.exp(s)
            p = e * pl.reciprocal(jnp.sum(e, axis=-1, keepdims=True),
                                  approx=True)

            # attention map writeback (bf16 halves the dominant HBM term)
            attn_ref[:, h, :, :] = p.astype(attn_ref.dtype)

            # p @ v with bf16 MXU inputs, f32 accumulation
            o = jnp.einsum("bqk,bkd->bqd",
                           p.astype(jnp.bfloat16), v,
                           preferred_element_type=jnp.float32)      # (bb, N, hd)
            group_out.append(o.reshape(T, head_dim))

        # One full-width (128-lane) slab store per head group.
        lane_lo = g * hpg * head_dim
        slab = group_out[0] if hpg == 1 else jnp.concatenate(group_out, axis=-1)
        ctx_ref[:, lane_lo:lane_lo + hpg * head_dim] = slab.astype(jnp.bfloat16)

    # ---- output projection: one wide MXU matmul + bias ----
    y = jnp.dot(ctx_ref[...], wproj_ref[...],
                preferred_element_type=jnp.float32) + bproj_ref[...]
    out_ref[...] = y.reshape(block_b, seq, C).astype(out_ref.dtype)


def _vmem_bytes(block_b, seq, C, num_heads):
    """Rough per-grid-step VMEM estimate (double-buffered blocks + scratch)."""
    T = block_b * seq
    bf, f4 = 2, 4
    dbuf = 2 * (T * C * bf                                   # x block (bf16)
                + T * C * bf                                 # out block (bf16)
                + block_b * num_heads * seq * seq * bf       # attn block (bf16)
                + num_heads * seq * seq * f4                 # rel bias (f32)
                + C * 3 * C * bf                             # W_qkv (bf16)
                + C * C * bf                                 # W_proj (bf16)
                + C * f4)                                    # b_proj (f32)
    scratch = T * 3 * C * bf + T * C * bf                    # qkv + ctx scratch
    live = T * 3 * C * f4 + 4 * block_b * seq * seq * f4     # f32 qkv + softmax
    return dbuf + scratch + live


def _pick_block_b(B, seq, C, num_heads, *, vmem_budget=40 << 20, max_rows=512):
    """Largest batch block dividing B whose token block (block_b*seq rows)
    stays reasonable and whose VMEM estimate fits the budget (v7x-safe)."""
    best = 1
    for cand in range(1, B + 1):
        if B % cand:
            continue
        if cand * seq > max_rows:
            continue
        if _vmem_bytes(cand, seq, C, num_heads) > vmem_budget:
            continue
        best = cand
    return best


def attention_forward(x, w_qkv, w_proj, b_proj, rel_bias, *, num_heads, scale,
                      block_b=None):
    B, N, C = x.shape
    assert C % num_heads == 0
    head_dim = C // num_heads
    if block_b is None:
        block_b = _pick_block_b(B, N, C, num_heads)
    assert B % block_b == 0

    # Wrapper-side prep (pure JAX glue): fold `scale` into the q columns,
    # pre-cast MXU operands to bf16 once (halves HBM/DMA bytes too).
    w_qkv_bf = w_qkv.at[:, :C].multiply(scale).astype(jnp.bfloat16)
    w_proj_bf = w_proj.astype(jnp.bfloat16)
    x_bf = x.astype(jnp.bfloat16)
    b_proj_f = b_proj.reshape(1, C).astype(jnp.float32)
    rel_bias_f = rel_bias.astype(jnp.float32)

    kernel = functools.partial(attention_kernel, num_heads=num_heads,
                               head_dim=head_dim, block_b=block_b, seq=N)

    out_shapes = (
        jax.ShapeDtypeStruct((B, N, C), jnp.bfloat16),
        jax.ShapeDtypeStruct((B, num_heads, N, N), jnp.bfloat16),
    )

    vmem_limit = int(min(48 << 20,
                         max(32 << 20, 2 * _vmem_bytes(block_b, N, C, num_heads))))

    grid_spec = pltpu.PrefetchScalarGridSpec(
        num_scalar_prefetch=0,
        grid=(B // block_b,),
        in_specs=[
            pl.BlockSpec((block_b, N, C), lambda b: (b, 0, 0)),          # x (bf16)
            pl.BlockSpec((C, 3 * C), lambda b: (0, 0)),                  # W_qkv^T
            pl.BlockSpec((C, C), lambda b: (0, 0)),                      # W_proj^T
            pl.BlockSpec((1, C), lambda b: (0, 0)),                      # b_proj
            pl.BlockSpec((num_heads, N, N), lambda b: (0, 0, 0)),        # rel bias
        ],
        out_specs=[
            pl.BlockSpec((block_b, N, C), lambda b: (b, 0, 0)),          # out
            pl.BlockSpec((block_b, num_heads, N, N),
                         lambda b: (b, 0, 0, 0)),                        # attn map
        ],
        scratch_shapes=[
            pltpu.VMEM((block_b * N, 3 * C), jnp.bfloat16),              # qkv
            pltpu.VMEM((block_b * N, C), jnp.bfloat16),                  # ctx
        ],
    )

    return pl.pallas_call(
        kernel,
        out_shape=out_shapes,
        grid_spec=grid_spec,
        compiler_params=pltpu.CompilerParams(
            dimension_semantics=("parallel",),
            vmem_limit_bytes=vmem_limit),
    )(x_bf, w_qkv_bf, w_proj_bf, b_proj_f, rel_bias_f)


def make_relative_position_bias(table, window_size, num_heads):
    """Glue (plain JAX): gather relative-position bias from the learned table."""
    coords_h = jnp.arange(window_size)
    coords_w = jnp.arange(window_size)
    coords = jnp.stack(jnp.meshgrid(coords_h, coords_w, indexing="ij"))   # (2,w,w)
    coords_flatten = coords.reshape(2, -1)                                # (2,ww)
    rel = coords_flatten[:, :, None] - coords_flatten[:, None, :]         # (2,ww,ww)
    rel = jnp.transpose(rel, (1, 2, 0))                                   # (ww,ww,2)
    rel = rel.at[:, :, 0].add(window_size - 1)
    rel = rel.at[:, :, 1].add(window_size - 1)
    rel = rel.at[:, :, 0].multiply(2 * window_size - 1)
    rel_idx = rel.sum(-1)                                                 # (ww,ww)
    ww = window_size * window_size
    bias = table[rel_idx.reshape(-1)].reshape(ww, ww, num_heads)          # (ww,ww,H)
    bias = jnp.transpose(bias, (2, 0, 1))                                 # (H,ww,ww)
    return bias


def reference_forward(x, w_qkv, w_proj, b_proj, rel_bias, num_heads, scale):
    """Pure-JAX reference matching the PyTorch forward (eval mode), mirroring
    the kernel's bf16-input / f32-accumulate recipe so the check stays tight."""
    B, N, C = x.shape
    hd = C // num_heads
    f32, bf16 = jnp.float32, jnp.bfloat16

    xq = x.astype(bf16).astype(f32)
    wq = w_qkv.at[:, :C].multiply(scale).astype(bf16).astype(f32)
    qkv = xq @ wq                                                         # (B,N,3C)
    qkv = qkv.astype(bf16).astype(f32)          # mirrors the bf16 qkv scratch
    qkv = qkv.reshape(B, N, 3, num_heads, hd).transpose(2, 0, 3, 1, 4)
    q, k, v = qkv[0], qkv[1], qkv[2]                                      # (B,H,N,hd)
    attn = jnp.einsum("bhnd,bhmd->bhnm", q, k) + rel_bias[None]
    attn = jax.nn.softmax(attn, axis=-1)

    pq = attn.astype(bf16).astype(f32)
    ctx = jnp.einsum("bhnm,bhmd->bhnd", pq, v)
    ctx = ctx.transpose(0, 2, 1, 3).reshape(B, N, C)
    ctx = ctx.astype(bf16).astype(f32)
    out = ctx @ w_proj.astype(bf16).astype(f32) + b_proj.reshape(1, C)
    return out, attn


if __name__ == "__main__":
    # Small shapes consistent with the module: window_size=2 => N = 4 tokens.
    # dim=128 keeps C lane-dense; the picker chooses block_b=8 -> grid=(1,).
    B = 8
    dim = 128
    num_heads = 4
    window_size = 2
    N = window_size * window_size
    head_dim = dim // num_heads
    scale = head_dim ** (-0.5)

    key = jax.random.PRNGKey(0)
    kx, kqkv, kproj, kpb, ktab = jax.random.split(key, 5)

    x = jax.random.normal(kx, (B, N, dim), dtype=jnp.float32)

    # nn.Linear(dim, 3*dim, bias=False): weight (3C, C). We store transposed.
    w_qkv = (jax.random.normal(kqkv, (dim, 3 * dim), dtype=jnp.float32)
             * (1.0 / jnp.sqrt(dim)))
    # nn.Linear(dim, dim): weight (C, C) + bias (C,). Stored transposed.
    w_proj = (jax.random.normal(kproj, (dim, dim), dtype=jnp.float32)
              * (1.0 / jnp.sqrt(dim)))
    b_proj = 0.01 * jax.random.normal(kpb, (1, dim), dtype=jnp.float32)

    # relative_position_bias_table: ((2w-1)^2, H), trunc_normal(std=0.02)
    table = 0.02 * jnp.clip(
        jax.random.normal(ktab, ((2 * window_size - 1) ** 2, num_heads),
                          dtype=jnp.float32), -2.0, 2.0)
    rel_bias = make_relative_position_bias(table, window_size, num_heads)

    out, attn_map = attention_forward(
        x, w_qkv, w_proj, b_proj, rel_bias,
        num_heads=num_heads, scale=scale)
    out = jax.block_until_ready(out)
    attn_map = jax.block_until_ready(attn_map)

    # correctness check against pure-JAX reference (bf16-matched recipe;
    # tolerance covers bf16 rounding + approx reciprocal)
    ref_out, ref_attn = reference_forward(
        x, w_qkv, w_proj, b_proj, rel_bias, num_heads, scale)
    assert out.shape == (B, N, dim)
    assert attn_map.shape == (B, num_heads, N, N)
    assert jnp.allclose(out.astype(jnp.float32), ref_out, atol=3e-2, rtol=3e-2)
    assert jnp.allclose(attn_map.astype(jnp.float32), ref_attn,
                        atol=2e-2, rtol=2e-2)

    print("KERNEL_OK")
</pallas_src>

<mosaic_0001>
module attributes {stable_mosaic.version = 11 : i64} {
  func.func @attention_kernel(%arg0: i32, %arg1: memref<8x4x128xbf16, #tpu.memory_space<vmem>>, %arg2: memref<128x384xbf16, #tpu.memory_space<vmem>>, %arg3: memref<128x128xbf16, #tpu.memory_space<vmem>>, %arg4: memref<1x128xf32, #tpu.memory_space<vmem>>, %arg5: memref<4x4x4xf32, #tpu.memory_space<vmem>>, %arg6: memref<8x4x128xbf16, #tpu.memory_space<vmem>>, %arg7: memref<8x4x4x4xbf16, #tpu.memory_space<vmem>>, %arg8: memref<32x384xbf16, #tpu.memory_space<vmem>>, %arg9: memref<32x128xbf16, #tpu.memory_space<vmem>>) attributes {dimension_semantics = [#tpu.dimension_semantics<parallel>], iteration_bounds = array<i64: 1>, scalar_prefetch = 0 : i64, scratch_operands = 2 : i64, tpu.core_type = #tpu.core_type<tc>, window_params = [{transform_indices = @transform_0, window_bounds = array<i64: 8, 4, 128>}, {pipeline_mode = #tpu.pipeline_mode<synchronous>, transform_indices = @transform_1, window_bounds = array<i64: 128, 384>}, {pipeline_mode = #tpu.pipeline_mode<synchronous>, transform_indices = @transform_2, window_bounds = array<i64: 128, 128>}, {pipeline_mode = #tpu.pipeline_mode<synchronous>, transform_indices = @transform_3, window_bounds = array<i64: 1, 128>}, {pipeline_mode = #tpu.pipeline_mode<synchronous>, transform_indices = @transform_4, window_bounds = array<i64: 4, 4, 4>}, {transform_indices = @transform_5, window_bounds = array<i64: 8, 4, 128>}, {transform_indices = @transform_6, window_bounds = array<i64: 8, 4, 4, 4>}]} {
    %c0 = arith.constant 0 : index
    %c0_0 = arith.constant 0 : index
    %c0_1 = arith.constant 0 : index
    %0 = vector.load %arg1[%c0, %c0_0, %c0_1] : memref<8x4x128xbf16, #tpu.memory_space<vmem>>, vector<8x4x128xbf16>
    %1 = vector.shape_cast %0 : vector<8x4x128xbf16> to vector<32x128xbf16>
    %c0_2 = arith.constant 0 : index
    %c0_3 = arith.constant 0 : index
    %2 = vector.load %arg2[%c0_2, %c0_3] : memref<128x384xbf16, #tpu.memory_space<vmem>>, vector<128x384xbf16>
    %cst = arith.constant dense<0.000000e+00> : vector<32x384xf32>
    %3 = tpu.matmul %1, %2, %cst {dimension_numbers = #tpu.dot_dimension_numbers<[1], [0], [0], [1], [0, 0, 1, 1], [], []>} : vector<32x128xbf16>, vector<128x384xbf16>, vector<32x384xf32> -> vector<32x384xf32>
    %4 = arith.truncf %3 : vector<32x384xf32> to vector<32x384xbf16>
    %c0_4 = arith.constant 0 : index
    %c0_5 = arith.constant 0 : index
    %5 = vector.load %arg8[%c0_4, %c0_5] : memref<32x384xbf16, #tpu.memory_space<vmem>>, vector<32x384xbf16>
    tpu.vector_store %arg8[%c0_4, %c0_5], %4 {strides = array<i32>} : memref<32x384xbf16, #tpu.memory_space<vmem>>, vector<32x384xbf16>,
    %c0_6 = arith.constant 0 : index
    %c0_7 = arith.constant 0 : index
    %6 = vector.load %arg8[%c0_6, %c0_7] : memref<32x384xbf16, #tpu.memory_space<vmem>>, vector<32x32xbf16>
    %7 = vector.shape_cast %6 : vector<32x32xbf16> to vector<8x4x32xbf16>
    %c0_8 = arith.constant 0 : index
    %c128 = arith.constant 128 : index
    %8 = vector.load %arg8[%c0_8, %c128] : memref<32x384xbf16, #tpu.memory_space<vmem>>, vector<32x32xbf16>
    %9 = vector.shape_cast %8 : vector<32x32xbf16> to vector<8x4x32xbf16>
    %c0_9 = arith.constant 0 : index
    %c256 = arith.constant 256 : index
    %10 = vector.load %arg8[%c0_9, %c256] : memref<32x384xbf16, #tpu.memory_space<vmem>>, vector<32x32xbf16>
    %11 = vector.shape_cast %10 : vector<32x32xbf16> to vector<8x4x32xbf16>
    "tpu.trace_start"() <{level = 10 : i32, message = "bqd,bkd->bqk"}> : () -> ()
    %cst_10 = arith.constant dense<0.000000e+00> : vector<8x4x4xf32>
    %12 = tpu.matmul %7, %9, %cst_10 {dimension_numbers = #tpu.dot_dimension_numbers<[2], [2], [1], [1], [0, 0, 0, 1, 1, 1], [0], [0]>} : vector<8x4x32xbf16>, vector<8x4x32xbf16>, vector<8x4x4xf32> -> vector<8x4x4xf32>
    "tpu.trace_stop"() : () -> ()
    %c0_11 = arith.constant 0 : index
    %c0_12 = arith.constant 0 : index
    %c0_13 = arith.constant 0 : index
    %13 = vector.load %arg5[%c0_11, %c0_12, %c0_13] : memref<4x4x4xf32, #tpu.memory_space<vmem>>, vector<1x4x4xf32>
    %14 = vector.shape_cast %13 : vector<1x4x4xf32> to vector<4x4xf32>
    %15 = vector.shape_cast %14 : vector<4x4xf32> to vector<1x4x4xf32>
    %16 = vector.broadcast %15 : vector<1x4x4xf32> to vector<8x4x4xf32>
    %17 = arith.addf %12, %16 : vector<8x4x4xf32>
    %cst_14 = arith.constant dense<0xFF800000> : vector<8x4xf32>
    %18 = vector.multi_reduction <maximumf>, %17, %cst_14 [2] : vector<8x4x4xf32> to vector<8x4xf32>
    %19 = vector.shape_cast %18 : vector<8x4xf32> to vector<8x4x1xf32>
    %20 = vector.broadcast %19 : vector<8x4x1xf32> to vector<8x4x4xf32>
    %21 = arith.subf %17, %20 : vector<8x4x4xf32>
    %22 = math.exp %21 : vector<8x4x4xf32>
    %cst_15 = arith.constant dense<0.000000e+00> : vector<8x4xf32>
    %23 = vector.multi_reduction <add>, %22, %cst_15 [2] : vector<8x4x4xf32> to vector<8x4xf32>
    %24 = vector.shape_cast %23 : vector<8x4xf32> to vector<8x4x1xf32>
    %25 = tpu.reciprocal %24 {approx = true} : vector<8x4x1xf32> -> vector<8x4x1xf32>
    %26 = vector.broadcast %25 : vector<8x4x1xf32> to vector<8x4x4xf32>
    %27 = arith.mulf %22, %26 : vector<8x4x4xf32>
    %28 = arith.truncf %27 : vector<8x4x4xf32> to vector<8x4x4xbf16>
    %c0_16 = arith.constant 0 : index
    %c0_17 = arith.constant 0 : index
    %c0_18 = arith.constant 0 : index
    %c0_19 = arith.constant 0 : index
    %29 = vector.load %arg7[%c0_16, %c0_17, %c0_18, %c0_19] : memref<8x4x4x4xbf16, #tpu.memory_space<vmem>>, vector<8x1x4x4xbf16>
    %30 = vector.shape_cast %29 : vector<8x1x4x4xbf16> to vector<8x4x4xbf16>
    %31 = vector.shape_cast %28 : vector<8x4x4xbf16> to vector<8x1x4x4xbf16>
    tpu.vector_store %arg7[%c0_16, %c0_17, %c0_18, %c0_19], %31 {strides = array<i32>} : memref<8x4x4x4xbf16, #tpu.memory_space<vmem>>, vector<8x1x4x4xbf16>,
    %32 = arith.truncf %27 : vector<8x4x4xf32> to vector<8x4x4xbf16>
    "tpu.trace_start"() <{level = 10 : i32, message = "bqk,bkd->bqd"}> : () -> ()
    %cst_20 = arith.constant dense<0.000000e+00> : vector<8x4x32xf32>
    %33 = tpu.matmul %32, %11, %cst_20 {dimension_numbers = #tpu.dot_dimension_numbers<[2], [1], [1], [2], [0, 0, 0, 1, 1, 2], [0], [0]>} : vector<8x4x4xbf16>, vector<8x4x32xbf16>, vector<8x4x32xf32> -> vector<8x4x32xf32>
    "tpu.trace_stop"() : () -> ()
    %34 = vector.shape_cast %33 : vector<8x4x32xf32> to vector<32x32xf32>
    %c0_21 = arith.constant 0 : index
    %c32 = arith.constant 32 : index
    %35 = vector.load %arg8[%c0_21, %c32] : memref<32x384xbf16, #tpu.memory_space<vmem>>, vector<32x32xbf16>
    %36 = vector.shape_cast %35 : vector<32x32xbf16> to vector<8x4x32xbf16>
    %c0_22 = arith.constant 0 : index
    %c160 = arith.constant 160 : index
    %37 = vector.load %arg8[%c0_22, %c160] : memref<32x384xbf16, #tpu.memory_space<vmem>>, vector<32x32xbf16>
    %38 = vector.shape_cast %37 : vector<32x32xbf16> to vector<8x4x32xbf16>
    %c0_23 = arith.constant 0 : index
    %c288 = arith.constant 288 : index
    %39 = vector.load %arg8[%c0_23, %c288] : memref<32x384xbf16, #tpu.memory_space<vmem>>, vector<32x32xbf16>
    %40 = vector.shape_cast %39 : vector<32x32xbf16> to vector<8x4x32xbf16>
    "tpu.trace_start"() <{level = 10 : i32, message = "bqd,bkd->bqk"}> : () -> ()
    %cst_24 = arith.constant dense<0.000000e+00> : vector<8x4x4xf32>
    %41 = tpu.matmul %36, %38, %cst_24 {dimension_numbers = #tpu.dot_dimension_numbers<[2], [2], [1], [1], [0, 0, 0, 1, 1, 1], [0], [0]>} : vector<8x4x32xbf16>, vector<8x4x32xbf16>, vector<8x4x4xf32> -> vector<8x4x4xf32>
    "tpu.trace_stop"() : () -> ()
    %c1 = arith.constant 1 : index
    %c0_25 = arith.constant 0 : index
    %c0_26 = arith.constant 0 : index
    %42 = vector.load %arg5[%c1, %c0_25, %c0_26] : memref<4x4x4xf32, #tpu.memory_space<vmem>>, vector<1x4x4xf32>
    %43 = vector.shape_cast %42 : vector<1x4x4xf32> to vector<4x4xf32>
    %44 = vector.shape_cast %43 : vector<4x4xf32> to vector<1x4x4xf32>
    %45 = vector.broadcast %44 : vector<1x4x4xf32> to vector<8x4x4xf32>
    %46 = arith.addf %41, %45 : vector<8x4x4xf32>
    %cst_27 = arith.constant dense<0xFF800000> : vector<8x4xf32>
    %47 = vector.multi_reduction <maximumf>, %46, %cst_27 [2] : vector<8x4x4xf32> to vector<8x4xf32>
    %48 = vector.shape_cast %47 : vector<8x4xf32> to vector<8x4x1xf32>
    %49 = vector.broadcast %48 : vector<8x4x1xf32> to vector<8x4x4xf32>
    %50 = arith.subf %46, %49 : vector<8x4x4xf32>
    %51 = math.exp %50 : vector<8x4x4xf32>
    %cst_28 = arith.constant dense<0.000000e+00> : vector<8x4xf32>
    %52 = vector.multi_reduction <add>, %51, %cst_28 [2] : vector<8x4x4xf32> to vector<8x4xf32>
    %53 = vector.shape_cast %52 : vector<8x4xf32> to vector<8x4x1xf32>
    %54 = tpu.reciprocal %53 {approx = true} : vector<8x4x1xf32> -> vector<8x4x1xf32>
    %55 = vector.broadcast %54 : vector<8x4x1xf32> to vector<8x4x4xf32>
    %56 = arith.mulf %51, %55 : vector<8x4x4xf32>
    %57 = arith.truncf %56 : vector<8x4x4xf32> to vector<8x4x4xbf16>
    %c0_29 = arith.constant 0 : index
    %c1_30 = arith.constant 1 : index
    %c0_31 = arith.constant 0 : index
    %c0_32 = arith.constant 0 : index
    %58 = vector.load %arg7[%c0_29, %c1_30, %c0_31, %c0_32] : memref<8x4x4x4xbf16, #tpu.memory_space<vmem>>, vector<8x1x4x4xbf16>
    %59 = vector.shape_cast %58 : vector<8x1x4x4xbf16> to vector<8x4x4xbf16>
    %60 = vector.shape_cast %57 : vector<8x4x4xbf16> to vector<8x1x4x4xbf16>
    tpu.vector_store %arg7[%c0_29, %c1_30, %c0_31, %c0_32], %60 {strides = array<i32>} : memref<8x4x4x4xbf16, #tpu.memory_space<vmem>>, vector<8x1x4x4xbf16>,
    %61 = arith.truncf %56 : vector<8x4x4xf32> to vector<8x4x4xbf16>
    "tpu.trace_start"() <{level = 10 : i32, message = "bqk,bkd->bqd"}> : () -> ()
    %cst_33 = arith.constant dense<0.000000e+00> : vector<8x4x32xf32>
    %62 = tpu.matmul %61, %40, %cst_33 {dimension_numbers = #tpu.dot_dimension_numbers<[2], [1], [1], [2], [0, 0, 0, 1, 1, 2], [0], [0]>} : vector<8x4x4xbf16>, vector<8x4x32xbf16>, vector<8x4x32xf32> -> vector<8x4x32xf32>
    "tpu.trace_stop"() : () -> ()
    %63 = vector.shape_cast %62 : vector<8x4x32xf32> to vector<32x32xf32>
    %c0_34 = arith.constant 0 : index
    %c64 = arith.constant 64 : index
    %64 = vector.load %arg8[%c0_34, %c64] : memref<32x384xbf16, #tpu.memory_space<vmem>>, vector<32x32xbf16>
    %65 = vector.shape_cast %64 : vector<32x32xbf16> to vector<8x4x32xbf16>
    %c0_35 = arith.constant 0 : index
    %c192 = arith.constant 192 : index
    %66 = vector.load %arg8[%c0_35, %c192] : memref<32x384xbf16, #tpu.memory_space<vmem>>, vector<32x32xbf16>
    %67 = vector.shape_cast %66 : vector<32x32xbf16> to vector<8x4x32xbf16>
    %c0_36 = arith.constant 0 : index
    %c320 = arith.constant 320 : index
    %68 = vector.load %arg8[%c0_36, %c320] : memref<32x384xbf16, #tpu.memory_space<vmem>>, vector<32x32xbf16>
    %69 = vector.shape_cast %68 : vector<32x32xbf16> to vector<8x4x32xbf16>
    "tpu.trace_start"() <{level = 10 : i32, message = "bqd,bkd->bqk"}> : () -> ()
    %cst_37 = arith.constant dense<0.000000e+00> : vector<8x4x4xf32>
    %70 = tpu.matmul %65, %67, %cst_37 {dimension_numbers = #tpu.dot_dimension_numbers<[2], [2], [1], [1], [0, 0, 0, 1, 1, 1], [0], [0]>} : vector<8x4x32xbf16>, vector<8x4x32xbf16>, vector<8x4x4xf32> -> vector<8x4x4xf32>
    "tpu.trace_stop"() : () -> ()
    %c2 = arith.constant 2 : index
    %c0_38 = arith.constant 0 : index
    %c0_39 = arith.constant 0 : index
    %71 = vector.load %arg5[%c2, %c0_38, %c0_39] : memref<4x4x4xf32, #tpu.memory_space<vmem>>, vector<1x4x4xf32>
    %72 = vector.shape_cast %71 : vector<1x4x4xf32> to vector<4x4xf32>
    %73 = vector.shape_cast %72 : vector<4x4xf32> to vector<1x4x4xf32>
    %74 = vector.broadcast %73 : vector<1x4x4xf32> to vector<8x4x4xf32>
    %75 = arith.addf %70, %74 : vector<8x4x4xf32>
    %cst_40 = arith.constant dense<0xFF800000> : vector<8x4xf32>
    %76 = vector.multi_reduction <maximumf>, %75, %cst_40 [2] : vector<8x4x4xf32> to vector<8x4xf32>
    %77 = vector.shape_cast %76 : vector<8x4xf32> to vector<8x4x1xf32>
    %78 = vector.broadcast %77 : vector<8x4x1xf32> to vector<8x4x4xf32>
    %79 = arith.subf %75, %78 : vector<8x4x4xf32>
    %80 = math.exp %79 : vector<8x4x4xf32>
    %cst_41 = arith.constant dense<0.000000e+00> : vector<8x4xf32>
    %81 = vector.multi_reduction <add>, %80, %cst_41 [2] : vector<8x4x4xf32> to vector<8x4xf32>
    %82 = vector.shape_cast %81 : vector<8x4xf32> to vector<8x4x1xf32>
    %83 = tpu.reciprocal %82 {approx = true} : vector<8x4x1xf32> -> vector<8x4x1xf32>
    %84 = vector.broadcast %83 : vector<8x4x1xf32> to vector<8x4x4xf32>
    %85 = arith.mulf %80, %84 : vector<8x4x4xf32>
    %86 = arith.truncf %85 : vector<8x4x4xf32> to vector<8x4x4xbf16>
    %c0_42 = arith.constant 0 : index
    %c2_43 = arith.constant 2 : index
    %c0_44 = arith.constant 0 : index
    %c0_45 = arith.constant 0 : index
    %87 = vector.load %arg7[%c0_42, %c2_43, %c0_44, %c0_45] : memref<8x4x4x4xbf16, #tpu.memory_space<vmem>>, vector<8x1x4x4xbf16>
    %88 = vector.shape_cast %87 : vector<8x1x4x4xbf16> to vector<8x4x4xbf16>
    %89 = vector.shape_cast %86 : vector<8x4x4xbf16> to vector<8x1x4x4xbf16>
    tpu.vector_store %arg7[%c0_42, %c2_43, %c0_44, %c0_45], %89 {strides = array<i32>} : memref<8x4x4x4xbf16, #tpu.memory_space<vmem>>, vector<8x1x4x4xbf16>,
    %90 = arith.truncf %85 : vector<8x4x4xf32> to vector<8x4x4xbf16>
    "tpu.trace_start"() <{level = 10 : i32, message = "bqk,bkd->bqd"}> : () -> ()
    %cst_46 = arith.constant dense<0.000000e+00> : vector<8x4x32xf32>
    %91 = tpu.matmul %90, %69, %cst_46 {dimension_numbers = #tpu.dot_dimension_numbers<[2], [1], [1], [2], [0, 0, 0, 1, 1, 2], [0], [0]>} : vector<8x4x4xbf16>, vector<8x4x32xbf16>, vector<8x4x32xf32> -> vector<8x4x32xf32>
    "tpu.trace_stop"() : () -> ()
    %92 = vector.shape_cast %91 : vector<8x4x32xf32> to vector<32x32xf32>
    %c0_47 = arith.constant 0 : index
    %c96 = arith.constant 96 : index
    %93 = vector.load %arg8[%c0_47, %c96] : memref<32x384xbf16, #tpu.memory_space<vmem>>, vector<32x32xbf16>
    %94 = vector.shape_cast %93 : vector<32x32xbf16> to vector<8x4x32xbf16>
    %c0_48 = arith.constant 0 : index
    %c224 = arith.constant 224 : index
    %95 = vector.load %arg8[%c0_48, %c224] : memref<32x384xbf16, #tpu.memory_space<vmem>>, vector<32x32xbf16>
    %96 = vector.shape_cast %95 : vector<32x32xbf16> to vector<8x4x32xbf16>
    %c0_49 = arith.constant 0 : index
    %c352 = arith.constant 352 : index
    %97 = vector.load %arg8[%c0_49, %c352] : memref<32x384xbf16, #tpu.memory_space<vmem>>, vector<32x32xbf16>
    %98 = vector.shape_cast %97 : vector<32x32xbf16> to vector<8x4x32xbf16>
    "tpu.trace_start"() <{level = 10 : i32, message = "bqd,bkd->bqk"}> : () -> ()
    %cst_50 = arith.constant dense<0.000000e+00> : vector<8x4x4xf32>
    %99 = tpu.matmul %94, %96, %cst_50 {dimension_numbers = #tpu.dot_dimension_numbers<[2], [2], [1], [1], [0, 0, 0, 1, 1, 1], [0], [0]>} : vector<8x4x32xbf16>, vector<8x4x32xbf16>, vector<8x4x4xf32> -> vector<8x4x4xf32>
    "tpu.trace_stop"() : () -> ()
    %c3 = arith.constant 3 : index
    %c0_51 = arith.constant 0 : index
    %c0_52 = arith.constant 0 : index
    %100 = vector.load %arg5[%c3, %c0_51, %c0_52] : memref<4x4x4xf32, #tpu.memory_space<vmem>>, vector<1x4x4xf32>
    %101 = vector.shape_cast %100 : vector<1x4x4xf32> to vector<4x4xf32>
    %102 = vector.shape_cast %101 : vector<4x4xf32> to vector<1x4x4xf32>
    %103 = vector.broadcast %102 : vector<1x4x4xf32> to vector<8x4x4xf32>
    %104 = arith.addf %99, %103 : vector<8x4x4xf32>
    %cst_53 = arith.constant dense<0xFF800000> : vector<8x4xf32>
    %105 = vector.multi_reduction <maximumf>, %104, %cst_53 [2] : vector<8x4x4xf32> to vector<8x4xf32>
    %106 = vector.shape_cast %105 : vector<8x4xf32> to vector<8x4x1xf32>
    %107 = vector.broadcast %106 : vector<8x4x1xf32> to vector<8x4x4xf32>
    %108 = arith.subf %104, %107 : vector<8x4x4xf32>
    %109 = math.exp %108 : vector<8x4x4xf32>
    %cst_54 = arith.constant dense<0.000000e+00> : vector<8x4xf32>
    %110 = vector.multi_reduction <add>, %109, %cst_54 [2] : vector<8x4x4xf32> to vector<8x4xf32>
    %111 = vector.shape_cast %110 : vector<8x4xf32> to vector<8x4x1xf32>
    %112 = tpu.reciprocal %111 {approx = true} : vector<8x4x1xf32> -> vector<8x4x1xf32>
    %113 = vector.broadcast %112 : vector<8x4x1xf32> to vector<8x4x4xf32>
    %114 = arith.mulf %109, %113 : vector<8x4x4xf32>
    %115 = arith.truncf %114 : vector<8x4x4xf32> to vector<8x4x4xbf16>
    %c0_55 = arith.constant 0 : index
    %c3_56 = arith.constant 3 : index
    %c0_57 = arith.constant 0 : index
    %c0_58 = arith.constant 0 : index
    %116 = vector.load %arg7[%c0_55, %c3_56, %c0_57, %c0_58] : memref<8x4x4x4xbf16, #tpu.memory_space<vmem>>, vector<8x1x4x4xbf16>
    %117 = vector.shape_cast %116 : vector<8x1x4x4xbf16> to vector<8x4x4xbf16>
    %118 = vector.shape_cast %115 : vector<8x4x4xbf16> to vector<8x1x4x4xbf16>
    tpu.vector_store %arg7[%c0_55, %c3_56, %c0_57, %c0_58], %118 {strides = array<i32>} : memref<8x4x4x4xbf16, #tpu.memory_space<vmem>>, vector<8x1x4x4xbf16>,
    %119 = arith.truncf %114 : vector<8x4x4xf32> to vector<8x4x4xbf16>
    "tpu.trace_start"() <{level = 10 : i32, message = "bqk,bkd->bqd"}> : () -> ()
    %cst_59 = arith.constant dense<0.000000e+00> : vector<8x4x32xf32>
    %120 = tpu.matmul %119, %98, %cst_59 {dimension_numbers = #tpu.dot_dimension_numbers<[2], [1], [1], [2], [0, 0, 0, 1, 1, 2], [0], [0]>} : vector<8x4x4xbf16>, vector<8x4x32xbf16>, vector<8x4x32xf32> -> vector<8x4x32xf32>
    "tpu.trace_stop"() : () -> ()
    %121 = vector.shape_cast %120 : vector<8x4x32xf32> to vector<32x32xf32>
    %122 = tpu.concatenate %34, %63, %92, %121 in 1 : vector<32x32xf32>, vector<32x32xf32>, vector<32x32xf32>, vector<32x32xf32> -> vector<32x128xf32>
    %123 = arith.truncf %122 : vector<32x128xf32> to vector<32x128xbf16>
    %c0_60 = arith.constant 0 : index
    %c0_61 = arith.constant 0 : index
    %124 = vector.load %arg9[%c0_60, %c0_61] : memref<32x128xbf16, #tpu.memory_space<vmem>>, vector<32x128xbf16>
    tpu.vector_store %arg9[%c0_60, %c0_61], %123 {strides = array<i32>} : memref<32x128xbf16, #tpu.memory_space<vmem>>, vector<32x128xbf16>,
    %c0_62 = arith.constant 0 : index
    %c0_63 = arith.constant 0 : index
    %125 = vector.load %arg9[%c0_62, %c0_63] : memref<32x128xbf16, #tpu.memory_space<vmem>>, vector<32x128xbf16>
    %c0_64 = arith.constant 0 : index
    %c0_65 = arith.constant 0 : index
    %126 = vector.load %arg3[%c0_64, %c0_65] : memref<128x128xbf16, #tpu.memory_space<vmem>>, vector<128x128xbf16>
    %cst_66 = arith.constant dense<0.000000e+00> : vector<32x128xf32>
    %127 = tpu.matmul %125, %126, %cst_66 {dimension_numbers = #tpu.dot_dimension_numbers<[1], [0], [0], [1], [0, 0, 1, 1], [], []>} : vector<32x128xbf16>, vector<128x128xbf16>, vector<32x128xf32> -> vector<32x128xf32>
    %c0_67 = arith.constant 0 : index
    %c0_68 = arith.constant 0 : index
    %128 = vector.load %arg4[%c0_67, %c0_68] : memref<1x128xf32, #tpu.memory_space<vmem>>, vector<1x128xf32>
    %129 = vector.broadcast %128 : vector<1x128xf32> to vector<32x128xf32>
    %130 = arith.addf %127, %129 : vector<32x128xf32>
    %131 = vector.shape_cast %130 : vector<32x128xf32> to vector<8x4x128xf32>
    %132 = arith.truncf %131 : vector<8x4x128xf32> to vector<8x4x128xbf16>
    %c0_69 = arith.constant 0 : index
    %c0_70 = arith.constant 0 : index
    %c0_71 = arith.constant 0 : index
    %133 = vector.load %arg6[%c0_69, %c0_70, %c0_71] : memref<8x4x128xbf16, #tpu.memory_space<vmem>>, vector<8x4x128xbf16>
    tpu.vector_store %arg6[%c0_69, %c0_70, %c0_71], %132 {strides = array<i32>} : memref<8x4x128xbf16, #tpu.memory_space<vmem>>, vector<8x4x128xbf16>,
    return
  }
  func.func @transform_0(%arg0: i32) -> (i32, i32, i32) {
    %c0_i32 = arith.constant 0 : i32
    %c0_i32_0 = arith.constant 0 : i32
    %c0_i32_1 = arith.constant 0 : i32
    return %arg0, %c0_i32, %c0_i32_0 : i32, i32, i32
  }
  func.func @transform_1(%arg0: i32) -> (i32, i32) {
    %c0_i32 = arith.constant 0 : i32
    %c0_i32_0 = arith.constant 0 : i32
    %c0_i32_1 = arith.constant 0 : i32
    return %c0_i32, %c0_i32_0 : i32, i32
  }
  func.func @transform_2(%arg0: i32) -> (i32, i32) {
    %c0_i32 = arith.constant 0 : i32
    %c0_i32_0 = arith.constant 0 : i32
    %c0_i32_1 = arith.constant 0 : i32
    return %c0_i32, %c0_i32_0 : i32, i32
  }
  func.func @transform_3(%arg0: i32) -> (i32, i32) {
    %c0_i32 = arith.constant 0 : i32
    %c0_i32_0 = arith.constant 0 : i32
    %c0_i32_1 = arith.constant 0 : i32
    return %c0_i32, %c0_i32_0 : i32, i32
  }
  func.func @transform_4(%arg0: i32) -> (i32, i32, i32) {
    %c0_i32 = arith.constant 0 : i32
    %c0_i32_0 = arith.constant 0 : i32
    %c0_i32_1 = arith.constant 0 : i32
    %c0_i32_2 = arith.constant 0 : i32
    return %c0_i32, %c0_i32_0, %c0_i32_1 : i32, i32, i32
  }
  func.func @transform_5(%arg0: i32) -> (i32, i32, i32) {
    %c0_i32 = arith.constant 0 : i32
    %c0_i32_0 = arith.constant 0 : i32
    %c0_i32_1 = arith.constant 0 : i32
    return %arg0, %c0_i32, %c0_i32_0 : i32, i32, i32
  }
  func.func @transform_6(%arg0: i32) -> (i32, i32, i32, i32) {
    %c0_i32 = arith.constant 0 : i32
    %c0_i32_0 = arith.constant 0 : i32
    %c0_i32_1 = arith.constant 0 : i32
    %c0_i32_2 = arith.constant 0 : i32
    return %arg0, %c0_i32, %c0_i32_0, %c0_i32_1 : i32, i32, i32, i32
  }
}

</mosaic_0001>

<bundles_post_ra>
// kernel: tpu_custom_call.1
= control target key start
LH: loop header
LB: loop body
LE: loop exit
PB: predicated region body
PF: predicated region fallthrough
CT: control target
= control target key end

     0   :  { %12 = vsyncpa [#allocation5], 0  ;;  %s4745_s0 = inlined_call_operand.hbm [shape: bf16[8,4,128], index: 0, kind: input, shape index: {}]   ;;  %s4746_s1 = inlined_call_operand.hbm [shape: bf16[128,384], index: 1, kind: input, shape index: {}]   ;;  %s4747_s2 = inlined_call_operand.hbm [shape: bf16[128,128], index: 2, kind: input, shape index: {}]   ;;  %s4748_s3 = inlined_call_operand.vmem [shape: f32[1,128], index: 3, kind: input, shape index: {}]   ;;  %s4749_s4 = inlined_call_operand.hbm [shape: f32[4,4,4], index: 4, kind: input, shape index: {}]   ;;  %s4750_s5 = inlined_call_operand.hbm [shape: bf16[8,4,128], index: 5, kind: output, shape index: {0}]   ;;  %s4751_s6 = inlined_call_operand.vmem [shape: bf16[8,4,4,4], index: 6, kind: output, shape index: {1}]  }
   0x1   :  { %13 = vsyncpa [#allocation8], 0 }
   0x2   :  { %14 = vsyncpa [#allocation11], 0  ;;  %s33_s23 = sshll.u32 %s4746_s1, 4  ;;  %s34_s23 = int_to_ptr.hbm [resolvable:$true] %s33_s23 }
   0x3   :  { %15 = vsyncpa [#allocation6], 0  ;;  %s3713_s24 = smov [#allocation7]   ;;  %s20_s28 = sshll.u32 %s4745_s0, 4  ;;  %s21_s28 = int_to_ptr.hbm [resolvable:$true] %s20_s28 }
   0x4   :  { %s35_s25 = sshll.u32 %s3713_s24, 4  ;;  %s3714_s29 = smov 192   ;;  %s36_s25 = int_to_ptr.vmem [resolvable:$true] %s35_s25 }
   0x5   :  { %s3715_s30 = smov 12   ;;  %s3716_s7 = smov [#allocation4]  }
   0x6   :  { %41 = dma.hbm_to_vmem [thread:$0]  %s34_s23, 3072, %s36_s25, [#allocation8], %s3714_s29, %s3714_s29, %s3715_s30  }
   0x7   :  { %s22_s8 = sshll.u32 %s3716_s7, 4  ;;  %s3717_s9 = smov 32   ;;  %s23_s8 = int_to_ptr.vmem [resolvable:$true] %s22_s8 }
   0x8   :  { %s3718_s10 = smov 2   ;;  %s46_s12 = sshll.u32 %s4747_s2, 4  ;;  %s47_s12 = int_to_ptr.hbm [resolvable:$true] %s46_s12 }
   0x9   :  { %28 = dma.hbm_to_vmem [thread:$0]  %s21_s28, 256, %s23_s8, [#allocation5], %s3717_s9, %s3717_s9, %s3718_s10  }
   0xa   :  { %s3719_s13 = smov [#allocation9]   ;;  %s61_s16 = sshll.u32 %s4749_s4, 4  ;;  %s62_s16 = int_to_ptr.hbm [resolvable:$true] %s61_s16 }
   0xb   :  { %s48_s0 = sshll.u32 %s3719_s13, 4  ;;  %s3720_s17 = smov 64   ;;  %s49_s0 = int_to_ptr.vmem [resolvable:$true] %s48_s0 }
   0xc   :  { %s3721_s18 = smov 4   ;;  %s3722_s19 = smov [#allocation10]  }
   0xd   :  { %54 = dma.hbm_to_vmem [thread:$0]  %s47_s12, 1024, %s49_s0, [#allocation8], %s3720_s17, %s3720_s17, %s3721_s18  }
   0xe   :  { %s63_s20 = sshll.u32 %s3722_s19, 4  ;;  %s64_s20 = int_to_ptr.vmem [resolvable:$true] %s63_s20 }
   0xf   :  { %69 = dma.hbm_to_vmem [thread:$0]  %s62_s16, 256, %s64_s20, [#allocation11], %s3720_s17, %s3720_s17, %s3721_s18  }
  0x10   :  { %3705 = dma.done.wait [#allocation5], 256  }
  0x11   :  { %3706 = vsyncadd [#allocation5], 4294967040 }
  0x12   :  { %3707 = dma.done.wait [#allocation8], 4096  }
  0x13   :  { %3708 = vsyncadd [#allocation8], 4294963200 }
  0x14   :  { %3709 = dma.done.wait [#allocation11], 256  }
  0x15   :  { %3710 = vsyncadd [#allocation11], 4294967040  ;;  %v3231_v0 = vld [vmem:[#allocation7 + $0xa8] sm:$0xf]  ;;  %v3391_v1 = vld [vmem:[#allocation7 + $0xb0] sm:$0xf0] }
  0x16   :  { %v3219_v2 = vld [vmem:[#allocation7 + $0x90] sm:$0xf]  ;;  %v3232_v3 = vor.u32 %v3391_v1, %v3231_v0  ;;  %v3388_v4 = vld [vmem:[#allocation7 + $0x98] sm:$0xf0]  ;;  %v3207_v6 = vld [vmem:[#allocation7 + $0x78] sm:$0xf] }
  0x17   :  { %v3220_v5 = vor.u32 %v3388_v4, %v3219_v2  ;;  %v3385_v7 = vld [vmem:[#allocation7 + $0x80] sm:$0xf0]  ;;  %v87_v8 = vld [vmem:[#allocation4] sm:$0x3]  ;;  %v88_v9 = vld [vmem:[#allocation4 + $0x2] sm:$0x3] }
  0x18   :  { %282 = vmatpush.bf16.msra.mxu1 %v3232_v3  ;;  %v89_v10 = vld [vmem:[#allocation4 + $0x4] sm:$0x3]  ;;  %v90_v11 = vld [vmem:[#allocation4 + $0x6] sm:$0x3]  ;;  %128 = vst [vmem:[#allocation1] ss:$4 sm:$0xff] %v87_v8  ;;  %v3208_v12 = vor.u32 %v3385_v7, %v3207_v6 }
  0x19   :  { %131 = vst [vmem:[#allocation1 + $0x1] ss:$4 sm:$0xff] %v88_v9  ;;  %v3195_v13 = vld [vmem:[#allocation7 + $0x60] sm:$0xf]  ;;  %v3382_v14 = vld [vmem:[#allocation7 + $0x68] sm:$0xf0] }
  0x1a   :  { %134 = vst [vmem:[#allocation1 + $0x2] ss:$4 sm:$0xff] %v89_v10  ;;  %v3183_v15 = vld [vmem:[#allocation7 + $0x48] sm:$0xf]  ;;  %v91_v16 = vld [vmem:[#allocation4 + $0x8] sm:$0x3]  ;;  %v3196_v17 = vor.u32 %v3382_v14, %v3195_v13 }
  0x1b   :  { %137 = vst [vmem:[#allocation1 + $0x3] ss:$4 sm:$0xff] %v90_v11  ;;  %v3379_v18 = vld [vmem:[#allocation7 + $0x50] sm:$0xf0]  ;;  %v92_v19 = vld [vmem:[#allocation4 + $0xa] sm:$0x3] }
  0x1c   :  { %283 = vmatpush.bf16.msra.mxu1 %v3220_v5  ;;  %v93_v20 = vld [vmem:[#allocation4 + $0xc] sm:$0x3]  ;;  %v94_v21 = vld [vmem:[#allocation4 + $0xe] sm:$0x3]  ;;  %140 = vst [vmem:[#allocation1 + $0x20] ss:$4 sm:$0xff] %v91_v16  ;;  %v3184_v22 = vor.u32 %v3379_v18, %v3183_v15 }
  0x1d   :  { %143 = vst [vmem:[#allocation1 + $0x21] ss:$4 sm:$0xff] %v92_v19  ;;  %v3171_v23 = vld [vmem:[#allocation7 + $0x30] sm:$0xf]  ;;  %v3376_v24 = vld [vmem:[#allocation7 + $0x38] sm:$0xf0] }
  0x1e   :  { %146 = vst [vmem:[#allocation1 + $0x22] ss:$4 sm:$0xff] %v93_v20  ;;  %v3172_v25 = vor.u32 %v3376_v24, %v3171_v23  ;;  %v3159_v26 = vld [vmem:[#allocation7 + $0x18] sm:$0xf]  ;;  %v3373_v27 = vld [vmem:[#allocation7 + $0x20] sm:$0xf0] }
  0x1f   :  { %149 = vst [vmem:[#allocation1 + $0x23] ss:$4 sm:$0xff] %v94_v21  ;;  %v3160_v28 = vor.u32 %v3373_v27, %v3159_v26  ;;  %v3147_v29 = vld [vmem:[#allocation7] sm:$0xf]  ;;  %v3370_v30 = vld [vmem:[#allocation7 + $0x8] sm:$0xf0] }
  0x20   :  { %284 = vmatpush.bf16.msra.mxu1 %v3208_v12  ;;  %v3390_v31 = vld [vmem:[#allocation7 + $0xac] sm:$0xf]  ;;  %v3233_v32 = vld [vmem:[#allocation7 + $0xb4] sm:$0xf0]  ;;  %v3148_v33 = vor.u32 %v3370_v30, %v3147_v29  ;;  %v3387_v35 = vld [vmem:[#allocation7 + $0x94] sm:$0xf] }
  0x21   :  { %v3236_v34 = vor.u32 %v3390_v31, %v3233_v32  ;;  %v3221_v36 = vld [vmem:[#allocation7 + $0x9c] sm:$0xf0]  ;;  %v3384_v39 = vld [vmem:[#allocation7 + $0x7c] sm:$0xf]  ;;  %v3209_v40 = vld [vmem:[#allocation7 + $0x84] sm:$0xf0] }
  0x22   :  { %v3779_v37 = vld.sshfl [vmem:[#allocation1] sm:$0xff pattern:$0x73625140]  ;;  %v3224_v38 = vor.u32 %v3387_v35, %v3221_v36  ;;  %v3212_v41 = vor.u32 %v3384_v39, %v3209_v40  ;;  %v3381_v42 = vld [vmem:[#allocation7 + $0x64] sm:$0xf]  ;;  %vm367_vm0 = vcmask 1041408  }
  0x23   :  { %v3197_v43 = vld [vmem:[#allocation7 + $0x6c] sm:$0xf0]  ;;  %v3378_v45 = vld [vmem:[#allocation7 + $0x4c] sm:$0xf]  ;;  %v3185_v46 = vld [vmem:[#allocation7 + $0x54] sm:$0xf0] }
  0x24   :  { %285 = vmatpush.bf16.msra.mxu1 %v3196_v17  ;;  %v3200_v44 = vor.u32 %v3381_v42, %v3197_v43  ;;  %v3188_v47 = vor.u32 %v3378_v45, %v3185_v46  ;;  %v3375_v48 = vld [vmem:[#allocation7 + $0x34] sm:$0xf]  ;;  %v3173_v49 = vld [vmem:[#allocation7 + $0x3c] sm:$0xf0]  ;;  %v3372_v52 = vld [vmem:[#allocation7 + $0x1c] sm:$0xf] }
  0x25   :  { %v3176_v51 = vor.u32 %v3375_v48, %v3173_v49  ;;  %v3161_v53 = vld [vmem:[#allocation7 + $0x24] sm:$0xf0]  ;;  %v3239_v54 = vld [vmem:[#allocation7 + $0xb0] sm:$0xf]  ;;  %v3392_v55 = vld [vmem:[#allocation7 + $0xb8] sm:$0xf0] }
  0x26   :  { %v151_v50 = vld.sshfl [vmem:[#allocation1 + $0x20] sm:$0xff pattern:$0x73625140]  ;;  %v3240_v56 = vor.u32 %v3392_v55, %v3239_v54  ;;  %v3164_v57 = vor.u32 %v3372_v52, %v3161_v53  ;;  %v3369_v58 = vld [vmem:[#allocation7 + $0x4] sm:$0xf]  ;;  %vm466_vm1 = vcmask 261120  }
  0x27   :  { %v3149_v59 = vld [vmem:[#allocation7 + $0xc] sm:$0xf0]  ;;  %v3227_v61 = vld [vmem:[#allocation7 + $0x98] sm:$0xf]  ;;  %v3389_v62 = vld [vmem:[#allocation7 + $0xa0] sm:$0xf0] }
  0x28   :  { %286 = vmatpush.bf16.msra.mxu1 %v3184_v22  ;;  %320 = vmatpush.bf16.msra.mxu2 %v3240_v56  ;;  %v3152_v60 = vor.u32 %v3369_v58, %v3149_v59  ;;  %v3228_v63 = vor.u32 %v3389_v62, %v3227_v61  ;;  %v3215_v0 = vld [vmem:[#allocation7 + $0x80] sm:$0xf]  ;;  %v3386_v1 = vld [vmem:[#allocation7 + $0x88] sm:$0xf0]  ;;  %v3203_v3 = vld [vmem:[#allocation7 + $0x68] sm:$0xf] }
  0x29   :  { %v3216_v2 = vor.u32 %v3386_v1, %v3215_v0  ;;  %v3383_v4 = vld [vmem:[#allocation7 + $0x70] sm:$0xf0]  ;;  %v3191_v6 = vld [vmem:[#allocation7 + $0x50] sm:$0xf]  ;;  %v3380_v7 = vld [vmem:[#allocation7 + $0x58] sm:$0xf0] }
  0x2a   :  { %v3204_v5 = vor.u32 %v3383_v4, %v3203_v3  ;;  %v3192_v8 = vor.u32 %v3380_v7, %v3191_v6  ;;  %v3179_v9 = vld [vmem:[#allocation7 + $0x38] sm:$0xf]  ;;  %v3377_v10 = vld [vmem:[#allocation7 + $0x40] sm:$0xf0]  ;;  %v3167_v12 = vld [vmem:[#allocation7 + $0x20] sm:$0xf] }
  0x2b   :  { %v3180_v11 = vor.u32 %v3377_v10, %v3179_v9  ;;  %v3374_v13 = vld [vmem:[#allocation7 + $0x28] sm:$0xf0]  ;;  %v3155_v15 = vld [vmem:[#allocation7 + $0x8] sm:$0xf]  ;;  %v3371_v16 = vld [vmem:[#allocation7 + $0x10] sm:$0xf0] }
  0x2c   :  { %287 = vmatpush.bf16.msra.mxu1 %v3172_v25  ;;  %321 = vmatpush.bf16.msra.mxu2 %v3228_v63  ;;  %v3168_v14 = vor.u32 %v3374_v13, %v3167_v12  ;;  %v3156_v17 = vor.u32 %v3371_v16, %v3155_v15  ;;  %vm371_vm2 = vcmask 1043458   ;;  %vm611_vm3 = vcmask 27648   ;;  %s3723_s2 = smov 96   ;;  %s3126_s14 = sshll.u32 %s4750_s5, 4  ;;  %s3127_s14 = int_to_ptr.hbm [resolvable:$true] %s3126_s14 }
  0x2d   :  { %vm708_vm4 = vcmask 25600   ;;  %vm717_vm5 = vcmask 31744   ;;  %vm2971_vm6 = vcmask 523264   ;;  %vm2976_vm7 = vcmask 785408  }
  0x30   :  { %288 = vmatpush.bf16.msra.mxu1 %v3160_v28  ;;  %322 = vmatpush.bf16.msra.mxu2 %v3216_v2 }
  0x34   :  { %289 = vmatpush.bf16.msra.mxu1 %v3148_v33  ;;  %323 = vmatpush.bf16.msra.mxu2 %v3204_v5 }
  0x37   :  { %290 = vmatmul.bf16.vlgmr.msra.gmra.mxu1 %v3779_v37 }
  0x38   :  { %301 = vmatpush.bf16.msrb.mxu1 %v3236_v34  ;;  %324 = vmatpush.bf16.msra.mxu2 %v3192_v8 }
  0x3c   :  { %302 = vmatpush.bf16.msrb.mxu1 %v3224_v38  ;;  %325 = vmatpush.bf16.msra.mxu2 %v3180_v11 }
  0x40   :  { %303 = vmatpush.bf16.msrb.mxu1 %v3212_v41  ;;  %326 = vmatpush.bf16.msra.mxu2 %v3168_v14 }
  0x44   :  { %304 = vmatpush.bf16.msrb.mxu1 %v3200_v44  ;;  %327 = vmatpush.bf16.msra.mxu2 %v3156_v17 }
  0x47   :  { %295 = vmatmul.bf16.gmra.mxu1 %v151_v50  ;;  %328 = vmatmul.bf16.vlgmr.msra.gmra.mxu2 %v3779_v37 }
  0x48   :  { %305 = vmatpush.bf16.msrb.mxu1 %v3188_v47 }
  0x4c   :  { %306 = vmatpush.bf16.msrb.mxu1 %v3176_v51 }
  0x50   :  { %307 = vmatpush.bf16.msrb.mxu1 %v3164_v57 }
  0x54   :  { %308 = vmatpush.bf16.msrb.mxu1 %v3152_v60 }
  0x57   :  { %309 = vmatmul.bf16.vlgmr.msrb.gmra.mxu1 %v3779_v37  ;;  %333 = vmatmul.bf16.gmra.mxu2 %v151_v50 }
  0x67   :  { %314 = vmatmul.bf16.gmra.mxu1 %v151_v50 }
  0xb4   :  { %v291_v18 = vpop.f32.mrf.mxu1 }
  0xbc   :  { %v293_v19 = vpop.f32.mrf.mxu1 }
  0xc4   :  { %v296_v20 = vpop.f32.mrf.mxu1 }
  0xcc   :  { %v298_v21 = vpop.f32.mrf.mxu1 }
  0xd4   :  { %v310_v22 = vpop.f32.mrf.mxu1 }
  0xd5   :  { %v339_v23 = vpack.c.bf16 %v310_v22, %v291_v18 }
  0xd7   :  { %347 = vst [vmem:[#allocation2] sm:$0xff] %v339_v23 }
  0xdc   :  { %v312_v24 = vpop.f32.mrf.mxu1 }
  0xdd   :  { %v341_v25 = vpack.c.bf16 %v312_v24, %v293_v19 }
  0xde   :  { %v866_v26 = vld [vmem:[#allocation2] sm:$0xf]  ;;  %v393_v29 = vld [vmem:[#allocation2 + $0x4] sm:$0xf] }
  0xdf   :  { %v874_v27 = vrot.slane %v866_v26, 2  ;;  %349 = vst [vmem:[#allocation2 + $0xc] sm:$0xff] %v341_v25  ;;  %v902_v30 = vld [vmem:[#allocation2 + $0x4] sm:$0xf]  ;;  %v401_v31 = vrot.slane %v393_v29, 2 }
  0xe0   :  { %v910_v33 = vrot.slane %v902_v30, 2  ;;  %v355_v37 = vld [vmem:[#allocation2] sm:$0xf] }
  0xe1   :  { %v880_v28 = vsel %vm367_vm0, %v866_v26, %v874_v27  ;;  %v407_v35 = vsel %vm367_vm0, %v393_v29, %v401_v31  ;;  %v408_v40 = vsel %vm371_vm2, %v393_v29, %v401_v31  ;;  %v363_v41 = vrot.slane %v355_v37, 2 }
  0xe2   :  { %976 = vst [vmem:[#allocation1] ss:$4 sm:$0xff] %v880_v28  ;;  %v469_v36 = vsel %vm466_vm1, %v407_v35, 0  ;;  %v916_v38 = vsel %vm367_vm0, %v902_v30, %v910_v33  ;;  %v410_v43 = vrot.slane %v408_v40, 2  ;;  %v881_v46 = vsel %vm371_vm2, %v866_v26, %v874_v27 }
  0xe3   :  { %478 = vmatpush.bf16.xpose.msra.mxu3 %v469_v36  ;;  %v370_v47 = vsel %vm367_vm0, %v355_v37, %v363_v41  ;;  %v883_v51 = vrot.slane %v881_v46, 2  ;;  %v917_v55 = vsel %vm371_vm2, %v902_v30, %v910_v33  ;;  %v372_v1 = vsel %vm371_vm2, %v355_v37, %v363_v41 }
  0xe4   :  { %v315_v32 = vpop.f32.mrf.mxu1  ;;  %v488_v48 = vsel %vm466_vm1, %v410_v43, 0  ;;  %v919_v58 = vrot.slane %v917_v55, 2  ;;  %v374_v6 = vrot.slane %v372_v1, 2 }
  0xe5   :  { %v343_v34 = vpack.c.bf16 %v315_v32, %v296_v20 }
  0xe6   :  { %v394_v42 = vld [vmem:[#allocation2 + $0x10] sm:$0xf]  ;;  %v867_v0 = vld [vmem:[#allocation2 + $0xc] sm:$0xf] }
  0xe7   :  { %351 = vst [vmem:[#allocation2 + $0x18] sm:$0xff] %v343_v34  ;;  %v402_v44 = vrot.slane %v394_v42, 2  ;;  %v875_v5 = vrot.slane %v867_v0, 2  ;;  %v903_v14 = vld [vmem:[#allocation2 + $0x10] sm:$0xf] }
  0xe8   :  { %v911_v18 = vrot.slane %v903_v14, 2  ;;  %v356_v20 = vld [vmem:[#allocation2 + $0xc] sm:$0xf] }
  0xe9   :  { %v3788_v39 = vld.sshfl [vmem:[#allocation1] sm:$0xff pattern:$0x73625140]  ;;  %v413_v49 = vsel %vm367_vm0, %v394_v42, %v402_v44  ;;  %v414_v60 = vsel %vm371_vm2, %v394_v42, %v402_v44  ;;  %v886_v12 = vsel %vm367_vm0, %v867_v0, %v875_v5  ;;  %v364_v24 = vrot.slane %v356_v20, 2 }
  0xea   :  { %981 = vst [vmem:[#allocation1] ss:$4 sm:$0xff] %v916_v38  ;;  %3241 = vmatmul.msk.bf16.vlgmr.msra.gmra.mxu3 %vm466_vm1, %v370_v47  ;;  %v505_v53 = vsel %vm466_vm1, %v413_v49, 0  ;;  %v416_v2 = vrot.slane %v414_v60, 2  ;;  %v922_v22 = vsel %vm367_vm0, %v903_v14, %v911_v18  ;;  %v887_v28 = vsel %vm371_vm2, %v867_v0, %v875_v5 }
  0xeb   :  { %497 = vmatpush.bf16.xpose.msrb.mxu3 %v488_v48  ;;  %v377_v30 = vsel %vm367_vm0, %v356_v20, %v364_v24  ;;  %v889_v32 = vrot.slane %v887_v28, 2  ;;  %v923_v34 = vsel %vm371_vm2, %v903_v14, %v911_v18  ;;  %v378_v38 = vsel %vm371_vm2, %v356_v20, %v364_v24 }
  0xec   :  { %v317_v45 = vpop.f32.mrf.mxu1  ;;  %v524_v8 = vsel %vm466_vm1, %v416_v2, 0  ;;  %v925_v35 = vrot.slane %v923_v34, 2  ;;  %v380_v41 = vrot.slane %v378_v38, 2 }
  0xed   :  { %v345_v50 = vpack.c.bf16 %v317_v45, %v298_v21 }
  0xee   :  { %v395_v54 = vld [vmem:[#allocation2 + $0x1c] sm:$0xf]  ;;  %v357_v61 = vld [vmem:[#allocation2 + $0x18] sm:$0xf] }
  0xef   :  { %353 = vst [vmem:[#allocation2 + $0x24] sm:$0xff] %v345_v50  ;;  %v403_v56 = vrot.slane %v395_v54, 2  ;;  %v365_v3 = vrot.slane %v357_v61, 2  ;;  %v868_v37 = vld [vmem:[#allocation2 + $0x18] sm:$0xf] }
  0xf0   :  { %v876_v40 = vrot.slane %v868_v37, 2  ;;  %v904_v44 = vld [vmem:[#allocation2 + $0x1c] sm:$0xf] }
  0xf1   :  { %v3796_v52 = vld.sshfl [vmem:[#allocation1] sm:$0xff pattern:$0x73625140]  ;;  %v419_v57 = vsel %vm367_vm0, %v395_v54, %v403_v56  ;;  %v420_v63 = vsel %vm371_vm2, %v395_v54, %v403_v56  ;;  %v383_v9 = vsel %vm367_vm0, %v357_v61, %v365_v3  ;;  %v384_v25 = vsel %vm371_vm2, %v357_v61, %v365_v3  ;;  %v329_v61 = vpop.f32.mrf.mxu2 }
  0xf2   :  { %1006 = vst [vmem:[#allocation1] ss:$4 sm:$0xff] %v883_v51  ;;  %v541_v59 = vsel %vm466_vm1, %v419_v57, 0  ;;  %v422_v4 = vrot.slane %v420_v63, 2  ;;  %v386_v29 = vrot.slane %v384_v25, 2  ;;  %v892_v43 = vsel %vm367_vm0, %v868_v37, %v876_v40 }
  0xf3   :  { %514 = vmatpush.bf16.xpose.msra.mxu3 %v505_v53  ;;  %550 = vmatpush.bf16.xpose.msra.mxu0 %v541_v59  ;;  %v912_v45 = vrot.slane %v904_v44, 2  ;;  %v893_v49 = vsel %vm371_vm2, %v868_v37, %v876_v40  ;;  %v340_v0 = vpack.c.bf16 %v329_v61, %v329_v61 }
  0xf4   :  { %v560_v10 = vsel %vm466_vm1, %v422_v4, 0  ;;  %v895_v51 = vrot.slane %v893_v49, 2 }
  0xf5   :  { %v928_v46 = vsel %vm367_vm0, %v904_v44, %v912_v45  ;;  %v929_v54 = vsel %vm371_vm2, %v904_v44, %v912_v45  ;;  %348 = vst [vmem:[#allocation2 + $0x8] sm:$0xf] %v340_v0 }
  0xf6   :  { %v396_v7 = vld [vmem:[#allocation2 + $0x28] sm:$0xf]  ;;  %v358_v17 = vld [vmem:[#allocation2 + $0x24] sm:$0xf]  ;;  %v931_v55 = vrot.slane %v929_v54, 2 }
  0xf7   :  { %v404_v13 = vrot.slane %v396_v7, 2  ;;  %v366_v19 = vrot.slane %v358_v17, 2  ;;  %v869_v57 = vld [vmem:[#allocation2 + $0x24] sm:$0xf]  ;;  %v905_v63 = vld [vmem:[#allocation2 + $0x28] sm:$0xf] }
  0xf8   :  { %v913_v1 = vrot.slane %v905_v63, 2 }
  0xf9   :  { %v3803_v62 = vld.sshfl [vmem:[#allocation1] sm:$0xff pattern:$0x73625140]  ;;  %v425_v15 = vsel %vm367_vm0, %v396_v7, %v404_v13  ;;  %v426_v21 = vsel %vm371_vm2, %v396_v7, %v404_v13  ;;  %v389_v26 = vsel %vm367_vm0, %v358_v17, %v366_v19  ;;  %v390_v48 = vsel %vm371_vm2, %v358_v17, %v366_v19  ;;  %v331_v7 = vpop.f32.mrf.mxu2 }
  0xfa   :  { %1012 = vst [vmem:[#allocation1] ss:$4 sm:$0xff] %v919_v58  ;;  %3242 = vmatmul.msk.bf16.vlgmr.msrb.gmra.mxu3 %vm466_vm1, %v374_v6  ;;  %3245 = vmatmul.msk.bf16.vlgmr.msra.gmra.mxu0 %vm466_vm1, %v383_v9  ;;  %v577_v16 = vsel %vm466_vm1, %v425_v15, 0  ;;  %v428_v27 = vrot.slane %v426_v21, 2  ;;  %v392_v50 = vrot.slane %v390_v48, 2  ;;  %v877_v58 = vrot.slane %v869_v57, 2 }
  0xfb   :  { %533 = vmatpush.bf16.xpose.msrb.mxu3 %v524_v8  ;;  %569 = vmatpush.bf16.xpose.msrb.mxu0 %v560_v10  ;;  %v934_v2 = vsel %vm367_vm0, %v905_v63, %v913_v1  ;;  %v342_v8 = vpack.c.bf16 %v331_v7, %v331_v7  ;;  %v935_v9 = vsel %vm371_vm2, %v905_v63, %v913_v1 }
  0xfc   :  { %586 = vmatpush.bf16.xpose.msrb.mxu2 %v577_v16  ;;  %v596_v31 = vsel %vm466_vm1, %v428_v27, 0  ;;  %v898_v60 = vsel %vm367_vm0, %v869_v57, %v877_v58  ;;  %v899_v4 = vsel %vm371_vm2, %v869_v57, %v877_v58  ;;  %v937_v10 = vrot.slane %v935_v9, 2  ;;  %v429_v61 = vld [vmem:[#allocation2 + $0x8] sm:$0xf] }
  0xfd   :  { %v901_v5 = vrot.slane %v899_v4, 2  ;;  %350 = vst [vmem:[#allocation2 + $0x14] sm:$0xf] %v342_v8  ;;  %v437_v1 = vrot.slane %v429_v61, 2 }
  0xff   :  { %v443_v7 = vsel %vm367_vm0, %v429_v61, %v437_v1  ;;  %v444_v9 = vsel %vm371_vm2, %v429_v61, %v437_v1 }
 0x101   :  { %v3812_v11 = vld.sshfl [vmem:[#allocation1] sm:$0xff pattern:$0x73625140]  ;;  %v334_v17 = vpop.f32.mrf.mxu2 }
 0x102   :  { %1036 = vst [vmem:[#allocation1] ss:$4 sm:$0xff] %v886_v12  ;;  %v938_v12 = vld [vmem:[#allocation2 + $0x8] sm:$0xf]  ;;  %v344_v18 = vpack.c.bf16 %v334_v17, %v334_v17  ;;  %v446_v17 = vrot.slane %v444_v9, 2 }
 0x103   :  { %3247 = vmatmul.msk.bf16.vlgmr.msrb.gmra.mxu2 %vm466_vm1, %v389_v26  ;;  %v946_v14 = vrot.slane %v938_v12, 2  ;;  %v3869_v26 = vld [vmem:[#allocation10] sm:$0xf] }
 0x104   :  { %352 = vst [vmem:[#allocation2 + $0x20] sm:$0xf] %v344_v18  ;;  %v939_v21 = vld [vmem:[#allocation2 + $0x14] sm:$0xf] }
 0x105   :  { %v952_v15 = vsel %vm367_vm0, %v938_v12, %v946_v14  ;;  %v953_v19 = vsel %vm371_vm2, %v938_v12, %v946_v14  ;;  %v947_v24 = vrot.slane %v939_v21, 2  ;;  %v430_v63 = vld [vmem:[#allocation2 + $0x14] sm:$0xf]  ;;  %v721_v14 = vsel %vm367_vm0, %v443_v7, 0 }
 0x106   :  { %v955_v20 = vrot.slane %v953_v19, 2  ;;  %730 = vmatpush.bf16.msra.mxu0 %v721_v14 }
 0x107   :  { %v958_v25 = vsel %vm367_vm0, %v939_v21, %v947_v24 }
 0x109   :  { %v3819_v23 = vld.sshfl [vmem:[#allocation1] sm:$0xff pattern:$0x73625140]  ;;  %v336_v27 = vpop.f32.mrf.mxu2 }
 0x10a   :  { %1041 = vst [vmem:[#allocation1] ss:$4 sm:$0xff] %v922_v22  ;;  %3243 = vmatmul.msk.bf16.vlgmr.msra.gmra.mxu3 %vm466_vm1, %v377_v30  ;;  %3246 = vmatmul.msk.bf16.vlgmr.msrb.gmra.mxu0 %vm466_vm1, %v386_v29  ;;  %v346_v29 = vpack.c.bf16 %v336_v27, %v336_v27 }
 0x10b   :  { %605 = vmatpush.bf16.xpose.msra.mxu3 %v596_v31  ;;  %v959_v31 = vsel %vm371_vm2, %v939_v21, %v947_v24  ;;  %v940_v37 = vld [vmem:[#allocation2 + $0x20] sm:$0xf]  ;;  %v740_v24 = vsel %vm367_vm0, %v446_v17, 0 }
 0x10c   :  { %354 = vst [vmem:[#allocation2 + $0x2c] sm:$0xf] %v346_v29  ;;  %749 = vmatpush.bf16.msra.mxu1 %v740_v24 }
 0x111   :  { %v3829_v33 = vld.sshfl [vmem:[#allocation1] sm:$0xff pattern:$0x73625140] }
 0x112   :  { %1066 = vst [vmem:[#allocation1] ss:$4 sm:$0xff] %v889_v32 }
 0x119   :  { %v3832_v36 = vld.sshfl [vmem:[#allocation1] sm:$0xff pattern:$0x73625140] }
 0x11a   :  { %1072 = vst [vmem:[#allocation1] ss:$4 sm:$0xff] %v925_v35  ;;  %3244 = vmatmul.msk.bf16.vlgmr.msrb.gmra.mxu3 %vm466_vm1, %v380_v41  ;;  %v961_v35 = vrot.slane %v959_v31, 2  ;;  %v948_v41 = vrot.slane %v940_v37, 2 }
 0x11c   :  { %v964_v44 = vsel %vm367_vm0, %v940_v37, %v948_v41  ;;  %v965_v48 = vsel %vm371_vm2, %v940_v37, %v948_v41 }
 0x11d   :  { %v967_v54 = vrot.slane %v965_v48, 2 }
 0x121   :  { %v3836_v42 = vld.sshfl [vmem:[#allocation1] sm:$0xff pattern:$0x73625140] }
 0x122   :  { %1096 = vst [vmem:[#allocation1] ss:$4 sm:$0xff] %v892_v43 }
 0x129   :  { %v3840_v47 = vld.sshfl [vmem:[#allocation1] sm:$0xff pattern:$0x73625140] }
 0x12a   :  { %1101 = vst [vmem:[#allocation1] ss:$4 sm:$0xff] %v928_v46  ;;  %3248 = vmatmul.msk.bf16.vlgmr.msra.gmra.mxu3 %vm466_vm1, %v392_v50 }
 0x131   :  { %v3845_v53 = vld.sshfl [vmem:[#allocation1] sm:$0xff pattern:$0x73625140] }
 0x132   :  { %1126 = vst [vmem:[#allocation1] ss:$4 sm:$0xff] %v895_v51 }
 0x139   :  { %v3848_v56 = vld.sshfl [vmem:[#allocation1] sm:$0xff pattern:$0x73625140] }
 0x13a   :  { %1132 = vst [vmem:[#allocation1] ss:$4 sm:$0xff] %v931_v55  ;;  %v941_v55 = vld [vmem:[#allocation2 + $0x2c] sm:$0xf] }
 0x13b   :  { %v949_v58 = vrot.slane %v941_v55, 2 }
 0x13d   :  { %v970_v4 = vsel %vm367_vm0, %v941_v55, %v949_v58 }
 0x141   :  { %v3850_v59 = vld.sshfl [vmem:[#allocation1] sm:$0xff pattern:$0x73625140] }
 0x142   :  { %1156 = vst [vmem:[#allocation1] ss:$4 sm:$0xff] %v898_v60 }
 0x149   :  { %v3854_v3 = vld.sshfl [vmem:[#allocation1] sm:$0xff pattern:$0x73625140] }
 0x14a   :  { %1161 = vst [vmem:[#allocation1] ss:$4 sm:$0xff] %v934_v2  ;;  %v438_v2 = vrot.slane %v430_v63, 2 }
 0x14c   :  { %v449_v8 = vsel %vm367_vm0, %v430_v63, %v438_v2 }
 0x151   :  { %v3857_v6 = vld.sshfl [vmem:[#allocation1] sm:$0xff pattern:$0x73625140] }
 0x152   :  { %1186 = vst [vmem:[#allocation1] ss:$4 sm:$0xff] %v901_v5 }
 0x159   :  { %v3860_v13 = vld.sshfl [vmem:[#allocation1] sm:$0xff pattern:$0x73625140] }
 0x15a   :  { %1192 = vst [vmem:[#allocation1] ss:$4 sm:$0xff] %v937_v10  ;;  %v450_v10 = vsel %vm371_vm2, %v430_v63, %v438_v2 }
 0x15b   :  { %v452_v19 = vrot.slane %v450_v10, 2 }
 0x15d   :  { %v777_v29 = vsel %vm367_vm0, %v452_v19, 0 }
 0x15e   :  { %786 = vmatpush.bf16.msrb.mxu3 %v777_v29 }
 0x161   :  { %v3863_v16 = vld.sshfl [vmem:[#allocation1] sm:$0xff pattern:$0x73625140] }
 0x162   :  { %1321 = vst [vmem:[#allocation1] ss:$4 sm:$0xff] %v952_v15  ;;  %v758_v15 = vsel %vm367_vm0, %v449_v8, 0 }
 0x163   :  { %767 = vmatpush.bf16.msra.mxu2 %v758_v15 }
 0x169   :  { %v3866_v22 = vld.sshfl [vmem:[#allocation1] sm:$0xff pattern:$0x73625140] }
 0x16a   :  { %1346 = vst [vmem:[#allocation1] ss:$4 sm:$0xff] %v955_v20 }
 0x16d   :  { %v480_v30 = vpop.f32.mrf.mxu3 }
 0x16e   :  { %v3875_v32 = vadd.f32 %v480_v30, %v3869_v26 }
 0x170   :  { %v612_v34 = vsel %vm611_vm3, %v3875_v32, -inf }
 0x171   :  { %v3871_v28 = vld.sshfl [vmem:[#allocation1] sm:$0xff pattern:$0x73625140]  ;;  %613 = vmax.xlane.f32.xlu2 %v612_v34 }
 0x172   :  { %1370 = vst [vmem:[#allocation1] ss:$4 sm:$0xff] %v958_v25  ;;  %v971_v25 = vsel %vm371_vm2, %v941_v55, %v949_v58 }
 0x173   :  { %v973_v34 = vrot.slane %v971_v25, 2 }
 0x175   :  { %v482_v40 = vpop.f32.mrf.mxu3 }
 0x176   :  { %v1517_v40 = vld [vmem:[#allocation2] sm:$0xf] }
 0x177   :  { %v3881_v43 = vpop.f32.mrf.mxu0  ;;  %v1525_v48 = vrot.slane %v1517_v40, 2 }
 0x178   :  { %v3941_v19 = vadd.f32 %v3881_v43, %v3869_v26 }
 0x179   :  { %v3879_v38 = vld.sshfl [vmem:[#allocation1] sm:$0xff pattern:$0x73625140]  ;;  %v1531_v63 = vsel %vm367_vm0, %v1517_v40, %v1525_v48  ;;  %v1532_v24 = vsel %vm371_vm2, %v1517_v40, %v1525_v48 }
 0x17a   :  { %1395 = vst [vmem:[#allocation1] ss:$4 sm:$0xff] %v961_v35  ;;  %v624_v25 = vsel %vm611_vm3, %v3941_v19, -inf  ;;  %v1534_v29 = vrot.slane %v1532_v24, 2 }
 0x17d   :  { %v499_v46 = vpop.f32.mrf.mxu3 }
 0x17e   :  { %v3888_v49 = vadd.f32 %v499_v46, %v3869_v26  ;;  %v432_v46 = vld [vmem:[#allocation2 + $0x2c] sm:$0xf] }
 0x17f   :  { %v554_v50 = vpop.f32.mrf.mxu0 }
 0x180   :  { %v615_v51 = vsel %vm611_vm3, %v3888_v49, -inf }
 0x181   :  { %v3884_v45 = vld.sshfl [vmem:[#allocation1] sm:$0xff pattern:$0x73625140]  ;;  %616 = vmax.xlane.f32.xlu2 %v615_v51  ;;  %v440_v51 = vrot.slane %v432_v46, 2 }
 0x182   :  { %1419 = vst [vmem:[#allocation1] ss:$4 sm:$0xff] %v964_v44  ;;  %v431_v44 = vld [vmem:[#allocation2 + $0x20] sm:$0xf] }
 0x183   :  { %v439_v50 = vrot.slane %v431_v44, 2  ;;  %v461_v55 = vsel %vm367_vm0, %v432_v46, %v440_v51 }
 0x185   :  { %v501_v60 = vpop.f32.mrf.mxu3  ;;  %v456_v61 = vsel %vm371_vm2, %v431_v44, %v439_v50 }
 0x186   :  { %v588_v5 = vpop.f32.mrf.mxu2  ;;  %v832_v60 = vsel %vm367_vm0, %v461_v55, 0  ;;  %v458_v2 = vrot.slane %v456_v61, 2 }
 0x187   :  { %v3894_v0 = vpop.f32.mrf.mxu0  ;;  %v3902_v12 = vadd.f32 %v588_v5, %v3869_v26  ;;  %841 = vmatpush.bf16.msrb.mxu2 %v832_v60 }
 0x188   :  { %v814_v9 = vsel %vm367_vm0, %v458_v2, 0 }
 0x189   :  { %v3892_v57 = vld.sshfl [vmem:[#allocation1] sm:$0xff pattern:$0x73625140]  ;;  %v630_v20 = vsel %vm611_vm3, %v3902_v12, -inf  ;;  %823 = vmatpush.bf16.msrb.mxu1 %v814_v9 }
 0x18a   :  { %1444 = vst [vmem:[#allocation1] ss:$4 sm:$0xff] %v967_v54  ;;  %631 = vmax.xlane.f32.xlu1 %v630_v20  ;;  %v455_v54 = vsel %vm367_vm0, %v431_v44, %v439_v50  ;;  %v3960_v44 = vadd.f32 %v3894_v0, %v3869_v26 }
 0x18b   :  { %v795_v58 = vsel %vm367_vm0, %v455_v54, 0 }
 0x18c   :  { %804 = vmatpush.bf16.msrb.mxu0 %v795_v58  ;;  %v1554_v58 = vld [vmem:[#allocation2 + $0x10] sm:$0xf] }
 0x18d   :  { %v516_v21 = vpop.f32.mrf.mxu3  ;;  %v1562_v60 = vrot.slane %v1554_v58, 2 }
 0x18e   :  { %v3913_v27 = vadd.f32 %v516_v21, %v3869_v26  ;;  %v590_v35 = vpop.f32.mrf.mxu2 }
 0x18f   :  { %v573_v30 = vpop.f32.mrf.mxu0  ;;  %v1573_v61 = vsel %vm367_vm0, %v1554_v58, %v1562_v60 }
 0x190   :  { %v618_v31 = vsel %vm611_vm3, %v3913_v27, -inf }
 0x191   :  { %v3906_v18 = vld.sshfl [vmem:[#allocation1] sm:$0xff pattern:$0x73625140]  ;;  %619 = vmax.xlane.f32.xlu0 %v618_v31 }
 0x192   :  { %1468 = vst [vmem:[#allocation1] ss:$4 sm:$0xff] %v970_v4  ;;  %v462_v4 = vsel %vm371_vm2, %v432_v46, %v440_v51  ;;  %v1518_v46 = vld [vmem:[#allocation2 + $0xc] sm:$0xf]  ;;  %v627_v51 = vsel %vm611_vm3, %v3960_v44, -inf }
 0x193   :  { %v464_v7 = vrot.slane %v462_v4, 2  ;;  %v1526_v50 = vrot.slane %v1518_v46, 2  ;;  %v1574_v4 = vsel %vm371_vm2, %v1554_v58, %v1562_v60  ;;  %v1520_v58 = vld [vmem:[#allocation2 + $0x24] sm:$0xf] }
 0x195   :  { %v518_v41 = vpop.f32.mrf.mxu3  ;;  %v851_v10 = vsel %vm367_vm0, %v464_v7, 0  ;;  %v1537_v54 = vsel %vm367_vm0, %v1518_v46, %v1526_v50  ;;  %v1519_v7 = vld [vmem:[#allocation2 + $0x18] sm:$0xf] }
 0x196   :  { %860 = vmatpush.bf16.msra.mxu3 %v851_v10  ;;  %v1527_v9 = vrot.slane %v1519_v7, 2 }
 0x198   :  { %v1543_v10 = vsel %vm367_vm0, %v1519_v7, %v1527_v9 }
 0x199   :  { %v3918_v37 = vld.sshfl [vmem:[#allocation1] sm:$0xff pattern:$0x73625140]  ;;  %1044 = vrot.lane.b32.xlu2 %v3829_v33, %s3723_s2  ;;  %v1553_v33 = vld [vmem:[#allocation2 + $0x4] sm:$0xf] }
 0x19a   :  { %1493 = vst [vmem:[#allocation1] ss:$4 sm:$0xff] %v973_v34  ;;  %v1561_v14 = vrot.slane %v1553_v33, 2 }
 0x19c   :  { %v1567_v17 = vsel %vm367_vm0, %v1553_v33, %v1561_v14  ;;  %v1568_v43 = vsel %vm371_vm2, %v1553_v33, %v1561_v14  ;;  %v1576_v33 = vrot.slane %v1574_v4, 2 }
 0x19d   :  { %v535_v5 = vpop.f32.mrf.mxu3  ;;  %v1570_v41 = vrot.slane %v1568_v43, 2  ;;  %v1544_v43 = vsel %vm371_vm2, %v1519_v7, %v1527_v9 }
 0x19e   :  { %v3932_v8 = vadd.f32 %v535_v5, %v3869_v26 }
 0x1a0   :  { %v621_v15 = vsel %vm611_vm3, %v3932_v8, -inf }
 0x1a1   :  { %v3928_v1 = vld.sshfl [vmem:[#allocation1] sm:$0xff pattern:$0x73625140]  ;;  %622 = vmax.xlane.f32.xlu0 %v621_v15 }
 0x1a2   :  { %1627 = vst [vmem:[#allocation1] ss:$4 sm:$0xff] %v1531_v63  ;;  %v1555_v15 = vld [vmem:[#allocation2 + $0x1c] sm:$0xf] }
 0x1a5   :  { %v537_v21 = vpop.f32.mrf.mxu3 }
 0x1a9   :  { %v3943_v20 = vld.sshfl [vmem:[#allocation1] sm:$0xff pattern:$0x73625140]  ;;  %625 = vmax.xlane.f32.xlu0 %v624_v25 }
 0x1aa   :  { %1632 = vst [vmem:[#allocation1] ss:$4 sm:$0xff] %v1567_v17  ;;  %v1563_v17 = vrot.slane %v1555_v15, 2 }
 0x1ac   :  { %v1579_v21 = vsel %vm367_vm0, %v1555_v15, %v1563_v17 }
 0x1ad   :  { %v607_v31 = vpop.f32.mrf.mxu3 }
 0x1ae   :  { %v3951_v34 = vadd.f32 %v607_v31, %v3869_v26  ;;  %v1538_v26 = vsel %vm371_vm2, %v1518_v46, %v1526_v50 }
 0x1af   :  { %v1540_v0 = vrot.slane %v1538_v26, 2  ;;  %v1528_v26 = vrot.slane %v1520_v58, 2 }
 0x1b0   :  { %v633_v35 = vsel %vm611_vm3, %v3951_v34, -inf }
 0x1b1   :  { %v3948_v30 = vld.sshfl [vmem:[#allocation1] sm:$0xff pattern:$0x73625140]  ;;  %634 = vmax.xlane.f32.xlu1 %v633_v35  ;;  %v1546_v35 = vrot.slane %v1544_v43, 2 }
 0x1b2   :  { %1657 = vst [vmem:[#allocation1] ss:$4 sm:$0xff] %v1534_v29 }
 0x1b5   :  { %v609_v48 = vpop.f32.mrf.mxu3 }
 0x1b6   :  { %v1580_v48 = vsel %vm371_vm2, %v1555_v15, %v1563_v17 }
 0x1b9   :  { %v3956_v40 = vld.sshfl [vmem:[#allocation1] sm:$0xff pattern:$0x73625140]  ;;  %628 = vmax.xlane.f32.xlu1 %v627_v51  ;;  %v1582_v51 = vrot.slane %v1580_v48, 2 }
 0x1ba   :  { %1663 = vst [vmem:[#allocation1] ss:$4 sm:$0xff] %v1570_v41 }
 0x1c1   :  { %v3965_v55 = vld.sshfl [vmem:[#allocation1] sm:$0xff pattern:$0x73625140] }
 0x1c2   :  { %1687 = vst [vmem:[#allocation1] ss:$4 sm:$0xff] %v1537_v54 }
 0x1c9   :  { %v3968_v63 = vld.sshfl [vmem:[#allocation1] sm:$0xff pattern:$0x73625140] }
 0x1ca   :  { %1692 = vst [vmem:[#allocation1] ss:$4 sm:$0xff] %v1573_v61 }
 0x1d1   :  { %v3971_v2 = vld.sshfl [vmem:[#allocation1] sm:$0xff pattern:$0x73625140] }
 0x1d2   :  { %1717 = vst [vmem:[#allocation1] ss:$4 sm:$0xff] %v1540_v0  ;;  %v1549_v0 = vsel %vm367_vm0, %v1520_v58, %v1528_v26 }
 0x1d9   :  { %v3974_v5 = vld.sshfl [vmem:[#allocation1] sm:$0xff pattern:$0x73625140] }
 0x1da   :  { %1723 = vst [vmem:[#allocation1] ss:$4 sm:$0xff] %v1576_v33  ;;  %v1556_v33 = vld [vmem:[#allocation2 + $0x28] sm:$0xf] }
 0x1db   :  { %v1564_v9 = vrot.slane %v1556_v33, 2 }
 0x1e1   :  { %v3977_v14 = vld.sshfl [vmem:[#allocation1] sm:$0xff pattern:$0x73625140] }
 0x1e2   :  { %1747 = vst [vmem:[#allocation1] ss:$4 sm:$0xff] %v1543_v10 }
 0x1e4   :  { %v614_v25 = vpop.xlane.xlu2 %613 }
 0x1e5   :  { %v636_v29 = vsub.f32 %v3875_v32, %v614_v25 }
 0x1e7   :  { %v644_v31 = vmul.f32 1.442695, %v636_v29 }
 0x1e9   :  { %v3980_v24 = vld.sshfl [vmem:[#allocation1] sm:$0xff pattern:$0x73625140]  ;;  %3457 = vpow2.f32 %v644_v31 }
 0x1ea   :  { %1752 = vst [vmem:[#allocation1] ss:$4 sm:$0xff] %v1579_v21 }
 0x1ef   :  { %v3986_v46 = vpop.eup %3457 }
 0x1f0   :  { %v660_v50 = vsel %vm611_vm3, %v3986_v46, 0.0 }
 0x1f1   :  { %v3984_v41 = vld.sshfl [vmem:[#allocation1] sm:$0xff pattern:$0x73625140]  ;;  %661 = vadd.xlane.f32.xlu0 %v660_v50 }
 0x1f2   :  { %1777 = vst [vmem:[#allocation1] ss:$4 sm:$0xff] %v1546_v35  ;;  %v1550_v35 = vsel %vm371_vm2, %v1520_v58, %v1528_v26 }
 0x1f3   :  { %v1552_v48 = vrot.slane %v1550_v35, 2 }
 0x1f4   :  { %v617_v32 = vpop.xlane.xlu2 %616 }
 0x1f5   :  { %v637_v60 = vsub.f32 %v3888_v49, %v617_v32  ;;  %v1585_v49 = vsel %vm367_vm0, %v1556_v33, %v1564_v9 }
 0x1f7   :  { %v646_v61 = vmul.f32 1.442695, %v637_v60  ;;  %v1586_v60 = vsel %vm371_vm2, %v1556_v33, %v1564_v9 }
 0x1f8   :  { %v1588_v58 = vrot.slane %v1586_v60, 2  ;;  %v1590_v60 = vld [vmem:[#allocation2 + $0x14] sm:$0xf] }
 0x1f9   :  { %v3991_v54 = vld.sshfl [vmem:[#allocation1] sm:$0xff pattern:$0x73625140]  ;;  %3459 = vpow2.f32 %v646_v61 }
 0x1fa   :  { %1783 = vst [vmem:[#allocation1] ss:$4 sm:$0xff] %v1582_v51 }
 0x1fd   :  { %v632_v15 = vpop.xlane.xlu1 %631 }
 0x1fe   :  { %v642_v17 = vsub.f32 %v3902_v12, %v632_v15 }
 0x1ff   :  { %v3997_v7 = vpop.eup %3459 }
 0x200   :  { %v663_v10 = vsel %vm611_vm3, %v3997_v7, 0.0  ;;  %v656_v25 = vmul.f32 1.442695, %v642_v17 }
 0x201   :  { %v3995_v4 = vld.sshfl [vmem:[#allocation1] sm:$0xff pattern:$0x73625140]  ;;  %664 = vadd.xlane.f32.xlu1 %v663_v10 }
 0x202   :  { %1807 = vst [vmem:[#allocation1] ss:$4 sm:$0xff] %v1549_v0  ;;  %3461 = vpow2.f32 %v656_v25  ;;  %v1589_v0 = vld [vmem:[#allocation2 + $0x8] sm:$0xf] }
 0x203   :  { %v1597_v17 = vrot.slane %v1589_v0, 2 }
 0x204   :  { %v620_v29 = vpop.xlane.xlu0 %619 }
 0x205   :  { %v638_v31 = vsub.f32 %v3913_v27, %v620_v29 }
 0x207   :  { %v648_v43 = vmul.f32 1.442695, %v638_v31 }
 0x208   :  { %v4007_v50 = vpop.eup %3461 }
 0x209   :  { %v4003_v21 = vld.sshfl [vmem:[#allocation1] sm:$0xff pattern:$0x73625140]  ;;  %3463 = vpow2.f32 %v648_v43  ;;  %v678_v12 = vsel %vm611_vm3, %v4007_v50, 0.0  ;;  %v1604_v43 = vsel %vm371_vm2, %v1589_v0, %v1597_v17 }
 0x20a   :  { %1812 = vst [vmem:[#allocation1] ss:$4 sm:$0xff] %v1585_v49  ;;  %679 = vadd.xlane.f32.xlu1 %v678_v12  ;;  %v1603_v49 = vsel %vm367_vm0, %v1589_v0, %v1597_v17 }
 0x20f   :  { %v4013_v32 = vpop.eup %3463 }
 0x210   :  { %v666_v27 = vsel %vm611_vm3, %v4013_v32, 0.0 }
 0x211   :  { %v4009_v51 = vld.sshfl [vmem:[#allocation1] sm:$0xff pattern:$0x73625140]  ;;  %667 = vadd.xlane.f32.xlu2 %v666_v27 }
 0x212   :  { %1837 = vst [vmem:[#allocation1] ss:$4 sm:$0xff] %v1552_v48 }
 0x214   :  { %v623_v26 = vpop.xlane.xlu0 %622 }
 0x215   :  { %v639_v10 = vsub.f32 %v3932_v8, %v623_v26  ;;  %v1606_v8 = vrot.slane %v1604_v43, 2 }
 0x217   :  { %v650_v15 = vmul.f32 1.442695, %v639_v10 }
 0x219   :  { %v4018_v61 = vld.sshfl [vmem:[#allocation1] sm:$0xff pattern:$0x73625140]  ;;  %3465 = vpow2.f32 %v650_v15 }
 0x21a   :  { %1843 = vst [vmem:[#allocation1] ss:$4 sm:$0xff] %v1588_v58  ;;  %v1598_v58 = vrot.slane %v1590_v60, 2 }
 0x21c   :  { %v626_v33 = vpop.xlane.xlu0 %625  ;;  %v1609_v26 = vsel %vm367_vm0, %v1590_v60, %v1598_v58 }
 0x21d   :  { %v640_v9 = vsub.f32 %v3941_v19, %v626_v33 }
 0x21f   :  { %v4025_v29 = vpop.eup %3465  ;;  %v652_v31 = vmul.f32 1.442695, %v640_v9 }
 0x220   :  { %v669_v35 = vsel %vm611_vm3, %v4025_v29, 0.0 }
 0x221   :  { %v4022_v25 = vld.sshfl [vmem:[#allocation1] sm:$0xff pattern:$0x73625140]  ;;  %3467 = vpow2.f32 %v652_v31  ;;  %670 = vadd.xlane.f32.xlu0 %v669_v35 }
 0x222   :  { %1972 = vst [vmem:[#allocation1] ss:$4 sm:$0xff] %v1603_v49  ;;  %v1610_v49 = vsel %vm371_vm2, %v1590_v60, %v1598_v58 }
 0x223   :  { %v1612_v33 = vrot.slane %v1610_v49, 2 }
 0x224   :  { %v635_v12 = vpop.xlane.xlu1 %634 }
 0x227   :  { %v4032_v27 = vpop.eup %3467 }
 0x228   :  { %v672_v19 = vsel %vm611_vm3, %v4032_v27, 0.0 }
 0x229   :  { %v4030_v48 = vld.sshfl [vmem:[#allocation1] sm:$0xff pattern:$0x73625140]  ;;  %1069 = vrot.lane.b32.xlu2 %v3832_v36, %s3723_s2  ;;  %673 = vadd.xlane.f32.xlu1 %v672_v19  ;;  %v1591_v36 = vld [vmem:[#allocation2 + $0x20] sm:$0xf] }
 0x22a   :  { %1997 = vst [vmem:[#allocation1] ss:$4 sm:$0xff] %v1606_v8  ;;  %v1599_v43 = vrot.slane %v1591_v36, 2 }
 0x22c   :  { %v629_v10 = vpop.xlane.xlu1 %628  ;;  %v1615_v35 = vsel %vm367_vm0, %v1591_v36, %v1599_v43 }
 0x22d   :  { %v641_v15 = vsub.f32 %v3960_v44, %v629_v10 }
 0x22f   :  { %v654_v17 = vmul.f32 1.442695, %v641_v15 }
 0x231   :  { %v4039_v0 = vld.sshfl [vmem:[#allocation1] sm:$0xff pattern:$0x73625140]  ;;  %3469 = vpow2.f32 %v654_v17  ;;  %1195 = vrot.lane.b32.xlu2 %v3863_v16, %s3723_s2  ;;  %v1616_v16 = vsel %vm371_vm2, %v1591_v36, %v1599_v43  ;;  %v2204_v43 = vld [vmem:[#allocation2 + $0x4] sm:$0xf] }
 0x232   :  { %2021 = vst [vmem:[#allocation1] ss:$4 sm:$0xff] %v1609_v26  ;;  %v1618_v60 = vrot.slane %v1616_v16, 2  ;;  %v643_v26 = vsub.f32 %v3951_v34, %v635_v12 }
 0x234   :  { %v658_v17 = vmul.f32 1.442695, %v643_v26 }
 0x235   :  { %1075 = vrot.lane.b32.xlu0 %v3836_v42, %s3723_s2  ;;  %v1592_v42 = vld [vmem:[#allocation2 + $0x2c] sm:$0xf] }
 0x236   :  { %v1600_v19 = vrot.slane %v1592_v42, 2  ;;  %3471 = vpow2.f32 %v658_v17 }
 0x237   :  { %v4049_v31 = vpop.eup %3469 }
 0x238   :  { %v675_v44 = vsel %vm611_vm3, %v4049_v31, 0.0  ;;  %v1621_v10 = vsel %vm367_vm0, %v1592_v42, %v1600_v19 }
 0x239   :  { %v4045_v9 = vld.sshfl [vmem:[#allocation1] sm:$0xff pattern:$0x73625140]  ;;  %676 = vadd.xlane.f32.xlu1 %v675_v44 }
 0x23a   :  { %2046 = vst [vmem:[#allocation1] ss:$4 sm:$0xff] %v1612_v33  ;;  %v2168_v33 = vld [vmem:[#allocation2] sm:$0xf] }
 0x23b   :  { %v2176_v12 = vrot.slane %v2168_v33, 2 }
 0x23c   :  { %v4076_v34 = vpop.eup %3471 }
 0x23d   :  { %1164 = vrot.lane.b32.xlu0 %v3857_v6, %s3723_s2  ;;  %v1622_v6 = vsel %vm371_vm2, %v1592_v42, %v1600_v19 }
 0x23e   :  { %v1624_v49 = vrot.slane %v1622_v6, 2  ;;  %v2169_v6 = vld [vmem:[#allocation2 + $0xc] sm:$0xf] }
 0x241   :  { %v4054_v8 = vld.sshfl [vmem:[#allocation1] sm:$0xff pattern:$0x73625140] }
 0x242   :  { %2070 = vst [vmem:[#allocation1] ss:$4 sm:$0xff] %v1615_v35 }
 0x245   :  { %984 = vrot.lane.b32.xlu0 %v3796_v52, %s3723_s2 }
 0x249   :  { %v4059_v58 = vld.sshfl [vmem:[#allocation1] sm:$0xff pattern:$0x73625140] }
 0x24a   :  { %2095 = vst [vmem:[#allocation1] ss:$4 sm:$0xff] %v1618_v60 }
 0x24d   :  { %1159 = vrot.lane.b32.xlu0 %v3854_v3, %s3723_s2  ;;  %v681_v3 = vsel %vm611_vm3, %v4076_v34, 0.0 }
 0x251   :  { %v4065_v15 = vld.sshfl [vmem:[#allocation1] sm:$0xff pattern:$0x73625140] }
 0x252   :  { %2119 = vst [vmem:[#allocation1] ss:$4 sm:$0xff] %v1621_v10  ;;  %1039 = vrot.lane.b32.xlu1 %v3819_v23, %s3723_s2  ;;  %v2182_v23 = vsel %vm367_vm0, %v2168_v33, %v2176_v12 }
 0x255   :  { %1009 = vrot.lane.b32.xlu0 %v3803_v62, %s3723_s2  ;;  %v2212_v62 = vrot.slane %v2204_v43, 2 }
 0x257   :  { %v2218_v44 = vsel %vm367_vm0, %v2204_v43, %v2212_v62 }
 0x259   :  { %v4072_v52 = vld.sshfl [vmem:[#allocation1] sm:$0xff pattern:$0x73625140] }
 0x25a   :  { %2144 = vst [vmem:[#allocation1] ss:$4 sm:$0xff] %v1624_v49  ;;  %682 = vadd.xlane.f32.xlu2 %v681_v3  ;;  %979 = vrot.lane.b32.xlu1 %v3788_v39, %s3723_s2  ;;  %v2183_v39 = vsel %vm371_vm2, %v2168_v33, %v2176_v12  ;;  %v2177_v49 = vrot.slane %v2169_v6, 2 }
 0x25b   :  { %v2185_v42 = vrot.slane %v2183_v39, 2 }
 0x25c   :  { %v2188_v12 = vsel %vm367_vm0, %v2169_v6, %v2177_v49 }
 0x25d   :  { %1099 = vrot.lane.b32.xlu0 %v3840_v47, %s3723_s2 }
 0x261   :  { %v4083_v36 = vld.sshfl [vmem:[#allocation1] sm:$0xff pattern:$0x73625140] }
 0x262   :  { %2278 = vst [vmem:[#allocation1] ss:$4 sm:$0xff] %v2182_v23  ;;  %1135 = vrot.lane.b32.xlu1 %v3850_v59, %s3723_s2  ;;  %v2219_v59 = vsel %vm371_vm2, %v2204_v43, %v2212_v62  ;;  %v1045_v23 = vpop.permute.xlu2 %1044 }
 0x263   :  { %v2221_v10 = vrot.slane %v2219_v59, 2 }
 0x264   :  { %v662_v16 = vpop.xlane.xlu0 %661 }
 0x265   :  { %3473 = vrcp.f32 %v662_v16 }
 0x269   :  { %v4090_v35 = vld.sshfl [vmem:[#allocation1] sm:$0xff pattern:$0x73625140] }
 0x26a   :  { %2283 = vst [vmem:[#allocation1] ss:$4 sm:$0xff] %v2218_v44 }
 0x26b   :  { %v3474_v60 = vpop.eup %3473 }
 0x26c   :  { %v692_v26 = vmul.f32 %v3474_v60, %v3986_v46 }
 0x26e   :  { %v700_v47 = vpack.c.bf16 %v692_v26, %v692_v26 }
 0x270   :  { %709 = vst.msk [vmem:[%s4751_s6] sm:$0x3] %vm708_vm4, %v700_v47  ;;  %3249 = vmatmul.msk.bf16.vlgmr.msra.gmra.mxu0 %vm717_vm5, %v700_v47 }
 0x271   :  { %v4093_v19 = vld.sshfl [vmem:[#allocation1] sm:$0xff pattern:$0x73625140] }
 0x272   :  { %2308 = vst [vmem:[#allocation1] ss:$4 sm:$0xff] %v2185_v42  ;;  %1015 = vrot.lane.b32.xlu2 %v3812_v11, %s3723_s2  ;;  %v2205_v11 = vld [vmem:[#allocation2 + $0x10] sm:$0xf]  ;;  %v2189_v42 = vsel %vm371_vm2, %v2169_v6, %v2177_v49 }
 0x273   :  { %v2213_v44 = vrot.slane %v2205_v11, 2  ;;  %v2191_v59 = vrot.slane %v2189_v42, 2 }
 0x274   :  { %v665_v46 = vpop.xlane.xlu1 %664 }
 0x275   :  { %3475 = vrcp.f32 %v665_v46  ;;  %v2224_v16 = vsel %vm367_vm0, %v2205_v11, %v2213_v44  ;;  %v2225_v6 = vsel %vm371_vm2, %v2205_v11, %v2213_v44 }
 0x279   :  { %v4104_v17 = vld.sshfl [vmem:[#allocation1] sm:$0xff pattern:$0x73625140] }
 0x27a   :  { %2314 = vst [vmem:[#allocation1] ss:$4 sm:$0xff] %v2221_v10  ;;  %1189 = vrot.lane.b32.xlu2 %v3860_v13, %s3723_s2 }
 0x27b   :  { %v3476_v33 = vpop.eup %3475 }
 0x27c   :  { %v693_v43 = vmul.f32 %v3476_v33, %v3997_v7 }
 0x27d   :  { %v680_v13 = vpop.xlane.xlu1 %679 }
 0x27e   :  { %v701_v62 = vpack.c.bf16 %v693_v43, %v693_v43  ;;  %3477 = vrcp.f32 %v680_v13 }
 0x280   :  { %710 = vst.msk [vmem:[%s4751_s6 + $0x8] sm:$0x3] %vm708_vm4, %v701_v62  ;;  %3250 = vmatmul.msk.bf16.vlgmr.msra.gmra.mxu1 %vm717_vm5, %v701_v62 }
 0x281   :  { %v4109_v3 = vld.sshfl [vmem:[#allocation1] sm:$0xff pattern:$0x73625140] }
 0x282   :  { %2338 = vst [vmem:[#allocation1] ss:$4 sm:$0xff] %v2188_v12  ;;  %1104 = vrot.lane.b32.xlu2 %v3845_v53, %s3723_s2  ;;  %v2170_v12 = vld [vmem:[#allocation2 + $0x18] sm:$0xf] }
 0x283   :  { %v2178_v43 = vrot.slane %v2170_v12, 2 }
 0x284   :  { %v668_v7 = vpop.xlane.xlu2 %667  ;;  %v3478_v60 = vpop.eup %3477 }
 0x285   :  { %3479 = vrcp.f32 %v668_v7  ;;  %v698_v26 = vmul.f32 %v3478_v60, %v4007_v50  ;;  %v1050_v50 = vsel %vm466_vm1, %v1045_v23, 0  ;;  %v2194_v11 = vsel %vm367_vm0, %v2170_v12, %v2178_v43 }
 0x287   :  { %v706_v10 = vpack.c.bf16 %v698_v26, %v698_v26 }
 0x289   :  { %v4120_v39 = vld.sshfl [vmem:[#allocation1] sm:$0xff pattern:$0x73625140]  ;;  %715 = vst.msk [vmem:[%s4751_s6 + $0x30] sm:$0x3] %vm708_vm4, %v706_v10 }
 0x28a   :  { %2343 = vst [vmem:[#allocation1] ss:$4 sm:$0xff] %v2224_v16  ;;  %1129 = vrot.lane.b32.xlu2 %v3848_v56, %s3723_s2  ;;  %v2227_v56 = vrot.slane %v2225_v6, 2  ;;  %v2206_v16 = vld [vmem:[#allocation2 + $0x1c] sm:$0xf] }
 0x28b   :  { %v3480_v47 = vpop.eup %3479  ;;  %v2214_v60 = vrot.slane %v2206_v16, 2 }
 0x28c   :  { %v694_v53 = vmul.f32 %v3480_v47, %v4013_v32 }
 0x28d   :  { %v2230_v26 = vsel %vm367_vm0, %v2206_v16, %v2214_v60 }
 0x28e   :  { %v702_v33 = vpack.c.bf16 %v694_v53, %v694_v53 }
 0x290   :  { %711 = vst.msk [vmem:[%s4751_s6 + $0x10] sm:$0x3] %vm708_vm4, %v702_v33  ;;  %3251 = vmatmul.msk.bf16.vlgmr.msra.gmra.mxu2 %vm717_vm5, %v702_v33  ;;  %v2195_v33 = vsel %vm371_vm2, %v2170_v12, %v2178_v43 }
 0x291   :  { %v4126_v46 = vld.sshfl [vmem:[#allocation1] sm:$0xff pattern:$0x73625140]  ;;  %1059 = vmatpush.bf16.xpose.msra.mxu2 %v1050_v50 }
 0x292   :  { %2368 = vst [vmem:[#allocation1] ss:$4 sm:$0xff] %v2191_v59 }
 0x294   :  { %v671_v49 = vpop.xlane.xlu0 %670 }
 0x295   :  { %3481 = vrcp.f32 %v671_v49  ;;  %v2231_v49 = vsel %vm371_vm2, %v2206_v16, %v2214_v60  ;;  %v1070_v60 = vpop.permute.xlu2 %1069 }
 0x299   :  { %v4140_v32 = vld.sshfl [vmem:[#allocation1] sm:$0xff pattern:$0x73625140] }
 0x29a   :  { %2374 = vst [vmem:[#allocation1] ss:$4 sm:$0xff] %v2227_v56 }
 0x29b   :  { %v3482_v62 = vpop.eup %3481 }
 0x29c   :  { %v695_v44 = vmul.f32 %v3482_v62, %v4025_v29  ;;  %v674_v13 = vpop.xlane.xlu1 %673  ;;  %v2233_v62 = vrot.slane %v2231_v49, 2 }
 0x29d   :  { %3483 = vrcp.f32 %v674_v13  ;;  %v2171_v13 = vld [vmem:[#allocation2 + $0x24] sm:$0xf] }
 0x29e   :  { %v703_v7 = vpack.c.bf16 %v695_v44, %v695_v44 }
 0x2a0   :  { %712 = vst.msk [vmem:[%s4751_s6 + $0x18] sm:$0x3] %vm708_vm4, %v703_v7  ;;  %3252 = vmatmul.msk.bf16.vlgmr.msrb.gmra.mxu3 %vm717_vm5, %v703_v7  ;;  %3255 = vmatmul.msk.bf16.vlgmr.msrb.gmra.mxu2 %vm717_vm5, %v706_v10  ;;  %v2197_v10 = vrot.slane %v2195_v33, 2 }
 0x2a1   :  { %v4143_v23 = vld.sshfl [vmem:[#allocation1] sm:$0xff pattern:$0x73625140] }
 0x2a2   :  { %2398 = vst [vmem:[#allocation1] ss:$4 sm:$0xff] %v2194_v11 }
 0x2a3   :  { %v3484_v42 = vpop.eup %3483 }
 0x2a4   :  { %v696_v29 = vmul.f32 %v3484_v42, %v4032_v27 }
 0x2a6   :  { %v704_v59 = vpack.c.bf16 %v696_v29, %v696_v29 }
 0x2a7   :  { %v1076_v53 = vpop.permute.xlu0 %1075 }
 0x2a8   :  { %713 = vst.msk [vmem:[%s4751_s6 + $0x20] sm:$0x3] %vm708_vm4, %v704_v59  ;;  %v1081_v6 = vsel %vm466_vm1, %v1076_v53, 0  ;;  %3253 = vmatmul.msk.bf16.vlgmr.msrb.gmra.mxu0 %vm717_vm5, %v704_v59 }
 0x2a9   :  { %v4153_v47 = vld.sshfl [vmem:[#allocation1] sm:$0xff pattern:$0x73625140]  ;;  %1090 = vmatpush.bf16.xpose.msrb.mxu3 %v1081_v6 }
 0x2aa   :  { %2403 = vst [vmem:[#allocation1] ss:$4 sm:$0xff] %v2230_v26  ;;  %v2179_v26 = vrot.slane %v2171_v13, 2 }
 0x2ac   :  { %v677_v56 = vpop.xlane.xlu1 %676  ;;  %v2200_v29 = vsel %vm367_vm0, %v2171_v13, %v2179_v26 }
 0x2ad   :  { %3485 = vrcp.f32 %v677_v56  ;;  %v1196_v56 = vpop.permute.xlu2 %1195 }
 0x2af   :  { %v1165_v27 = vpop.permute.xlu0 %1164 }
 0x2b0   :  { %v1170_v12 = vsel %vm466_vm1, %v1165_v27, 0  ;;  %v2201_v27 = vsel %vm371_vm2, %v2171_v13, %v2179_v26 }
 0x2b1   :  { %v4163_v50 = vld.sshfl [vmem:[#allocation1] sm:$0xff pattern:$0x73625140]  ;;  %1179 = vmatpush.bf16.xpose.msrb.mxu2 %v1170_v12  ;;  %v2203_v49 = vrot.slane %v2201_v27, 2 }
 0x2b2   :  { %4752 = vst [vmem:[#allocation17_spill] sm:$0xff] %v4163_v50 }
 0x2b3   :  { %2428 = vst [vmem:[#allocation1] ss:$4 sm:$0xff] %v2197_v10  ;;  %v3486_v43 = vpop.eup %3485 }
 0x2b4   :  { %v697_v44 = vmul.f32 %v3486_v43, %v4049_v31  ;;  %v2207_v31 = vld [vmem:[#allocation2 + $0x28] sm:$0xf] }
 0x2b5   :  { %v2215_v53 = vrot.slane %v2207_v31, 2 }
 0x2b6   :  { %v705_v7 = vpack.c.bf16 %v697_v44, %v697_v44 }
 0x2b7   :  { %v985_v42 = vpop.permute.xlu0 %984  ;;  %v2236_v33 = vsel %vm367_vm0, %v2207_v31, %v2215_v53  ;;  %v2237_v44 = vsel %vm371_vm2, %v2207_v31, %v2215_v53  ;;  %v1201_v53 = vsel %vm466_vm1, %v1196_v56, 0 }
 0x2b8   :  { %714 = vst.msk [vmem:[%s4751_s6 + $0x28] sm:$0x3] %vm708_vm4, %v705_v7  ;;  %v990_v16 = vsel %vm466_vm1, %v985_v42, 0  ;;  %3254 = vmatmul.msk.bf16.vlgmr.msrb.gmra.mxu1 %vm717_vm5, %v705_v7  ;;  %v2239_v7 = vrot.slane %v2237_v44, 2 }
 0x2b9   :  { %999 = vmatpush.bf16.xpose.msra.mxu0 %v990_v16 }
 0x2ba   :  { %v4167_v11 = vld.sshfl [vmem:[#allocation1] sm:$0xff pattern:$0x73625140] }
 0x2bb   :  { %4753 = vst [vmem:[#allocation18_spill] sm:$0xff] %v4167_v11 }
 0x2bc   :  { %2434 = vst [vmem:[#allocation1] ss:$4 sm:$0xff] %v2233_v62 }
 0x2bf   :  { %v1160_v42 = vpop.permute.xlu0 %1159 }
 0x2c3   :  { %v4177_v59 = vld.sshfl [vmem:[#allocation1] sm:$0xff pattern:$0x73625140] }
 0x2c4   :  { %2458 = vst [vmem:[#allocation1] ss:$4 sm:$0xff] %v2200_v29  ;;  %v1040_v10 = vpop.permute.xlu1 %1039 }
 0x2c5   :  { %3259 = vmatmul.msk.bf16.vlgmr.msra.gmra.mxu2 %vm466_vm1, %v1040_v10  ;;  %v2240_v10 = vld [vmem:[#allocation2 + $0x8] sm:$0xf] }
 0x2c6   :  { %v2248_v31 = vrot.slane %v2240_v10, 2 }
 0x2c7   :  { %v1010_v44 = vpop.permute.xlu0 %1009 }
 0x2cb   :  { %v4180_v6 = vld.sshfl [vmem:[#allocation1] sm:$0xff pattern:$0x73625140] }
 0x2cc   :  { %2463 = vst [vmem:[#allocation1] ss:$4 sm:$0xff] %v2236_v33  ;;  %v980_v43 = vpop.permute.xlu1 %979 }
 0x2cd   :  { %v683_v62 = vpop.xlane.xlu2 %682  ;;  %3257 = vmatmul.msk.bf16.vlgmr.msra.gmra.mxu0 %vm466_vm1, %v980_v43 }
 0x2ce   :  { %3487 = vrcp.f32 %v683_v62 }
 0x2d3   :  { %v4184_v12 = vld.sshfl [vmem:[#allocation1] sm:$0xff pattern:$0x73625140] }
 0x2d4   :  { %2488 = vst [vmem:[#allocation1] ss:$4 sm:$0xff] %v2203_v49  ;;  %v3488_v16 = vpop.eup %3487  ;;  %v1136_v29 = vpop.permute.xlu1 %1135 }
 0x2d5   :  { %v699_v13 = vmul.f32 %v3488_v16, %v4076_v34  ;;  %v1016_v26 = vpop.permute.xlu2 %1015  ;;  %3263 = vmatmul.msk.bf16.vlgmr.msrb.gmra.mxu2 %vm466_vm1, %v1160_v42  ;;  %v1141_v43 = vsel %vm466_vm1, %v1136_v29, 0  ;;  %v2254_v34 = vsel %vm367_vm0, %v2240_v10, %v2248_v31  ;;  %v2255_v42 = vsel %vm371_vm2, %v2240_v10, %v2248_v31  ;;  %v2241_v29 = vld [vmem:[#allocation2 + $0x14] sm:$0xf] }
 0x2d6   :  { %v1021_v27 = vsel %vm466_vm1, %v1016_v26, 0  ;;  %v2257_v56 = vrot.slane %v2255_v42, 2 }
 0x2d7   :  { %v707_v49 = vpack.c.bf16 %v699_v13, %v699_v13  ;;  %1030 = vmatpush.bf16.xpose.msra.mxu1 %v1021_v27  ;;  %v2249_v27 = vrot.slane %v2241_v29, 2 }
 0x2d9   :  { %716 = vst.msk [vmem:[%s4751_s6 + $0x38] sm:$0x3] %vm708_vm4, %v707_v49  ;;  %3256 = vmatmul.msk.bf16.vlgmr.msra.gmra.mxu3 %vm717_vm5, %v707_v49  ;;  %v2260_v49 = vsel %vm367_vm0, %v2241_v29, %v2249_v27  ;;  %v2261_v10 = vsel %vm371_vm2, %v2241_v29, %v2249_v27  ;;  %v2243_v29 = vld [vmem:[#allocation2 + $0x2c] sm:$0xf] }
 0x2da   :  { %1210 = vmatpush.bf16.xpose.msra.mxu3 %v1201_v53  ;;  %v2263_v31 = vrot.slane %v2261_v10, 2  ;;  %v2251_v10 = vrot.slane %v2243_v29, 2 }
 0x2db   :  { %v4188_v33 = vld.sshfl [vmem:[#allocation1] sm:$0xff pattern:$0x73625140] }
 0x2dc   :  { %2494 = vst [vmem:[#allocation1] ss:$4 sm:$0xff] %v2239_v7 }
 0x2dd   :  { %v1190_v7 = vpop.permute.xlu2 %1189 }
 0x2de   :  { %3258 = vmatmul.msk.bf16.vlgmr.msra.gmra.mxu1 %vm466_vm1, %v1010_v44 }
 0x2df   :  { %1150 = vmatpush.bf16.xpose.msrb.mxu1 %v1141_v43  ;;  %v1100_v43 = vpop.permute.xlu0 %1099 }
 0x2e3   :  { %v4201_v62 = vld.sshfl [vmem:[#allocation1] sm:$0xff pattern:$0x73625140] }
 0x2e4   :  { %2623 = vst [vmem:[#allocation1] ss:$4 sm:$0xff] %v2254_v34 }
 0x2e5   :  { %v1105_v13 = vpop.permute.xlu2 %1104 }
 0x2e6   :  { %v1110_v26 = vsel %vm466_vm1, %v1105_v13, 0 }
 0x2e7   :  { %1119 = vmatpush.bf16.xpose.msrb.mxu0 %v1110_v26 }
 0x2e9   :  { %3260 = vmatmul.msk.bf16.vlgmr.msrb.gmra.mxu3 %vm466_vm1, %v1070_v60 }
 0x2eb   :  { %v4205_v16 = vld.sshfl [vmem:[#allocation1] sm:$0xff pattern:$0x73625140] }
 0x2ec   :  { %4754 = vst [vmem:[#allocation19_spill] sm:$0xff] %v4205_v16 }
 0x2ed   :  { %2648 = vst [vmem:[#allocation1] ss:$4 sm:$0xff] %v2257_v56  ;;  %v732_v34 = vpop.f32.mrf.mxu0  ;;  %v1130_v44 = vpop.permute.xlu2 %1129  ;;  %v2242_v56 = vld [vmem:[#allocation2 + $0x20] sm:$0xf] }
 0x2ee   :  { %3261 = vmatmul.msk.bf16.vlgmr.msrb.gmra.mxu0 %vm466_vm1, %v1100_v43  ;;  %3262 = vmatmul.msk.bf16.vlgmr.msrb.gmra.mxu1 %vm466_vm1, %v1130_v44  ;;  %v2250_v60 = vrot.slane %v2242_v56, 2 }
 0x2f0   :  { %v2266_v26 = vsel %vm367_vm0, %v2242_v56, %v2250_v60  ;;  %v2267_v43 = vsel %vm371_vm2, %v2242_v56, %v2250_v60 }
 0x2f1   :  { %v2269_v44 = vrot.slane %v2267_v43, 2 }
 0x2f4   :  { %v4210_v53 = vld.sshfl [vmem:[#allocation1] sm:$0xff pattern:$0x73625140] }
 0x2f5   :  { %4755 = vst [vmem:[#allocation20_spill] sm:$0xff] %v4210_v53  ;;  %v734_v13 = vpop.f32.mrf.mxu0 }
 0x2f6   :  { %2672 = vst [vmem:[#allocation1] ss:$4 sm:$0xff] %v2260_v49 }
 0x2f9   :  { %3264 = vmatmul.msk.bf16.vlgmr.msra.gmra.mxu3 %vm466_vm1, %v1190_v7  ;;  %v2273_v7 = vsel %vm371_vm2, %v2243_v29, %v2251_v10 }
 0x2fd   :  { %v4215_v42 = vld.sshfl [vmem:[#allocation1] sm:$0xff pattern:$0x73625140]  ;;  %v751_v49 = vpop.f32.mrf.mxu1 }
 0x2fe   :  { %4756 = vst [vmem:[#allocation21_spill] sm:$0xff] %v4215_v42  ;;  %v2275_v42 = vrot.slane %v2273_v7, 2 }
 0x2ff   :  { %2697 = vst [vmem:[#allocation1] ss:$4 sm:$0xff] %v2263_v31  ;;  %v2272_v31 = vsel %vm367_vm0, %v2243_v29, %v2251_v10 }
 0x305   :  { %v753_v27 = vpop.f32.mrf.mxu1 }
 0x306   :  { %v4219_v53 = vld.sshfl [vmem:[#allocation1] sm:$0xff pattern:$0x73625140] }
 0x307   :  { %4757 = vst [vmem:[#allocation22_spill] sm:$0xff] %v4219_v53 }
 0x308   :  { %2721 = vst [vmem:[#allocation1] ss:$4 sm:$0xff] %v2266_v26 }
 0x30f   :  { %v4222_v16 = vld.sshfl [vmem:[#allocation1] sm:$0xff pattern:$0x73625140] }
 0x310   :  { %4758 = vst [vmem:[#allocation23_spill] sm:$0xff] %v4222_v16 }
 0x311   :  { %2746 = vst [vmem:[#allocation1] ss:$4 sm:$0xff] %v2269_v44 }
 0x313   :  { %v769_v53 = vpop.f32.mrf.mxu2 }
 0x318   :  { %v4225_v13 = vld.sshfl [vmem:[#allocation1] sm:$0xff pattern:$0x73625140] }
 0x319   :  { %4759 = vst [vmem:[#allocation24_spill] sm:$0xff] %v4225_v13 }
 0x31a   :  { %2770 = vst [vmem:[#allocation1] ss:$4 sm:$0xff] %v2272_v31 }
 0x31b   :  { %v771_v56 = vpop.f32.mrf.mxu2 }
 0x321   :  { %v4228_v11 = vld.sshfl [vmem:[#allocation1] sm:$0xff pattern:$0x73625140] }
 0x322   :  { %4760 = vst [vmem:[#allocation25_spill] sm:$0xff] %v4228_v11 }
 0x323   :  { %2795 = vst [vmem:[#allocation1] ss:$4 sm:$0xff] %v2275_v42  ;;  %v788_v26 = vpop.f32.mrf.mxu3  ;;  %v843_v43 = vpop.f32.mrf.mxu2  ;;  %v975_v42 = vld [vmem:[#allocation10 + $0x4] sm:$0xf] }
 0x324   :  { %2831 = vst [vmem:[#allocation1 + $0x10] ss:$2 sm:$0xff] %v769_v53 }
 0x325   :  { %2833 = vst [vmem:[#allocation1 + $0x11] ss:$2 sm:$0xff] %v788_v26  ;;  %v806_v44 = vpop.f32.mrf.mxu0 }
 0x326   :  { %2839 = vst [vmem:[#allocation1 + $0x30] ss:$2 sm:$0xff] %v843_v43 }
 0x327   :  { %2835 = vst [vmem:[#allocation1 + $0x20] ss:$2 sm:$0xff] %v806_v44 }
 0x32a   :  { %v4230_v60 = vld.sshfl [vmem:[#allocation1] sm:$0xff pattern:$0x73625140] }
 0x32b   :  { %4761 = vst [vmem:[#allocation26_spill] sm:$0xff] %v4230_v60  ;;  %v790_v27 = vpop.f32.mrf.mxu3  ;;  %v845_v31 = vpop.f32.mrf.mxu2 }
 0x32c   :  { %2827 = vst [vmem:[#allocation1] ss:$2 sm:$0xff] %v732_v34 }
 0x32d   :  { %2829 = vst [vmem:[#allocation1 + $0x1] ss:$2 sm:$0xff] %v751_v49  ;;  %v808_v29 = vpop.f32.mrf.mxu0 }
 0x335   :  { %v825_v10 = vpop.f32.mrf.mxu1 }
 0x336   :  { %2837 = vst [vmem:[#allocation1 + $0x21] ss:$2 sm:$0xff] %v825_v10 }
 0x33d   :  { %v827_v7 = vpop.f32.mrf.mxu1 }
 0x348   :  { %v1061_v16 = vpop.f32.mrf.mxu2 }
 0x34a   :  { %v1001_v53 = vpop.f32.mrf.mxu0 }
 0x34b   :  { %v1002_v56 = vadd.f32 %v1001_v53, %v975_v42 }
 0x34d   :  { %v1216_v11 = vsel %vm611_vm3, %v1002_v56, -inf }
 0x34e   :  { %1217 = vmax.xlane.f32.xlu0 %v1216_v11 }
 0x350   :  { %v1063_v34 = vpop.f32.mrf.mxu2 }
 0x352   :  { %v1003_v49 = vpop.f32.mrf.mxu0 }
 0x358   :  { %v1181_v13 = vpop.f32.mrf.mxu2 }
 0x359   :  { %v4233_v26 = vadd.f32 %v1181_v13, %v975_v42 }
 0x35b   :  { %v1032_v43 = vpop.f32.mrf.mxu1 }
 0x35c   :  { %v1033_v44 = vadd.f32 %v1032_v43, %v975_v42  ;;  %v862_v27 = vpop.f32.mrf.mxu3  ;;  %v1062_v43 = vadd.f32 %v1061_v16, %v975_v42 }
 0x35d   :  { %2841 = vst [vmem:[#allocation1 + $0x31] ss:$2 sm:$0xff] %v862_v27 }
 0x35e   :  { %v1219_v31 = vsel %vm611_vm3, %v1033_v44, -inf }
 0x35f   :  { %1220 = vmax.xlane.f32.xlu2 %v1219_v31 }
 0x360   :  { %v1183_v29 = vpop.f32.mrf.mxu2 }
 0x363   :  { %v1034_v10 = vpop.f32.mrf.mxu1 }
 0x364   :  { %v864_v7 = vpop.f32.mrf.mxu3 }
 0x365   :  { %v1222_v7 = vsel %vm611_vm3, %v1062_v43, -inf }
 0x36b   :  { %v1121_v60 = vpop.f32.mrf.mxu0  ;;  %v1152_v53 = vpop.f32.mrf.mxu1 }
 0x36c   :  { %v4236_v50 = vadd.f32 %v1121_v60, %v975_v42  ;;  %v1153_v11 = vadd.f32 %v1152_v53, %v975_v42  ;;  %v1092_v34 = vpop.f32.mrf.mxu3 }
 0x36d   :  { %v4241_v27 = vadd.f32 %v1092_v34, %v975_v42 }
 0x36e   :  { %v1228_v13 = vsel %vm611_vm3, %v4236_v50, -inf  ;;  %v1231_v49 = vsel %vm611_vm3, %v1153_v11, -inf }
 0x36f   :  { %1229 = vmax.xlane.f32.xlu1 %v1228_v13  ;;  %1232 = vmax.xlane.f32.xlu0 %v1231_v49  ;;  %v1225_v60 = vsel %vm611_vm3, %v4241_v27, -inf }
 0x373   :  { %v1123_v31 = vpop.f32.mrf.mxu0  ;;  %v1154_v29 = vpop.f32.mrf.mxu1 }
 0x374   :  { %v1094_v10 = vpop.f32.mrf.mxu3 }
 0x377   :  { %1398 = vrot.lane.b32.xlu2 %v3884_v45, %s3723_s2  ;;  %1223 = vmax.xlane.f32.xlu1 %v1222_v7  ;;  %v1234_v45 = vsel %vm611_vm3, %v4233_v26, -inf }
 0x378   :  { %1226 = vmax.xlane.f32.xlu0 %v1225_v60 }
 0x37c   :  { %v1212_v53 = vpop.f32.mrf.mxu3 }
 0x37d   :  { %v4258_v34 = vadd.f32 %v1212_v53, %v975_v42 }
 0x37f   :  { %1471 = vrot.lane.b32.xlu2 %v3918_v37, %s3723_s2  ;;  %v1237_v13 = vsel %vm611_vm3, %v4258_v34, -inf }
 0x384   :  { %v1214_v16 = vpop.f32.mrf.mxu3 }
 0x387   :  { %1324 = vrot.lane.b32.xlu2 %v3866_v22, %s3723_s2 }
 0x38c   :  { %1373 = vrot.lane.b32.xlu0 %v3879_v38, %s3723_s2 }
 0x390   :  { %1496 = vrot.lane.b32.xlu1 %v3928_v1, %s3723_s2 }
 0x3b0   :  { %1235 = vmax.xlane.f32.xlu2 %v1234_v45 }
 0x3ba   :  { %1238 = vmax.xlane.f32.xlu1 %v1237_v13 }
 0x3c1   :  { %v1218_v37 = vpop.xlane.xlu0 %1217 }
 0x3c2   :  { %v1240_v49 = vsub.f32 %v1002_v56, %v1218_v37 }
 0x3c4   :  { %v1248_v31 = vmul.f32 1.442695, %v1240_v49 }
 0x3c6   :  { %3489 = vpow2.f32 %v1248_v31 }
 0x3c8   :  { %1349 = vrot.lane.b32.xlu2 %v3871_v28, %s3723_s2 }
 0x3cc   :  { %v4264_v22 = vpop.eup %3489 }
 0x3cd   :  { %v1264_v38 = vsel %vm611_vm3, %v4264_v22, 0.0 }
 0x3ce   :  { %1265 = vadd.xlane.f32.xlu0 %v1264_v38 }
 0x3d2   :  { %v1221_v1 = vpop.xlane.xlu2 %1220 }
 0x3d3   :  { %v1241_v42 = vsub.f32 %v1033_v44, %v1221_v1 }
 0x3d5   :  { %v1250_v29 = vmul.f32 1.442695, %v1241_v42 }
 0x3d7   :  { %3491 = vpow2.f32 %v1250_v29 }
 0x3da   :  { %v1399_v10 = vpop.permute.xlu2 %1398 }
 0x3db   :  { %v1404_v7 = vsel %vm367_vm0, %v1399_v10, 0 }
 0x3dc   :  { %1413 = vmatpush.bf16.msrb.mxu3 %v1404_v7 }
 0x3dd   :  { %v4269_v56 = vpop.eup %3491 }
 0x3de   :  { %v1267_v60 = vsel %vm611_vm3, %v4269_v56, 0.0 }
 0x3df   :  { %1268 = vadd.xlane.f32.xlu1 %v1267_v60 }
 0x3e2   :  { %v1472_v28 = vpop.permute.xlu2 %1471  ;;  %1695 = vrot.lane.b32.xlu0 %v3971_v2, %s3720_s17  ;;  %v1233_v53 = vpop.xlane.xlu0 %1232 }
 0x3e3   :  { %v1245_v16 = vsub.f32 %v1153_v11, %v1233_v53  ;;  %v1230_v45 = vpop.xlane.xlu1 %1229  ;;  %v1477_v60 = vsel %vm367_vm0, %v1472_v28, 0 }
 0x3e4   :  { %v1244_v11 = vsub.f32 %v4236_v50, %v1230_v45 }
 0x3e5   :  { %v1258_v44 = vmul.f32 1.442695, %v1245_v16 }
 0x3e6   :  { %v1256_v42 = vmul.f32 1.442695, %v1244_v11 }
 0x3e7   :  { %3493 = vpow2.f32 %v1258_v44 }
 0x3ea   :  { %v1325_v13 = vpop.permute.xlu2 %1324  ;;  %1726 = vrot.lane.b32.xlu0 %v3977_v14, %s3720_s17 }
 0x3eb   :  { %v1330_v37 = vsel %vm367_vm0, %v1325_v13, 0  ;;  %v1224_v49 = vpop.xlane.xlu1 %1223  ;;  %v1227_v14 = vpop.xlane.xlu0 %1226 }
 0x3ec   :  { %v1242_v31 = vsub.f32 %v1062_v43, %v1224_v49  ;;  %1339 = vmatpush.bf16.msra.mxu0 %v1330_v37 }
 0x3ed   :  { %v4278_v38 = vpop.eup %3493 }
 0x3ee   :  { %v1252_v1 = vmul.f32 1.442695, %v1242_v31  ;;  %v1279_v2 = vsel %vm611_vm3, %v4278_v38, 0.0 }
 0x3ef   :  { %1280 = vadd.xlane.f32.xlu1 %v1279_v2 }
 0x3f0   :  { %3495 = vpow2.f32 %v1252_v1 }
 0x3f1   :  { %3497 = vpow2.f32 %v1256_v42 }
 0x3f2   :  { %1422 = vrot.lane.b32.xlu0 %v3892_v57, %s3723_s2 }
 0x3f6   :  { %v4285_v29 = vpop.eup %3495 }
 0x3f7   :  { %v1270_v43 = vsel %vm611_vm3, %v4285_v29, 0.0  ;;  %v4291_v10 = vpop.eup %3497 }
 0x3f8   :  { %1271 = vadd.xlane.f32.xlu2 %v1270_v43  ;;  %v1276_v57 = vsel %vm611_vm3, %v4291_v10, 0.0 }
 0x3fa   :  { %1720 = vrot.lane.b32.xlu0 %v3974_v5, %s3720_s17  ;;  %v1243_v5 = vsub.f32 %v4241_v27, %v1227_v14 }
 0x3fe   :  { %v1374_v50 = vpop.permute.xlu0 %1373 }
 0x3ff   :  { %v1379_v7 = vsel %vm367_vm0, %v1374_v50, 0 }
 0x400   :  { %1388 = vmatpush.bf16.msra.mxu2 %v1379_v7  ;;  %1277 = vadd.xlane.f32.xlu2 %v1276_v57 }
 0x402   :  { %1815 = vrot.lane.b32.xlu0 %v4009_v51, %s3720_s17  ;;  %v1497_v53 = vpop.permute.xlu1 %1496  ;;  %v1254_v51 = vmul.f32 1.442695, %v1243_v5 }
 0x403   :  { %v1502_v16 = vsel %vm367_vm0, %v1497_v53, 0 }
 0x404   :  { %1486 = vmatpush.bf16.msrb.mxu2 %v1477_v60  ;;  %1511 = vmatpush.bf16.msra.mxu3 %v1502_v16  ;;  %3499 = vpow2.f32 %v1254_v51 }
 0x408   :  { %1690 = vrot.lane.b32.xlu1 %v3968_v63, %s3720_s17 }
 0x40a   :  { %1846 = vrot.lane.b32.xlu0 %v4022_v25, %s3720_s17  ;;  %v4321_v27 = vpop.eup %3499 }
 0x412   :  { %1810 = vrot.lane.b32.xlu0 %v4003_v21, %s3720_s17 }
 0x418   :  { %1447 = vrot.lane.b32.xlu2 %v3906_v18, %s3723_s2 }
 0x41a   :  { %1660 = vrot.lane.b32.xlu0 %v3956_v40, %s3720_s17 }
 0x420   :  { %1635 = vrot.lane.b32.xlu2 %v3948_v30, %s3720_s17 }
 0x422   :  { %1750 = vrot.lane.b32.xlu0 %v3980_v24, %s3720_s17 }
 0x423   :  { %v1236_v63 = vpop.xlane.xlu2 %1235 }
 0x424   :  { %v1246_v25 = vsub.f32 %v4233_v26, %v1236_v63 }
 0x426   :  { %v1260_v40 = vmul.f32 1.442695, %v1246_v25 }
 0x428   :  { %1840 = vrot.lane.b32.xlu2 %v4018_v61, %s3720_s17  ;;  %3501 = vpow2.f32 %v1260_v40  ;;  %v1273_v61 = vsel %vm611_vm3, %v4321_v27, 0.0 }
 0x42a   :  { %2024 = vrot.lane.b32.xlu0 %v4045_v9, %s3720_s17 }
 0x42b   :  { %v1350_v18 = vpop.permute.xlu2 %1349 }
 0x42c   :  { %v1355_v21 = vsel %vm367_vm0, %v1350_v18, 0 }
 0x42d   :  { %1364 = vmatpush.bf16.msra.mxu1 %v1355_v21  ;;  %v1239_v30 = vpop.xlane.xlu1 %1238 }
 0x42e   :  { %v1247_v24 = vsub.f32 %v4258_v34, %v1239_v30  ;;  %v4328_v9 = vpop.eup %3501 }
 0x42f   :  { %v1282_v28 = vsel %vm611_vm3, %v4328_v9, 0.0 }
 0x430   :  { %1755 = vrot.lane.b32.xlu2 %v3984_v41, %s3720_s17  ;;  %v1262_v26 = vmul.f32 1.442695, %v1247_v24 }
 0x432   :  { %1274 = vadd.xlane.f32.xlu1 %v1273_v61  ;;  %3503 = vpow2.f32 %v1262_v26 }
 0x438   :  { %1780 = vrot.lane.b32.xlu2 %v3991_v54, %s3720_s17  ;;  %v4334_v45 = vpop.eup %3503 }
 0x439   :  { %v1285_v34 = vsel %vm611_vm3, %v4334_v45, 0.0 }
 0x43a   :  { %1283 = vadd.xlane.f32.xlu1 %v1282_v28 }
 0x440   :  { %2049 = vrot.lane.b32.xlu2 %v4054_v8, %s3720_s17 }
 0x441   :  { %v1266_v41 = vpop.xlane.xlu0 %1265 }
 0x442   :  { %3505 = vrcp.f32 %v1266_v41  ;;  %1286 = vadd.xlane.f32.xlu1 %v1285_v34 }
 0x448   :  { %v3506_v44 = vpop.eup %3505  ;;  %1975 = vrot.lane.b32.xlu2 %v4030_v48, %s3720_s17 }
 0x449   :  { %v1296_v13 = vmul.f32 %v3506_v44, %v4264_v22 }
 0x44b   :  { %v1304_v54 = vpack.c.bf16 %v1296_v13, %v1296_v13 }
 0x44d   :  { %3265 = vst.msk [vmem:[%s4751_s6 + $0x2] sm:$0x3] %vm708_vm4, %v1304_v54  ;;  %3273 = vmatmul.msk.bf16.vlgmr.msra.gmra.mxu0 %vm717_vm5, %v1304_v54 }
 0x450   :  { %2122 = vrot.lane.b32.xlu2 %v4072_v52, %s3720_s17 }
 0x452   :  { %v1269_v8 = vpop.xlane.xlu1 %1268 }
 0x453   :  { %3507 = vrcp.f32 %v1269_v8 }
 0x454   :  { %v1696_v37 = vpop.permute.xlu0 %1695 }
 0x455   :  { %v1701_v50 = vsel %vm466_vm1, %v1696_v37, 0 }
 0x459   :  { %v3508_v49 = vpop.eup %3507 }
 0x45a   :  { %v1297_v22 = vmul.f32 %v3508_v49, %v4269_v56 }
 0x45b   :  { %1666 = vrot.lane.b32.xlu1 %v3965_v55, %s3720_s17 }
 0x45c   :  { %v1305_v48 = vpack.c.bf16 %v1297_v22, %v1297_v22  ;;  %v1727_v31 = vpop.permute.xlu0 %1726 }
 0x45d   :  { %v1732_v28 = vsel %vm466_vm1, %v1727_v31, 0 }
 0x45e   :  { %3266 = vst.msk [vmem:[%s4751_s6 + $0xa] sm:$0x3] %vm708_vm4, %v1305_v48  ;;  %3274 = vmatmul.msk.bf16.vlgmr.msra.gmra.mxu1 %vm717_vm5, %v1305_v48 }
 0x462   :  { %v1281_v1 = vpop.xlane.xlu1 %1280 }
 0x463   :  { %3509 = vrcp.f32 %v1281_v1  ;;  %1630 = vrot.lane.b32.xlu1 %v3943_v20, %s3720_s17 }
 0x464   :  { %v1423_v52 = vpop.permute.xlu0 %1422 }
 0x465   :  { %v1428_v56 = vsel %vm367_vm0, %v1423_v52, 0 }
 0x466   :  { %1437 = vmatpush.bf16.msrb.mxu0 %v1428_v56 }
 0x469   :  { %v3510_v2 = vpop.eup %3509 }
 0x46a   :  { %v1301_v55 = vmul.f32 %v3510_v2, %v4278_v38 }
 0x46b   :  { %1786 = vrot.lane.b32.xlu1 %v3995_v4, %s3720_s17  ;;  %v1272_v42 = vpop.xlane.xlu2 %1271 }
 0x46c   :  { %v1309_v11 = vpack.c.bf16 %v1301_v55, %v1301_v55  ;;  %3511 = vrcp.f32 %v1272_v42  ;;  %v1721_v16 = vpop.permute.xlu0 %1720 }
 0x46e   :  { %3270 = vst.msk [vmem:[%s4751_s6 + $0x2a] sm:$0x3] %vm708_vm4, %v1309_v11 }
 0x472   :  { %v3512_v14 = vpop.eup %3511 }
 0x473   :  { %2000 = vrot.lane.b32.xlu1 %v4039_v0, %s3720_s17  ;;  %v1298_v20 = vmul.f32 %v3512_v14, %v4285_v29  ;;  %v1278_v43 = vpop.xlane.xlu2 %1277 }
 0x474   :  { %3513 = vrcp.f32 %v1278_v43  ;;  %v1816_v5 = vpop.permute.xlu0 %1815 }
 0x475   :  { %v1306_v38 = vpack.c.bf16 %v1298_v20, %v1298_v20  ;;  %v1821_v8 = vsel %vm466_vm1, %v1816_v5, 0 }
 0x477   :  { %3267 = vst.msk [vmem:[%s4751_s6 + $0x12] sm:$0x3] %vm708_vm4, %v1306_v38  ;;  %3275 = vmatmul.msk.bf16.vlgmr.msra.gmra.mxu2 %vm717_vm5, %v1306_v38 }
 0x478   :  { %1710 = vmatpush.bf16.xpose.msra.mxu2 %v1701_v50 }
 0x47a   :  { %v3514_v4 = vpop.eup %3513  ;;  %v1691_v25 = vpop.permute.xlu1 %1690 }
 0x47b   :  { %v1300_v7 = vmul.f32 %v3514_v4, %v4291_v10  ;;  %v1448_v60 = vpop.permute.xlu2 %1447 }
 0x47c   :  { %v1453_v0 = vsel %vm367_vm0, %v1448_v60, 0  ;;  %v1847_v18 = vpop.permute.xlu0 %1846 }
 0x47d   :  { %v1308_v29 = vpack.c.bf16 %v1300_v7, %v1300_v7  ;;  %1462 = vmatpush.bf16.msrb.mxu1 %v1453_v0 }
 0x47f   :  { %3269 = vst.msk [vmem:[%s4751_s6 + $0x22] sm:$0x3] %vm708_vm4, %v1308_v29  ;;  %3277 = vmatmul.msk.bf16.vlgmr.msrb.gmra.mxu0 %vm717_vm5, %v1308_v29 }
 0x480   :  { %3278 = vmatmul.msk.bf16.vlgmr.msrb.gmra.mxu1 %vm717_vm5, %v1309_v11 }
 0x483   :  { %v1636_v57 = vpop.permute.xlu2 %1635 }
 0x484   :  { %v1641_v53 = vsel %vm466_vm1, %v1636_v57, 0  ;;  %v1811_v21 = vpop.permute.xlu0 %1810 }
 0x485   :  { %1650 = vmatpush.bf16.xpose.msra.mxu0 %v1641_v53 }
 0x48b   :  { %v4386_v10 = vpop.permute.xlu2 %1840 }
 0x48c   :  { %v1661_v41 = vpop.permute.xlu0 %1660 }
 0x493   :  { %v1756_v63 = vpop.permute.xlu2 %1755 }
 0x494   :  { %v1761_v51 = vsel %vm466_vm1, %v1756_v63, 0  ;;  %v1751_v49 = vpop.permute.xlu0 %1750  ;;  %v4430_v63 = vld.sshfl [vmem:[#allocation1 + $0x20] sm:$0xff pattern:$0x75316420] }
 0x495   :  { %1770 = vmatpush.bf16.xpose.msrb.mxu0 %v1761_v51 }
 0x49b   :  { %v1781_v54 = vpop.permute.xlu2 %1780 }
 0x49c   :  { %v2025_v1 = vpop.permute.xlu0 %2024 }
 0x49d   :  { %v2030_v52 = vsel %vm367_vm0, %v2025_v1, 0 }
 0x4a3   :  { %v2050_v31 = vpop.permute.xlu2 %2049 }
 0x4a4   :  { %v2055_v42 = vsel %vm367_vm0, %v2050_v31, 0 }
 0x4a5   :  { %v1275_v40 = vpop.xlane.xlu1 %1274 }
 0x4a6   :  { %3515 = vrcp.f32 %v1275_v40 }
 0x4ab   :  { %v1976_v2 = vpop.permute.xlu2 %1975 }
 0x4ac   :  { %v3516_v30 = vpop.eup %3515  ;;  %v1981_v43 = vsel %vm367_vm0, %v1976_v2, 0 }
 0x4ad   :  { %v1299_v24 = vmul.f32 %v3516_v30, %v4321_v27  ;;  %v1284_v61 = vpop.xlane.xlu1 %1283 }
 0x4ae   :  { %3517 = vrcp.f32 %v1284_v61 }
 0x4af   :  { %v1307_v26 = vpack.c.bf16 %v1299_v24, %v1299_v24  ;;  %v4432_v24 = vld.sshfl [vmem:[#allocation1 + $0x30] sm:$0xff pattern:$0x75316420] }
 0x4b1   :  { %3268 = vst.msk [vmem:[%s4751_s6 + $0x1a] sm:$0x3] %vm708_vm4, %v1307_v26  ;;  %3276 = vmatmul.msk.bf16.vlgmr.msrb.gmra.mxu3 %vm717_vm5, %v1307_v26 }
 0x4b2   :  { %1741 = vmatpush.bf16.xpose.msrb.mxu3 %v1732_v28 }
 0x4b3   :  { %v2123_v38 = vpop.permute.xlu2 %2122 }
 0x4b4   :  { %v3518_v34 = vpop.eup %3517  ;;  %v2128_v50 = vsel %vm367_vm0, %v2123_v38, 0 }
 0x4b5   :  { %v1302_v44 = vmul.f32 %v3518_v34, %v4328_v9  ;;  %v1287_v13 = vpop.xlane.xlu1 %1286  ;;  %v1852_v9 = vsel %vm466_vm1, %v1847_v18, 0  ;;  %v1626_v34 = vld [vmem:[#allocation10 + $0x8] sm:$0xf] }
 0x4b6   :  { %3519 = vrcp.f32 %v1287_v13 }
 0x4b7   :  { %v1310_v27 = vpack.c.bf16 %v1302_v44, %v1302_v44 }
 0x4b9   :  { %3271 = vst.msk [vmem:[%s4751_s6 + $0x32] sm:$0x3] %vm708_vm4, %v1310_v27  ;;  %3279 = vmatmul.msk.bf16.vlgmr.msrb.gmra.mxu2 %vm717_vm5, %v1310_v27 }
 0x4ba   :  { %1830 = vmatpush.bf16.xpose.msrb.mxu2 %v1821_v8 }
 0x4bc   :  { %v3520_v37 = vpop.eup %3519 }
 0x4bd   :  { %v1303_v22 = vmul.f32 %v3520_v37, %v4334_v45  ;;  %v4412_v45 = vld.sshfl [vmem:[#allocation1] sm:$0xff pattern:$0x75316420] }
 0x4bf   :  { %v1311_v48 = vpack.c.bf16 %v1303_v22, %v1303_v22 }
 0x4c1   :  { %3272 = vst.msk [vmem:[%s4751_s6 + $0x3a] sm:$0x3] %vm708_vm4, %v1311_v48  ;;  %3280 = vmatmul.msk.bf16.vlgmr.msra.gmra.mxu3 %vm717_vm5, %v1311_v48 }
 0x4c2   :  { %1861 = vmatpush.bf16.xpose.msra.mxu3 %v1852_v9 }
 0x4c9   :  { %3283 = vmatmul.msk.bf16.vlgmr.msra.gmra.mxu2 %vm466_vm1, %v1691_v25 }
 0x4ca   :  { %2039 = vmatpush.bf16.msra.mxu2 %v2030_v52  ;;  %v1341_v56 = vpop.f32.mrf.mxu0 }
 0x4cb   :  { %2858 = vst [vmem:[#allocation1] ss:$2 sm:$0xff] %v1341_v56 }
 0x4cd   :  { %v1667_v55 = vpop.permute.xlu1 %1666 }
 0x4ce   :  { %v1672_v11 = vsel %vm466_vm1, %v1667_v55, 0 }
 0x4cf   :  { %1681 = vmatpush.bf16.xpose.msra.mxu1 %v1672_v11 }
 0x4d1   :  { %3284 = vmatmul.msk.bf16.vlgmr.msrb.gmra.mxu3 %vm466_vm1, %v1721_v16  ;;  %v4428_v16 = vld.sshfl [vmem:[#allocation1 + $0x10] sm:$0xff pattern:$0x75316420] }
 0x4d2   :  { %2064 = vmatpush.bf16.msrb.mxu3 %v2055_v42  ;;  %v1343_v14 = vpop.f32.mrf.mxu0 }
 0x4d5   :  { %v1631_v20 = vpop.permute.xlu1 %1630 }
 0x4d6   :  { %3281 = vmatmul.msk.bf16.vlgmr.msra.gmra.mxu0 %vm466_vm1, %v1631_v20  ;;  %3282 = vmatmul.msk.bf16.vlgmr.msra.gmra.mxu1 %vm466_vm1, %v1661_v41 }
 0x4d7   :  { %1990 = vmatpush.bf16.msra.mxu0 %v1981_v43 }
 0x4d9   :  { %3287 = vmatmul.msk.bf16.vlgmr.msrb.gmra.mxu2 %vm466_vm1, %v1811_v21 }
 0x4da   :  { %2137 = vmatpush.bf16.msrb.mxu2 %v2128_v50 }
 0x4db   :  { %v1366_v4 = vpop.f32.mrf.mxu1 }
 0x4dc   :  { %2860 = vst [vmem:[#allocation1 + $0x1] ss:$2 sm:$0xff] %v1366_v4 }
 0x4dd   :  { %v1787_v7 = vpop.permute.xlu1 %1786 }
 0x4de   :  { %v1792_v60 = vsel %vm466_vm1, %v1787_v7, 0 }
 0x4df   :  { %1801 = vmatpush.bf16.xpose.msrb.mxu1 %v1792_v60 }
 0x4e1   :  { %3288 = vmatmul.msk.bf16.vlgmr.msra.gmra.mxu3 %vm466_vm1, %v4386_v10 }
 0x4e3   :  { %v1368_v0 = vpop.f32.mrf.mxu1 }
 0x4e5   :  { %v2001_v29 = vpop.permute.xlu1 %2000 }
 0x4e6   :  { %v2006_v57 = vsel %vm367_vm0, %v2001_v29, 0  ;;  %3285 = vmatmul.msk.bf16.vlgmr.msrb.gmra.mxu0 %vm466_vm1, %v1751_v49  ;;  %3286 = vmatmul.msk.bf16.vlgmr.msrb.gmra.mxu1 %vm466_vm1, %v1781_v54 }
 0x4e7   :  { %2015 = vmatpush.bf16.msra.mxu1 %v2006_v57 }
 0x4fa   :  { %v1390_v53 = vpop.f32.mrf.mxu2 }
 0x4fb   :  { %2862 = vst [vmem:[#allocation1 + $0x10] ss:$2 sm:$0xff] %v1390_v53 }
 0x4fc   :  { %v1439_v5 = vpop.f32.mrf.mxu0 }
 0x4fd   :  { %2866 = vst [vmem:[#allocation1 + $0x20] ss:$2 sm:$0xff] %v1439_v5  ;;  %v1464_v51 = vpop.f32.mrf.mxu1 }
 0x4fe   :  { %2868 = vst [vmem:[#allocation1 + $0x21] ss:$2 sm:$0xff] %v1464_v51 }
 0x502   :  { %v1392_v10 = vpop.f32.mrf.mxu2 }
 0x504   :  { %v1441_v25 = vpop.f32.mrf.mxu0 }
 0x505   :  { %v1466_v18 = vpop.f32.mrf.mxu1 }
 0x534   :  { %v1415_v40 = vpop.f32.mrf.mxu3 }
 0x535   :  { %2864 = vst [vmem:[#allocation1 + $0x11] ss:$2 sm:$0xff] %v1415_v40 }
 0x53c   :  { %v1417_v21 = vpop.f32.mrf.mxu3  ;;  %v1488_v30 = vpop.f32.mrf.mxu2 }
 0x53d   :  { %2870 = vst [vmem:[#allocation1 + $0x30] ss:$2 sm:$0xff] %v1488_v30 }
 0x544   :  { %v1490_v61 = vpop.f32.mrf.mxu2  ;;  %v1513_v26 = vpop.f32.mrf.mxu3 }
 0x545   :  { %2872 = vst [vmem:[#allocation1 + $0x31] ss:$2 sm:$0xff] %v1513_v26 }
 0x54c   :  { %v1515_v28 = vpop.f32.mrf.mxu3  ;;  %v1712_v41 = vpop.f32.mrf.mxu2 }
 0x54d   :  { %v1713_v50 = vadd.f32 %v1712_v41, %v1626_v34 }
 0x54f   :  { %v1873_v29 = vsel %vm611_vm3, %v1713_v50, -inf }
 0x553   :  { %v1652_v44 = vpop.f32.mrf.mxu0  ;;  %v1683_v13 = vpop.f32.mrf.mxu1 }
 0x554   :  { %v1653_v27 = vadd.f32 %v1652_v44, %v1626_v34  ;;  %v1684_v54 = vadd.f32 %v1683_v13, %v1626_v34  ;;  %v1714_v8 = vpop.f32.mrf.mxu2  ;;  %v1743_v37 = vpop.f32.mrf.mxu3 }
 0x555   :  { %v1744_v4 = vadd.f32 %v1743_v37, %v1626_v34 }
 0x556   :  { %v1870_v49 = vsel %vm611_vm3, %v1684_v54, -inf  ;;  %v1867_v22 = vsel %vm611_vm3, %v1653_v27, -inf }
 0x557   :  { %1871 = vmax.xlane.f32.xlu1 %v1870_v49  ;;  %1868 = vmax.xlane.f32.xlu2 %v1867_v22  ;;  %v1876_v57 = vsel %vm611_vm3, %v1744_v4, -inf }
 0x55b   :  { %v1654_v48 = vpop.f32.mrf.mxu0  ;;  %v1685_v9 = vpop.f32.mrf.mxu1 }
 0x55c   :  { %v1745_v31 = vpop.f32.mrf.mxu3  ;;  %v1832_v1 = vpop.f32.mrf.mxu2 }
 0x55d   :  { %v1833_v53 = vadd.f32 %v1832_v1, %v1626_v34 }
 0x55f   :  { %v1885_v5 = vsel %vm611_vm3, %v1833_v53, -inf }
 0x563   :  { %v1772_v52 = vpop.f32.mrf.mxu0  ;;  %v1803_v56 = vpop.f32.mrf.mxu1 }
 0x564   :  { %v1773_v2 = vadd.f32 %v1772_v52, %v1626_v34  ;;  %v1804_v55 = vadd.f32 %v1803_v56, %v1626_v34  ;;  %v1834_v11 = vpop.f32.mrf.mxu2  ;;  %v1863_v42 = vpop.f32.mrf.mxu3 }
 0x565   :  { %v4436_v14 = vadd.f32 %v1863_v42, %v1626_v34 }
 0x566   :  { %v1879_v20 = vsel %vm611_vm3, %v1773_v2, -inf  ;;  %v1882_v43 = vsel %vm611_vm3, %v1804_v55, -inf }
 0x567   :  { %1880 = vmax.xlane.f32.xlu1 %v1879_v20  ;;  %1883 = vmax.xlane.f32.xlu0 %v1882_v43  ;;  %v1888_v38 = vsel %vm611_vm3, %v4436_v14, -inf }
 0x568   :  { %1889 = vmax.xlane.f32.xlu2 %v1888_v38 }
 0x56b   :  { %v1774_v7 = vpop.f32.mrf.mxu0  ;;  %v1805_v60 = vpop.f32.mrf.mxu1 }
 0x56c   :  { %v1865_v0 = vpop.f32.mrf.mxu3 }
 0x56f   :  { %1874 = vmax.xlane.f32.xlu1 %v1873_v29  ;;  %1877 = vmax.xlane.f32.xlu0 %v1876_v57 }
 0x577   :  { %1886 = vmax.xlane.f32.xlu0 %v1885_v5 }
 0x580   :  { %2147 = vrot.lane.b32.xlu2 %v4083_v36, %s3720_s17 }
 0x58b   :  { %2073 = vrot.lane.b32.xlu0 %v4059_v58, %s3720_s17 }
 0x593   :  { %2098 = vrot.lane.b32.xlu0 %v4065_v15, %s3720_s17 }
 0x59b   :  { %2346 = vrot.lane.b32.xlu0 %v4126_v46, %s3717_s9 }
 0x5a3   :  { %2341 = vrot.lane.b32.xlu0 %v4120_v39, %s3717_s9 }
 0x5ab   :  { %2286 = vrot.lane.b32.xlu0 %v4093_v19, %s3717_s9 }
 0x5b3   :  { %2317 = vrot.lane.b32.xlu0 %v4109_v3, %s3717_s9 }
 0x5bb   :  { %2497 = vrot.lane.b32.xlu0 %v4201_v62, %s3717_s9 }
 0x5ca   :  { %v1869_v36 = vpop.xlane.xlu2 %1868  ;;  %v1872_v58 = vpop.xlane.xlu1 %1871 }
 0x5cb   :  { %v1891_v51 = vsub.f32 %v1653_v27, %v1869_v36  ;;  %v1892_v15 = vsub.f32 %v1684_v54, %v1872_v58  ;;  %v4763_v58 = vld [vmem:[#allocation18_spill] sm:$0xff] }
 0x5cd   :  { %v1899_v10 = vmul.f32 1.442695, %v1891_v51  ;;  %v1901_v25 = vmul.f32 1.442695, %v1892_v15 }
 0x5cf   :  { %3521 = vpow2.f32 %v1899_v10 }
 0x5d0   :  { %3523 = vpow2.f32 %v1901_v25 }
 0x5d5   :  { %v4461_v46 = vpop.eup %3521 }
 0x5d6   :  { %v1915_v39 = vsel %vm611_vm3, %v4461_v46, 0.0  ;;  %v4465_v3 = vpop.eup %3523 }
 0x5d7   :  { %1916 = vadd.xlane.f32.xlu1 %v1915_v39  ;;  %v1918_v26 = vsel %vm611_vm3, %v4465_v3, 0.0 }
 0x5da   :  { %v1884_v19 = vpop.xlane.xlu0 %1883  ;;  %v1881_v18 = vpop.xlane.xlu1 %1880 }
 0x5db   :  { %v1896_v40 = vsub.f32 %v1804_v55, %v1884_v19  ;;  %v1895_v62 = vsub.f32 %v1773_v2, %v1881_v18  ;;  %v1890_v21 = vpop.xlane.xlu2 %1889 }
 0x5dd   :  { %v1909_v30 = vmul.f32 1.442695, %v1896_v40  ;;  %v1907_v61 = vmul.f32 1.442695, %v1895_v62 }
 0x5df   :  { %3525 = vpow2.f32 %v1909_v30  ;;  %1919 = vadd.xlane.f32.xlu1 %v1918_v26 }
 0x5e0   :  { %3527 = vpow2.f32 %v1907_v61 }
 0x5e2   :  { %v1878_v28 = vpop.xlane.xlu0 %1877  ;;  %v1875_v41 = vpop.xlane.xlu1 %1874 }
 0x5e3   :  { %v1894_v34 = vsub.f32 %v1744_v4, %v1878_v28  ;;  %v1893_v44 = vsub.f32 %v1713_v50, %v1875_v41  ;;  %v2148_v13 = vpop.permute.xlu2 %2147  ;;  %v1898_v4 = vsub.f32 %v4436_v14, %v1890_v21 }
 0x5e4   :  { %v2153_v27 = vsel %vm367_vm0, %v2148_v13, 0 }
 0x5e5   :  { %v4470_v54 = vpop.eup %3525  ;;  %v1905_v8 = vmul.f32 1.442695, %v1894_v34  ;;  %v1903_v37 = vmul.f32 1.442695, %v1893_v44  ;;  %2162 = vmatpush.bf16.msra.mxu3 %v2153_v27 }
 0x5e6   :  { %v4472_v49 = vpop.eup %3527  ;;  %v1930_v22 = vsel %vm611_vm3, %v4470_v54, 0.0 }
 0x5e7   :  { %3529 = vpow2.f32 %v1905_v8  ;;  %1931 = vadd.xlane.f32.xlu1 %v1930_v22  ;;  %v1927_v48 = vsel %vm611_vm3, %v4472_v49, 0.0 }
 0x5e8   :  { %3531 = vpow2.f32 %v1903_v37  ;;  %1928 = vadd.xlane.f32.xlu2 %v1927_v48 }
 0x5ea   :  { %v1887_v9 = vpop.xlane.xlu0 %1886 }
 0x5eb   :  { %v1897_v31 = vsub.f32 %v1833_v53, %v1887_v9 }
 0x5ed   :  { %v4478_v1 = vpop.eup %3529  ;;  %v1911_v52 = vmul.f32 1.442695, %v1897_v31 }
 0x5ee   :  { %v4480_v56 = vpop.eup %3531  ;;  %v1924_v2 = vsel %vm611_vm3, %v4478_v1, 0.0 }
 0x5ef   :  { %3533 = vpow2.f32 %v1911_v52  ;;  %1925 = vadd.xlane.f32.xlu1 %v1924_v2  ;;  %v1921_v55 = vsel %vm611_vm3, %v4480_v56, 0.0 }
 0x5f0   :  { %1922 = vadd.xlane.f32.xlu2 %v1921_v55 }
 0x5f5   :  { %v4486_v11 = vpop.eup %3533 }
 0x5f6   :  { %v1933_v42 = vsel %vm611_vm3, %v4486_v11, 0.0 }
 0x5f7   :  { %1934 = vadd.xlane.f32.xlu0 %v1933_v42 }
 0x5fd   :  { %v2074_v20 = vpop.permute.xlu0 %2073 }
 0x5fe   :  { %v2079_v43 = vsel %vm367_vm0, %v2074_v20, 0 }
 0x5ff   :  { %2088 = vmatpush.bf16.msrb.mxu0 %v2079_v43 }
 0x605   :  { %v2099_v38 = vpop.permute.xlu0 %2098 }
 0x606   :  { %v2104_v50 = vsel %vm367_vm0, %v2099_v38, 0 }
 0x607   :  { %2113 = vmatpush.bf16.msrb.mxu1 %v2104_v50 }
 0x608   :  { %2377 = vrot.lane.b32.xlu2 %v4143_v23, %s3717_s9  ;;  %2371 = vrot.lane.b32.xlu1 %v4140_v32, %s3717_s9  ;;  %v1913_v23 = vmul.f32 1.442695, %v1898_v4 }
 0x60a   :  { %3535 = vpow2.f32 %v1913_v23 }
 0x60b   :  { %2461 = vrot.lane.b32.xlu0 %v4180_v6, %s3717_s9 }
 0x610   :  { %2466 = vrot.lane.b32.xlu2 %v4184_v12, %s3717_s9  ;;  %v4509_v32 = vpop.eup %3535 }
 0x611   :  { %v1936_v6 = vsel %vm611_vm3, %v4509_v32, 0.0 }
 0x613   :  { %2437 = vrot.lane.b32.xlu0 %v4177_v59, %s3717_s9  ;;  %v2347_v59 = vpop.permute.xlu0 %2346 }
 0x614   :  { %v2352_v27 = vsel %vm466_vm1, %v2347_v59, 0 }
 0x618   :  { %2281 = vrot.lane.b32.xlu2 %v4090_v35, %s3717_s9 }
 0x61b   :  { %v4513_v12 = vpop.permute.xlu0 %2341 }
 0x620   :  { %2491 = vrot.lane.b32.xlu2 %v4188_v33, %s3717_s9 }
 0x623   :  { %v2287_v33 = vpop.permute.xlu0 %2286 }
 0x624   :  { %v2292_v29 = vsel %vm466_vm1, %v2287_v33, 0 }
 0x628   :  { %2401 = vrot.lane.b32.xlu2 %v4153_v47, %s3717_s9  ;;  %v4762_v47 = vld [vmem:[#allocation17_spill] sm:$0xff] }
 0x632   :  { %1937 = vadd.xlane.f32.xlu1 %v1936_v6  ;;  %v4586_v6 = vld.sshfl [vmem:[#allocation1] sm:$0xff pattern:$0x75316420] }
 0x64a   :  { %v1917_v35 = vpop.xlane.xlu1 %1916 }
 0x64b   :  { %3537 = vrcp.f32 %v1917_v35  ;;  %2311 = vrot.lane.b32.xlu1 %v4104_v17, %s3717_s9  ;;  %v2318_v17 = vpop.permute.xlu0 %2317 }
 0x64c   :  { %v2323_v10 = vsel %vm466_vm1, %v2318_v17, 0 }
 0x651   :  { %v3538_v14 = vpop.eup %3537 }
 0x652   :  { %v1947_v7 = vmul.f32 %v3538_v14, %v4461_v46  ;;  %v1920_v60 = vpop.xlane.xlu1 %1919  ;;  %v4588_v14 = vld.sshfl [vmem:[#allocation1 + $0x20] sm:$0xff pattern:$0x75316420] }
 0x653   :  { %3539 = vrcp.f32 %v1920_v60  ;;  %2406 = vrot.lane.b32.xlu1 %v4762_v47, %s3717_s9  ;;  %v2498_v46 = vpop.permute.xlu0 %2497  ;;  %v4590_v47 = vld.sshfl [vmem:[#allocation1 + $0x10] sm:$0xff pattern:$0x75316420] }
 0x654   :  { %v1955_v0 = vpack.c.bf16 %v1947_v7, %v1947_v7  ;;  %v2503_v42 = vsel %vm466_vm1, %v2498_v46, 0 }
 0x656   :  { %3289 = vst.msk [vmem:[%s4751_s6 + $0x4] sm:$0x3] %vm708_vm4, %v1955_v0  ;;  %3297 = vmatmul.msk.bf16.vlgmr.msra.gmra.mxu0 %vm717_vm5, %v1955_v0 }
 0x657   :  { %2301 = vmatpush.bf16.xpose.msra.mxu0 %v2292_v29 }
 0x659   :  { %v3540_v57 = vpop.eup %3539 }
 0x65a   :  { %v1948_v53 = vmul.f32 %v3540_v57, %v4465_v3  ;;  %v1932_v5 = vpop.xlane.xlu1 %1931  ;;  %v2277_v57 = vld [vmem:[#allocation10 + $0xc] sm:$0xf] }
 0x65b   :  { %v1929_v36 = vpop.xlane.xlu2 %1928  ;;  %3541 = vrcp.f32 %v1932_v5  ;;  %2431 = vrot.lane.b32.xlu1 %v4763_v58, %s3717_s9 }
 0x65c   :  { %v1956_v51 = vpack.c.bf16 %v1948_v53, %v1948_v53  ;;  %3543 = vrcp.f32 %v1929_v36 }
 0x65e   :  { %3290 = vst.msk [vmem:[%s4751_s6 + $0xc] sm:$0x3] %vm708_vm4, %v1956_v51  ;;  %3298 = vmatmul.msk.bf16.vlgmr.msra.gmra.mxu1 %vm717_vm5, %v1956_v51 }
 0x65f   :  { %2332 = vmatpush.bf16.xpose.msra.mxu1 %v2323_v10 }
 0x661   :  { %v3542_v15 = vpop.eup %3541 }
 0x662   :  { %v3544_v25 = vpop.eup %3543  ;;  %v1952_v39 = vmul.f32 %v3542_v15, %v4470_v54  ;;  %v1926_v19 = vpop.xlane.xlu1 %1925 }
 0x663   :  { %v1951_v18 = vmul.f32 %v3544_v25, %v4472_v49  ;;  %v1923_v3 = vpop.xlane.xlu2 %1922  ;;  %3545 = vrcp.f32 %v1926_v19  ;;  %v4593_v25 = vld.sshfl [vmem:[#allocation1 + $0x30] sm:$0xff pattern:$0x75316420]  ;;  %v4764_v19 = vld [vmem:[#allocation19_spill] sm:$0xff] }
 0x664   :  { %v1960_v40 = vpack.c.bf16 %v1952_v39, %v1952_v39  ;;  %3547 = vrcp.f32 %v1923_v3 }
 0x665   :  { %v1959_v62 = vpack.c.bf16 %v1951_v18, %v1951_v18 }
 0x666   :  { %3294 = vst.msk [vmem:[%s4751_s6 + $0x2c] sm:$0x3] %vm708_vm4, %v1960_v40 }
 0x667   :  { %3293 = vst.msk [vmem:[%s4751_s6 + $0x24] sm:$0x3] %vm708_vm4, %v1959_v62  ;;  %3301 = vmatmul.msk.bf16.vlgmr.msrb.gmra.mxu0 %vm717_vm5, %v1959_v62 }
 0x669   :  { %v3546_v21 = vpop.eup %3545 }
 0x66a   :  { %v3548_v30 = vpop.eup %3547  ;;  %v1950_v61 = vmul.f32 %v3546_v21, %v4478_v1  ;;  %v1935_v26 = vpop.xlane.xlu0 %1934 }
 0x66b   :  { %v1949_v28 = vmul.f32 %v3548_v30, %v4480_v56  ;;  %3549 = vrcp.f32 %v1935_v26  ;;  %v2378_v41 = vpop.permute.xlu2 %2377 }
 0x66c   :  { %v1958_v34 = vpack.c.bf16 %v1950_v61, %v1950_v61  ;;  %v2383_v13 = vsel %vm466_vm1, %v2378_v41, 0 }
 0x66d   :  { %v1957_v44 = vpack.c.bf16 %v1949_v28, %v1949_v28 }
 0x66e   :  { %3292 = vst.msk [vmem:[%s4751_s6 + $0x1c] sm:$0x3] %vm708_vm4, %v1958_v34  ;;  %3300 = vmatmul.msk.bf16.vlgmr.msrb.gmra.mxu3 %vm717_vm5, %v1958_v34  ;;  %3302 = vmatmul.msk.bf16.vlgmr.msrb.gmra.mxu1 %vm717_vm5, %v1960_v40 }
 0x66f   :  { %3291 = vst.msk [vmem:[%s4751_s6 + $0x14] sm:$0x3] %vm708_vm4, %v1957_v44  ;;  %3299 = vmatmul.msk.bf16.vlgmr.msra.gmra.mxu2 %vm717_vm5, %v1957_v44  ;;  %2392 = vmatpush.bf16.xpose.msrb.mxu3 %v2383_v13 }
 0x670   :  { %2361 = vmatpush.bf16.xpose.msra.mxu2 %v2352_v27 }
 0x671   :  { %v3550_v54 = vpop.eup %3549 }
 0x672   :  { %v1953_v8 = vmul.f32 %v3550_v54, %v4486_v11 }
 0x673   :  { %v2467_v37 = vpop.permute.xlu2 %2466 }
 0x674   :  { %v1961_v49 = vpack.c.bf16 %v1953_v8, %v1953_v8  ;;  %v2472_v9 = vsel %vm466_vm1, %v2467_v37, 0 }
 0x676   :  { %3295 = vst.msk [vmem:[%s4751_s6 + $0x34] sm:$0x3] %vm708_vm4, %v1961_v49 }
 0x67a   :  { %v2372_v52 = vpop.permute.xlu1 %2371 }
 0x67b   :  { %v2282_v22 = vpop.permute.xlu2 %2281 }
 0x67c   :  { %3305 = vmatmul.msk.bf16.vlgmr.msra.gmra.mxu0 %vm466_vm1, %v2282_v22 }
 0x67d   :  { %v2462_v48 = vpop.permute.xlu0 %2461 }
 0x67f   :  { %3303 = vmatmul.msk.bf16.vlgmr.msrb.gmra.mxu2 %vm717_vm5, %v1961_v49 }
 0x680   :  { %2481 = vmatpush.bf16.xpose.msrb.mxu2 %v2472_v9 }
 0x683   :  { %v2492_v43 = vpop.permute.xlu2 %2491 }
 0x685   :  { %v2438_v31 = vpop.permute.xlu0 %2437 }
 0x686   :  { %v2443_v1 = vsel %vm466_vm1, %v2438_v31, 0 }
 0x687   :  { %2452 = vmatpush.bf16.xpose.msrb.mxu1 %v2443_v1 }
 0x68b   :  { %v2402_v4 = vpop.permute.xlu2 %2401 }
 0x68f   :  { %3307 = vmatmul.msk.bf16.vlgmr.msra.gmra.mxu2 %vm466_vm1, %v4513_v12 }
 0x69f   :  { %3311 = vmatmul.msk.bf16.vlgmr.msrb.gmra.mxu2 %vm466_vm1, %v2462_v48 }
 0x6a5   :  { %v1938_v56 = vpop.xlane.xlu1 %1937 }
 0x6a6   :  { %3551 = vrcp.f32 %v1938_v56 }
 0x6ac   :  { %v3552_v2 = vpop.eup %3551 }
 0x6ad   :  { %v1954_v55 = vmul.f32 %v3552_v2, %v4509_v32 }
 0x6af   :  { %v1962_v11 = vpack.c.bf16 %v1954_v55, %v1954_v55 }
 0x6b1   :  { %3296 = vst.msk [vmem:[%s4751_s6 + $0x3c] sm:$0x3] %vm708_vm4, %v1962_v11  ;;  %3304 = vmatmul.msk.bf16.vlgmr.msra.gmra.mxu3 %vm717_vm5, %v1962_v11  ;;  %v4765_v11 = vld [vmem:[#allocation22_spill] sm:$0xff] }
 0x6b2   :  { %2512 = vmatpush.bf16.xpose.msra.mxu3 %v2503_v42  ;;  %v4766_v42 = vld [vmem:[#allocation21_spill] sm:$0xff] }
 0x6bd   :  { %v2312_v20 = vpop.permute.xlu1 %2311 }
 0x6be   :  { %3306 = vmatmul.msk.bf16.vlgmr.msra.gmra.mxu1 %vm466_vm1, %v2312_v20  ;;  %v4767_v20 = vld [vmem:[#allocation20_spill] sm:$0xff] }
 0x6c1   :  { %3308 = vmatmul.msk.bf16.vlgmr.msrb.gmra.mxu3 %vm466_vm1, %v2372_v52 }
 0x6c5   :  { %v2407_v38 = vpop.permute.xlu1 %2406 }
 0x6c6   :  { %v2412_v50 = vsel %vm466_vm1, %v2407_v38, 0 }
 0x6c7   :  { %2421 = vmatpush.bf16.xpose.msrb.mxu0 %v2412_v50 }
 0x6cd   :  { %v2432_v23 = vpop.permute.xlu1 %2431 }
 0x6ce   :  { %3309 = vmatmul.msk.bf16.vlgmr.msrb.gmra.mxu0 %vm466_vm1, %v2402_v4  ;;  %3310 = vmatmul.msk.bf16.vlgmr.msrb.gmra.mxu1 %vm466_vm1, %v2432_v23 }
 0x6d1   :  { %3312 = vmatmul.msk.bf16.vlgmr.msra.gmra.mxu3 %vm466_vm1, %v2492_v43 }
 0x6d3   :  { %v1992_v32 = vpop.f32.mrf.mxu0 }
 0x6d4   :  { %2897 = vst [vmem:[#allocation1] ss:$2 sm:$0xff] %v1992_v32 }
 0x6db   :  { %v1994_v59 = vpop.f32.mrf.mxu0  ;;  %v2017_v12 = vpop.f32.mrf.mxu1 }
 0x6dc   :  { %2899 = vst [vmem:[#allocation1 + $0x1] ss:$2 sm:$0xff] %v2017_v12 }
 0x6e3   :  { %v2019_v35 = vpop.f32.mrf.mxu1 }
 0x6e4   :  { %v2090_v33 = vpop.f32.mrf.mxu0 }
 0x6e5   :  { %2905 = vst [vmem:[#allocation1 + $0x20] ss:$2 sm:$0xff] %v2090_v33 }
 0x6eb   :  { %v2115_v7 = vpop.f32.mrf.mxu1 }
 0x6ec   :  { %v2092_v60 = vpop.f32.mrf.mxu0  ;;  %2907 = vst [vmem:[#allocation1 + $0x21] ss:$2 sm:$0xff] %v2115_v7 }
 0x6f1   :  { %v2066_v0 = vpop.f32.mrf.mxu3 }
 0x6f2   :  { %v2041_v29 = vpop.f32.mrf.mxu2  ;;  %2903 = vst [vmem:[#allocation1 + $0x11] ss:$2 sm:$0xff] %v2066_v0 }
 0x6f3   :  { %2901 = vst [vmem:[#allocation1 + $0x10] ss:$2 sm:$0xff] %v2041_v29  ;;  %v2117_v17 = vpop.f32.mrf.mxu1 }
 0x6f9   :  { %v2303_v53 = vpop.f32.mrf.mxu0  ;;  %v2068_v5 = vpop.f32.mrf.mxu3 }
 0x6fa   :  { %v2304_v36 = vadd.f32 %v2303_v53, %v2277_v57  ;;  %v2043_v58 = vpop.f32.mrf.mxu2 }
 0x6fc   :  { %v2518_v51 = vsel %vm611_vm3, %v2304_v36, -inf }
 0x6fd   :  { %2519 = vmax.xlane.f32.xlu1 %v2518_v51 }
 0x701   :  { %v2305_v10 = vpop.f32.mrf.mxu0 }
 0x702   :  { %v2139_v15 = vpop.f32.mrf.mxu2 }
 0x703   :  { %2909 = vst [vmem:[#allocation1 + $0x30] ss:$2 sm:$0xff] %v2139_v15 }
 0x70a   :  { %v2141_v46 = vpop.f32.mrf.mxu2 }
 0x712   :  { %v2363_v39 = vpop.f32.mrf.mxu2 }
 0x713   :  { %v2364_v49 = vadd.f32 %v2363_v39, %v2277_v57 }
 0x715   :  { %v2524_v56 = vsel %vm611_vm3, %v2364_v49, -inf }
 0x716   :  { %2626 = vrot.lane.b32.xlu1 %v4764_v19, %s3717_s9 }
 0x71a   :  { %v2365_v18 = vpop.f32.mrf.mxu2 }
 0x722   :  { %v2483_v3 = vpop.f32.mrf.mxu2 }
 0x723   :  { %v4610_v32 = vadd.f32 %v2483_v3, %v2277_v57 }
 0x725   :  { %v2536_v59 = vsel %vm611_vm3, %v4610_v32, -inf }
 0x72a   :  { %v2485_v40 = vpop.f32.mrf.mxu2 }
 0x734   :  { %v2164_v62 = vpop.f32.mrf.mxu3 }
 0x735   :  { %2911 = vst [vmem:[#allocation1 + $0x31] ss:$2 sm:$0xff] %v2164_v62 }
 0x73b   :  { %v2334_v21 = vpop.f32.mrf.mxu1 }
 0x73c   :  { %v2335_v30 = vadd.f32 %v2334_v21, %v2277_v57  ;;  %v2166_v61 = vpop.f32.mrf.mxu3 }
 0x73e   :  { %v2521_v26 = vsel %vm611_vm3, %v2335_v30, -inf }
 0x73f   :  { %2522 = vmax.xlane.f32.xlu2 %v2521_v26 }
 0x743   :  { %v2336_v28 = vpop.f32.mrf.mxu1 }
 0x744   :  { %v2394_v41 = vpop.f32.mrf.mxu3 }
 0x745   :  { %v2395_v22 = vadd.f32 %v2394_v41, %v2277_v57 }
 0x747   :  { %v2527_v52 = vsel %vm611_vm3, %v2395_v22, -inf }
 0x74b   :  { %v2423_v34 = vpop.f32.mrf.mxu0  ;;  %v2454_v44 = vpop.f32.mrf.mxu1 }
 0x74c   :  { %v2424_v13 = vadd.f32 %v2423_v34, %v2277_v57  ;;  %v2455_v27 = vadd.f32 %v2454_v44, %v2277_v57  ;;  %v2396_v54 = vpop.f32.mrf.mxu3 }
 0x74e   :  { %v2530_v8 = vsel %vm611_vm3, %v2424_v13, -inf  ;;  %v2533_v37 = vsel %vm611_vm3, %v2455_v27, -inf }
 0x74f   :  { %2531 = vmax.xlane.f32.xlu2 %v2530_v8  ;;  %2534 = vmax.xlane.f32.xlu0 %v2533_v37 }
 0x753   :  { %v2425_v48 = vpop.f32.mrf.mxu0  ;;  %v2456_v9 = vpop.f32.mrf.mxu1 }
 0x754   :  { %v2514_v31 = vpop.f32.mrf.mxu3  ;;  %v4769_v9 = vld [vmem:[#allocation24_spill] sm:$0xff] }
 0x755   :  { %v2515_v1 = vadd.f32 %v2514_v31, %v2277_v57  ;;  %v4770_v31 = vld [vmem:[#allocation25_spill] sm:$0xff] }
 0x757   :  { %2528 = vmax.xlane.f32.xlu2 %v2527_v52  ;;  %2525 = vmax.xlane.f32.xlu0 %v2524_v56  ;;  %v2539_v2 = vsel %vm611_vm3, %v2515_v1, -inf  ;;  %v3441_v52 = vpack.i.bf16 %v4593_v25, %v4588_v14  ;;  %v4771_v25 = vld [vmem:[#allocation23_spill] sm:$0xff] }
 0x758   :  { %2540 = vmax.xlane.f32.xlu1 %v2539_v2 }
 0x75c   :  { %v2516_v55 = vpop.f32.mrf.mxu3 }
 0x76b   :  { %2700 = vrot.lane.b32.xlu0 %v4765_v11, %s3717_s9 }
 0x76f   :  { %2675 = vrot.lane.b32.xlu2 %v4766_v42, %s3717_s9 }
 0x770   :  { %v2520_v43 = vpop.xlane.xlu1 %2519 }
 0x771   :  { %v2542_v4 = vsub.f32 %v2304_v36, %v2520_v43 }
 0x773   :  { %2651 = vrot.lane.b32.xlu0 %v4767_v20, %s3717_s9  ;;  %v2550_v23 = vmul.f32 1.442695, %v2542_v4 }
 0x775   :  { %3553 = vpow2.f32 %v2550_v23  ;;  %v2912_v23 = vld.sshfl [vmem:[#allocation1] sm:$0xff pattern:$0x75316420] }
 0x77b   :  { %v4614_v12 = vpop.eup %3553 }
 0x77c   :  { %v2566_v35 = vsel %vm611_vm3, %v4614_v12, 0.0 }
 0x788   :  { %v2627_v38 = vpop.permute.xlu1 %2626 }
 0x789   :  { %v2632_v50 = vsel %vm367_vm0, %v2627_v38, 0  ;;  %v2913_v38 = vld.sshfl [vmem:[#allocation1 + $0x10] sm:$0xff pattern:$0x75316420] }
 0x78a   :  { %2641 = vmatpush.bf16.msra.mxu0 %v2632_v50 }
 0x79d   :  { %2537 = vmax.xlane.f32.xlu0 %v2536_v59 }
 0x7a5   :  { %2567 = vadd.xlane.f32.xlu0 %v2566_v35 }
 0x7b2   :  { %v2523_v33 = vpop.xlane.xlu2 %2522 }
 0x7b3   :  { %v2543_v7 = vsub.f32 %v2335_v30, %v2523_v33  ;;  %v2914_v33 = vld.sshfl [vmem:[#allocation1 + $0x20] sm:$0xff pattern:$0x75316420] }
 0x7b5   :  { %v2552_v60 = vmul.f32 1.442695, %v2543_v7 }
 0x7b7   :  { %3555 = vpow2.f32 %v2552_v60 }
 0x7bd   :  { %v4618_v0 = vpop.eup %3555 }
 0x7be   :  { %v2569_v29 = vsel %vm611_vm3, %v4618_v0, 0.0 }
 0x7bf   :  { %2570 = vadd.xlane.f32.xlu1 %v2569_v29 }
 0x7c2   :  { %v2532_v17 = vpop.xlane.xlu2 %2531  ;;  %v2535_v57 = vpop.xlane.xlu0 %2534 }
 0x7c3   :  { %v2546_v53 = vsub.f32 %v2424_v13, %v2532_v17  ;;  %v2547_v5 = vsub.f32 %v2455_v27, %v2535_v57 }
 0x7c5   :  { %v2558_v36 = vmul.f32 1.442695, %v2546_v53  ;;  %v2560_v58 = vmul.f32 1.442695, %v2547_v5 }
 0x7c7   :  { %3557 = vpow2.f32 %v2558_v36 }
 0x7c8   :  { %3559 = vpow2.f32 %v2560_v58 }
 0x7ca   :  { %v2529_v51 = vpop.xlane.xlu2 %2528  ;;  %v2526_v10 = vpop.xlane.xlu0 %2525 }
 0x7cb   :  { %v2545_v15 = vsub.f32 %v2395_v22, %v2529_v51  ;;  %v2544_v46 = vsub.f32 %v2364_v49, %v2526_v10  ;;  %v2541_v39 = vpop.xlane.xlu1 %2540  ;;  %v4768_v49 = vld [vmem:[#allocation26_spill] sm:$0xff] }
 0x7cc   :  { %v2549_v62 = vsub.f32 %v2515_v1, %v2541_v39  ;;  %v3426_v1 = vpack.i.bf16 %v4590_v47, %v4586_v6 }
 0x7cd   :  { %v4622_v19 = vpop.eup %3557  ;;  %v2556_v18 = vmul.f32 1.442695, %v2545_v15  ;;  %v2554_v3 = vmul.f32 1.442695, %v2544_v46 }
 0x7ce   :  { %v4624_v40 = vpop.eup %3559  ;;  %v2578_v21 = vsel %vm611_vm3, %v4622_v19, 0.0  ;;  %v2564_v61 = vmul.f32 1.442695, %v2549_v62 }
 0x7cf   :  { %3561 = vpow2.f32 %v2556_v18  ;;  %v2581_v30 = vsel %vm611_vm3, %v4624_v40, 0.0  ;;  %2579 = vadd.xlane.f32.xlu0 %v2578_v21 }
 0x7d0   :  { %3563 = vpow2.f32 %v2554_v3  ;;  %2582 = vadd.xlane.f32.xlu2 %v2581_v30 }
 0x7d1   :  { %3565 = vpow2.f32 %v2564_v61 }
 0x7d2   :  { %v2676_v26 = vpop.permute.xlu2 %2675 }
 0x7d3   :  { %v2681_v28 = vsel %vm367_vm0, %v2676_v26, 0 }
 0x7d4   :  { %2690 = vmatpush.bf16.msra.mxu2 %v2681_v28 }
 0x7d5   :  { %v4631_v41 = vpop.eup %3561 }
 0x7d6   :  { %v4633_v34 = vpop.eup %3563  ;;  %v2575_v44 = vsel %vm611_vm3, %v4631_v41, 0.0 }
 0x7d7   :  { %v2572_v13 = vsel %vm611_vm3, %v4633_v34, 0.0  ;;  %v4639_v27 = vpop.eup %3565 }
 0x7d8   :  { %2576 = vadd.xlane.f32.xlu2 %v2575_v44  ;;  %2573 = vadd.xlane.f32.xlu1 %v2572_v13  ;;  %v2587_v37 = vsel %vm611_vm3, %v4639_v27, 0.0 }
 0x7dd   :  { %v2701_v54 = vpop.permute.xlu0 %2700 }
 0x7de   :  { %v2706_v8 = vsel %vm367_vm0, %v2701_v54, 0 }
 0x7df   :  { %2715 = vmatpush.bf16.msrb.mxu3 %v2706_v8 }
 0x7e0   :  { %2588 = vadd.xlane.f32.xlu1 %v2587_v37 }
 0x7e3   :  { %2798 = vrot.lane.b32.xlu0 %v4768_v49, %s3717_s9 }
 0x7e5   :  { %v2652_v22 = vpop.permute.xlu0 %2651 }
 0x7e6   :  { %v2657_v48 = vsel %vm367_vm0, %v2652_v22, 0 }
 0x7e7   :  { %2666 = vmatpush.bf16.msra.mxu1 %v2657_v48 }
 0x7eb   :  { %2749 = vrot.lane.b32.xlu0 %v4769_v9, %s3717_s9 }
 0x7f9   :  { %2773 = vrot.lane.b32.xlu1 %v4770_v31, %s3717_s9 }
 0x801   :  { %3427 = vrot.lane.b32.xlu1 %v3426_v1, %s3717_s9 }
 0x809   :  { %3442 = vrot.lane.b32.xlu1 %v3441_v52, %s3717_s9 }
 0x810   :  { %v2538_v56 = vpop.xlane.xlu0 %2537 }
 0x811   :  { %v2548_v2 = vsub.f32 %v4610_v32, %v2538_v56  ;;  %v3431_v32 = vpack.i.bf16 %v2913_v38, %v2912_v23 }
 0x813   :  { %v2562_v55 = vmul.f32 1.442695, %v2548_v2 }
 0x815   :  { %3567 = vpow2.f32 %v2562_v55 }
 0x818   :  { %v2568_v11 = vpop.xlane.xlu0 %2567 }
 0x819   :  { %3569 = vrcp.f32 %v2568_v11 }
 0x81b   :  { %v4658_v42 = vpop.eup %3567 }
 0x81c   :  { %v2584_v20 = vsel %vm611_vm3, %v4658_v42, 0.0 }
 0x81d   :  { %2585 = vadd.xlane.f32.xlu2 %v2584_v20 }
 0x81f   :  { %v3570_v6 = vpop.eup %3569 }
 0x820   :  { %v2598_v47 = vmul.f32 %v3570_v6, %v4614_v12  ;;  %v2915_v12 = vld.sshfl [vmem:[#allocation1 + $0x30] sm:$0xff pattern:$0x75316420] }
 0x821   :  { %v3446_v60 = vpack.i.bf16 %v2915_v12, %v2914_v33  ;;  %v3397_v33 = vld [vmem:[#allocation9 + $0x10] sm:$0xff] }
 0x822   :  { %v2606_v43 = vpack.c.bf16 %v2598_v47, %v2598_v47  ;;  %v3402_v47 = vld [vmem:[#allocation9 + $0x38] sm:$0xff] }
 0x824   :  { %3313 = vst.msk [vmem:[%s4751_s6 + $0x6] sm:$0x3] %vm708_vm4, %v2606_v43  ;;  %3321 = vmatmul.msk.bf16.vlgmr.msra.gmra.mxu0 %vm717_vm5, %v2606_v43  ;;  %v3401_v43 = vld [vmem:[#allocation9 + $0x30] sm:$0xff] }
 0x832   :  { %v2571_v14 = vpop.xlane.xlu1 %2570 }
 0x833   :  { %3571 = vrcp.f32 %v2571_v14  ;;  %v3400_v14 = vld [vmem:[#allocation9 + $0x28] sm:$0xff] }
 0x835   :  { %2724 = vrot.lane.b32.xlu2 %v4771_v25, %s3717_s9  ;;  %v3399_v25 = vld [vmem:[#allocation9 + $0x20] sm:$0xff] }
 0x839   :  { %v3572_v50 = vpop.eup %3571 }
 0x83a   :  { %v2599_v4 = vmul.f32 %v3572_v50, %v4618_v0 }
 0x83c   :  { %v2607_v59 = vpack.c.bf16 %v2599_v4, %v2599_v4 }
 0x83d   :  { %3432 = vrot.lane.b32.xlu2 %v3431_v32, %s3720_s17 }
 0x83e   :  { %3314 = vst.msk [vmem:[%s4751_s6 + $0xe] sm:$0x3] %vm708_vm4, %v2607_v59  ;;  %3322 = vmatmul.msk.bf16.vlgmr.msra.gmra.mxu1 %vm717_vm5, %v2607_v59 }
 0x842   :  { %v2580_v35 = vpop.xlane.xlu0 %2579 }
 0x843   :  { %v2583_v7 = vpop.xlane.xlu2 %2582  ;;  %3573 = vrcp.f32 %v2580_v35  ;;  %v3398_v35 = vld [vmem:[#allocation9 + $0x18] sm:$0xff] }
 0x844   :  { %3575 = vrcp.f32 %v2583_v7  ;;  %v3396_v7 = vld [vmem:[#allocation9 + $0x8] sm:$0xff] }
 0x845   :  { %3447 = vrot.lane.b32.xlu2 %v3446_v60, %s3720_s17  ;;  %v3395_v60 = vld [vmem:[#allocation9] sm:$0xff] }
 0x849   :  { %v3574_v0 = vpop.eup %3573 }
 0x84a   :  { %v3576_v29 = vpop.eup %3575  ;;  %v2602_v17 = vmul.f32 %v3574_v0, %v4622_v19 }
 0x84b   :  { %v2603_v57 = vmul.f32 %v3576_v29, %v4624_v40  ;;  %v2577_v53 = vpop.xlane.xlu2 %2576  ;;  %v2574_v5 = vpop.xlane.xlu1 %2573 }
 0x84c   :  { %v2610_v36 = vpack.c.bf16 %v2602_v17, %v2602_v17  ;;  %3577 = vrcp.f32 %v2577_v53 }
 0x84d   :  { %v2611_v58 = vpack.c.bf16 %v2603_v57, %v2603_v57  ;;  %3579 = vrcp.f32 %v2574_v5 }
 0x84e   :  { %3317 = vst.msk [vmem:[%s4751_s6 + $0x26] sm:$0x3] %vm708_vm4, %v2610_v36 }
 0x84f   :  { %3318 = vst.msk [vmem:[%s4751_s6 + $0x2e] sm:$0x3] %vm708_vm4, %v2611_v58 }
 0x852   :  { %v3578_v51 = vpop.eup %3577 }
 0x853   :  { %v3580_v10 = vpop.eup %3579  ;;  %v2601_v15 = vmul.f32 %v3578_v51, %v4631_v41  ;;  %v2589_v46 = vpop.xlane.xlu1 %2588 }
 0x854   :  { %v2600_v39 = vmul.f32 %v3580_v10, %v4633_v34  ;;  %3581 = vrcp.f32 %v2589_v46 }
 0x855   :  { %v2609_v19 = vpack.c.bf16 %v2601_v15, %v2601_v15  ;;  %v2799_v18 = vpop.permute.xlu0 %2798 }
 0x856   :  { %v2608_v3 = vpack.c.bf16 %v2600_v39, %v2600_v39  ;;  %v2804_v40 = vsel %vm367_vm0, %v2799_v18, 0 }
 0x857   :  { %3316 = vst.msk [vmem:[%s4751_s6 + $0x1e] sm:$0x3] %vm708_vm4, %v2609_v19  ;;  %3324 = vmatmul.msk.bf16.vlgmr.msrb.gmra.mxu3 %vm717_vm5, %v2609_v19 }
 0x858   :  { %3315 = vst.msk [vmem:[%s4751_s6 + $0x16] sm:$0x3] %vm708_vm4, %v2608_v3  ;;  %3323 = vmatmul.msk.bf16.vlgmr.msra.gmra.mxu2 %vm717_vm5, %v2608_v3  ;;  %2813 = vmatpush.bf16.msra.mxu3 %v2804_v40 }
 0x85a   :  { %v3582_v62 = vpop.eup %3581 }
 0x85b   :  { %v2605_v21 = vmul.f32 %v3582_v62, %v4639_v27 }
 0x85d   :  { %v2613_v30 = vpack.c.bf16 %v2605_v21, %v2605_v21  ;;  %v2750_v61 = vpop.permute.xlu0 %2749 }
 0x85e   :  { %v2755_v26 = vsel %vm367_vm0, %v2750_v61, 0 }
 0x85f   :  { %3320 = vst.msk [vmem:[%s4751_s6 + $0x3e] sm:$0x3] %vm708_vm4, %v2613_v30  ;;  %2764 = vmatpush.bf16.msrb.mxu1 %v2755_v26 }
 0x862   :  { %3326 = vmatmul.msk.bf16.vlgmr.msrb.gmra.mxu1 %vm717_vm5, %v2611_v58 }
 0x867   :  { %3328 = vmatmul.msk.bf16.vlgmr.msra.gmra.mxu3 %vm717_vm5, %v2613_v30 }
 0x86b   :  { %v2774_v28 = vpop.permute.xlu1 %2773 }
 0x86c   :  { %v2779_v41 = vsel %vm367_vm0, %v2774_v28, 0 }
 0x86d   :  { %2788 = vmatpush.bf16.msrb.mxu2 %v2779_v41 }
 0x873   :  { %v3428_v0 = vpop.permute.xlu1 %3427 }
 0x874   :  { %v3430_v17 = vunpack.i.h.bf16 %v3428_v0  ;;  %v3429_v57 = vunpack.i.l.bf16 %v3428_v0 }
 0x876   :  { %v2968_v58 = vsel %vm466_vm1, %v4428_v16, %v3430_v17  ;;  %v2967_v51 = vsel %vm466_vm1, %v4412_v45, %v3429_v57 }
 0x87b   :  { %v3443_v62 = vpop.permute.xlu1 %3442 }
 0x87c   :  { %v3445_v16 = vunpack.i.h.bf16 %v3443_v62  ;;  %v3444_v30 = vunpack.i.l.bf16 %v3443_v62 }
 0x87e   :  { %v2970_v28 = vsel %vm466_vm1, %v4432_v24, %v3445_v16  ;;  %v2969_v41 = vsel %vm466_vm1, %v4430_v63, %v3444_v30  ;;  %v3456_v24 = vld [vmem:[%s4748_s3] ss:$0 sm:$0xff]  ;;  %s3724_s3 = smov [#allocation12]  }
 0x87f   :  { %s3124_s12 = sshll.u32 %s3724_s3, 4  ;;  %s3125_s12 = int_to_ptr.vmem [resolvable:$true] %s3124_s12 }
 0x890   :  { %v2586_v34 = vpop.xlane.xlu2 %2585 }
 0x891   :  { %3583 = vrcp.f32 %v2586_v34 }
 0x897   :  { %v3584_v44 = vpop.eup %3583 }
 0x898   :  { %v2604_v13 = vmul.f32 %v3584_v44, %v4658_v42  ;;  %v2725_v27 = vpop.permute.xlu2 %2724 }
 0x899   :  { %v2730_v54 = vsel %vm367_vm0, %v2725_v27, 0 }
 0x89a   :  { %v2612_v8 = vpack.c.bf16 %v2604_v13, %v2604_v13  ;;  %2739 = vmatpush.bf16.msrb.mxu0 %v2730_v54 }
 0x89c   :  { %3319 = vst.msk [vmem:[%s4751_s6 + $0x36] sm:$0x3] %vm708_vm4, %v2612_v8  ;;  %3327 = vmatmul.msk.bf16.vlgmr.msrb.gmra.mxu2 %vm717_vm5, %v2612_v8 }
 0x89d   :  { %3325 = vmatmul.msk.bf16.vlgmr.msrb.gmra.mxu0 %vm717_vm5, %v2610_v36 }
 0x89e   :  { %3073 = vmatpush.bf16.msra.mxu0 %v3402_v47 }
 0x8a0   :  { %v3433_v29 = vpop.permute.xlu2 %3432 }
 0x8a1   :  { %v2643_v37 = vpop.f32.mrf.mxu0  ;;  %v3435_v53 = vunpack.i.h.bf16 %v3433_v29  ;;  %v3434_v5 = vunpack.i.l.bf16 %v3433_v29 }
 0x8a2   :  { %2936 = vst [vmem:[#allocation1] ss:$2 sm:$0xff] %v2643_v37  ;;  %3074 = vmatpush.bf16.msra.mxu0 %v3401_v43 }
 0x8a3   :  { %v2972_v46 = vsel %vm2971_vm6, %v2967_v51, %v3434_v5  ;;  %v2973_v39 = vsel %vm2971_vm6, %v2968_v58, %v3435_v53 }
 0x8a6   :  { %3075 = vmatpush.bf16.msra.mxu0 %v3400_v14 }
 0x8a8   :  { %v3448_v21 = vpop.permute.xlu2 %3447 }
 0x8a9   :  { %v2645_v49 = vpop.f32.mrf.mxu0  ;;  %v3450_v61 = vunpack.i.h.bf16 %v3448_v21  ;;  %v3449_v45 = vunpack.i.l.bf16 %v3448_v21 }
 0x8aa   :  { %3076 = vmatpush.bf16.msra.mxu0 %v3399_v25 }
 0x8ab   :  { %v2974_v13 = vsel %vm2971_vm6, %v2969_v41, %v3449_v45  ;;  %v2975_v27 = vsel %vm2971_vm6, %v2970_v28, %v3450_v61 }
 0x8ae   :  { %3077 = vmatpush.bf16.msra.mxu0 %v3398_v35 }
 0x8b2   :  { %3078 = vmatpush.bf16.msra.mxu0 %v3397_v33 }
 0x8b6   :  { %3079 = vmatpush.bf16.msra.mxu0 %v3396_v7 }
 0x8ba   :  { %3080 = vmatpush.bf16.msra.mxu0 %v3395_v60 }
 0x8bb   :  { %v2668_v22 = vpop.f32.mrf.mxu1 }
 0x8bc   :  { %2938 = vst [vmem:[#allocation1 + $0x1] ss:$2 sm:$0xff] %v2668_v22 }
 0x8c3   :  { %v2670_v48 = vpop.f32.mrf.mxu1  ;;  %v2951_v2 = vld.sshfl [vmem:[#allocation1] sm:$0xff pattern:$0x75316420] }
 0x8da   :  { %v2717_v9 = vpop.f32.mrf.mxu3 }
 0x8db   :  { %v2692_v31 = vpop.f32.mrf.mxu2  ;;  %2942 = vst [vmem:[#allocation1 + $0x11] ss:$2 sm:$0xff] %v2717_v9 }
 0x8dc   :  { %2940 = vst [vmem:[#allocation1 + $0x10] ss:$2 sm:$0xff] %v2692_v31 }
 0x8df   :  { %v2766_v1 = vpop.f32.mrf.mxu1 }
 0x8e0   :  { %2946 = vst [vmem:[#allocation1 + $0x21] ss:$2 sm:$0xff] %v2766_v1 }
 0x8e2   :  { %v2719_v52 = vpop.f32.mrf.mxu3 }
 0x8e3   :  { %v2694_v56 = vpop.f32.mrf.mxu2  ;;  %v2952_v55 = vld.sshfl [vmem:[#allocation1 + $0x10] sm:$0xff pattern:$0x75316420] }
 0x8e4   :  { %v3436_v11 = vpack.i.bf16 %v2952_v55, %v2951_v2 }
 0x8e6   :  { %3437 = vrot.lane.b32.xlu0 %v3436_v11, %s3723_s2 }
 0x8e7   :  { %v2768_v42 = vpop.f32.mrf.mxu1 }
 0x8ea   :  { %v2815_v20 = vpop.f32.mrf.mxu3 }
 0x8eb   :  { %2950 = vst [vmem:[#allocation1 + $0x31] ss:$2 sm:$0xff] %v2815_v20 }
 0x8f2   :  { %v2817_v6 = vpop.f32.mrf.mxu3 }
 0x91a   :  { %v2741_v38 = vpop.f32.mrf.mxu0 }
 0x91b   :  { %2944 = vst [vmem:[#allocation1 + $0x20] ss:$2 sm:$0xff] %v2741_v38 }
 0x91f   :  { %v2790_v50 = vpop.f32.mrf.mxu2 }
 0x920   :  { %2948 = vst [vmem:[#allocation1 + $0x30] ss:$2 sm:$0xff] %v2790_v50 }
 0x922   :  { %v2743_v4 = vpop.f32.mrf.mxu0  ;;  %v2953_v32 = vld.sshfl [vmem:[#allocation1 + $0x20] sm:$0xff pattern:$0x75316420] }
 0x927   :  { %v2792_v23 = vpop.f32.mrf.mxu2  ;;  %v2954_v59 = vld.sshfl [vmem:[#allocation1 + $0x30] sm:$0xff pattern:$0x75316420] }
 0x928   :  { %v3451_v12 = vpack.i.bf16 %v2954_v59, %v2953_v32 }
 0x92a   :  { %3452 = vrot.lane.b32.xlu0 %v3451_v12, %s3723_s2 }
 0x958   :  { %v3438_v36 = vpop.permute.xlu0 %3437 }
 0x959   :  { %v3440_v10 = vunpack.i.h.bf16 %v3438_v36  ;;  %v3439_v15 = vunpack.i.l.bf16 %v3438_v36 }
 0x95b   :  { %v2977_v19 = vsel %vm2976_vm7, %v2972_v46, %v3439_v15  ;;  %v2978_v18 = vsel %vm2976_vm7, %v2973_v39, %v3440_v10 }
 0x95c   :  { %v3406_v3 = vpack.c.bf16 %v2978_v18, %v2977_v19 }
 0x95e   :  { %3407 = vst [vmem:[#allocation3] sm:$0xff] %v3406_v3  }
 0x965   :  { %v3393_v40 = vld [vmem:[#allocation3] sm:$0xff] }
 0x966   :  { %3081 = vmatmul.bf16.vlgmr.msra.gmra.mxu0 %v3393_v40 }
 0x99c   :  { %v3453_v26 = vpop.permute.xlu0 %3452 }
 0x99d   :  { %v3455_v34 = vunpack.i.h.bf16 %v3453_v26  ;;  %v3454_v44 = vunpack.i.l.bf16 %v3453_v26 }
 0x99f   :  { %v2979_v54 = vsel %vm2976_vm7, %v2974_v13, %v3454_v44  ;;  %v2980_v8 = vsel %vm2976_vm7, %v2975_v27, %v3455_v34 }
 0x9a0   :  { %v3411_v37 = vpack.c.bf16 %v2980_v8, %v2979_v54 }
 0x9a2   :  { %3413 = vst [vmem:[#allocation3 + $0x8] sm:$0xff] %v3411_v37  }
 0x9a9   :  { %v3394_v49 = vld [vmem:[#allocation3 + $0x8] sm:$0xff] }
 0x9aa   :  { %3086 = vmatmul.bf16.gmra.mxu0 %v3394_v49 }
 0x9e3   :  { %v3082_v22 = vpop.f32.mrf.mxu0 }
 0x9e4   :  { %v3083_v63 = vadd.f32 %v3456_v24, %v3082_v22 }
 0x9e6   :  { %v3096_v48 = vrot.slane %v3083_v63, 4  ;;  %v3104_v9 = vpack.c.bf16 %v3083_v63, %v3083_v63 }
 0x9e8   :  { %v3105_v31 = vpack.c.bf16 %v3096_v48, %v3096_v48  ;;  %3112 = vst [vmem:[#allocation12] sm:$0x3] %v3104_v9 }
 0x9ea   :  { %3113 = vst [vmem:[#allocation12 + $0x2] sm:$0x3] %v3105_v31 }
 0x9eb   :  { %v3084_v1 = vpop.f32.mrf.mxu0 }
 0x9ec   :  { %v3085_v52 = vadd.f32 %v3456_v24, %v3084_v1 }
 0x9ee   :  { %v3097_v56 = vrot.slane %v3085_v52, 4  ;;  %v3106_v2 = vpack.c.bf16 %v3085_v52, %v3085_v52 }
 0x9f0   :  { %v3107_v55 = vpack.c.bf16 %v3097_v56, %v3097_v56  ;;  %3114 = vst [vmem:[#allocation12 + $0x4] sm:$0x3] %v3106_v2 }
 0x9f2   :  { %3115 = vst [vmem:[#allocation12 + $0x6] sm:$0x3] %v3107_v55 }
 0xa27   :  { %v3087_v11 = vpop.f32.mrf.mxu0 }
 0xa28   :  { %v3088_v42 = vadd.f32 %v3456_v24, %v3087_v11 }
 0xa2a   :  { %v3098_v20 = vrot.slane %v3088_v42, 4  ;;  %v3108_v6 = vpack.c.bf16 %v3088_v42, %v3088_v42 }
 0xa2c   :  { %v3109_v47 = vpack.c.bf16 %v3098_v20, %v3098_v20  ;;  %3116 = vst [vmem:[#allocation12 + $0x8] sm:$0x3] %v3108_v6 }
 0xa2e   :  { %3117 = vst [vmem:[#allocation12 + $0xa] sm:$0x3] %v3109_v47 }
 0xa2f   :  { %v3089_v43 = vpop.f32.mrf.mxu0 }
 0xa30   :  { %v3090_v14 = vadd.f32 %v3456_v24, %v3089_v43 }
 0xa32   :  { %v3099_v25 = vrot.slane %v3090_v14, 4  ;;  %v3110_v38 = vpack.c.bf16 %v3090_v14, %v3090_v14 }
 0xa34   :  { %v3111_v50 = vpack.c.bf16 %v3099_v25, %v3099_v25  ;;  %3118 = vst [vmem:[#allocation12 + $0xc] sm:$0x3] %v3110_v38 }
 0xa36   :  { %3119 = vst [vmem:[#allocation12 + $0xe] sm:$0x3] %v3111_v50 }
 0xa37   :  { %3132 = dma.vmem_to_hbm [thread:$0]  %s3125_s12, 256, %s3127_s14, [#allocation6], %s3717_s9, %s3717_s9, %s3718_s10  }
 0xa38   :  { %3711 = dma.done.wait [#allocation6], 256  }
 0xa39   :  { %3712 = vsyncadd [#allocation6], 4294967040 }
 0xa3a   :  { %3141 = vsyncpa [#allocation5], 1 }
 0xa3b   :  { %3142 = vsyncpa [#allocation8], 1 }
 0xa3c   :  { %3143 = vsyncpa [#allocation11], 1 }
 0xa3d   :  { %3144 = vsyncpa [#allocation6], 1 }

</bundles_post_ra>
